<compile_context>
chip_gen: v7x
topology: tpu7x:2x2x1
jax: 0.10.0
libtpu: 0.0.40
codegen_flags: <defaults>
</compile_context>

<pallas_src>
import functools
import math

import jax
import jax.numpy as jnp
from jax.experimental import pallas as pl
from jax.experimental.pallas import tpu as pltpu

_LANES = 128
_SUB = 8                 # sublane rows per grid step -> 8 * 128 = 1024 boxes
_TINY = 1e-12


# ----------------------------- in-kernel helpers -----------------------------
def _corners(x, y, w, h, ang):
    """Corners of rotated boxes (mmcv box2corners convention), CCW order.

    All inputs (SUB, 128); returns two lists of four (SUB, 128) arrays."""
    c = jnp.cos(ang)
    s = jnp.sin(ang)
    hwc = 0.5 * w * c
    hws = 0.5 * w * s
    hhc = 0.5 * h * c
    hhs = 0.5 * h * s
    # local corners (+.5,+.5), (-.5,+.5), (-.5,-.5), (+.5,-.5) rotated by ang
    cx = [x + hwc - hhs, x - hwc - hhs, x - hwc + hhs, x + hwc + hhs]
    cy = [y + hws + hhc, y - hws + hhc, y - hws - hhc, y + hws - hhc]
    return cx, cy


def _clip(vx, vy, ax, ay, bx, by):
    """Clip a convex polygon (vertex-slot lists, CCW, consecutive duplicates
    allowed) by the half-plane to the LEFT of the directed edge a->b.

    Returns m+1 vertex slots; order is preserved and degenerate slots hold
    duplicated vertices that contribute zero area to the shoelace."""
    m = len(vx)
    ex = bx - ax
    ey = by - ay
    # signed distance to the clip line (>= 0  <=>  inside / on the line)
    d = [ex * (vy[k] - ay) - ey * (vx[k] - ax) for k in range(m)]
    inside = [dk >= 0.0 for dk in d]

    # intersection of every polygon edge (slot k-1 -> slot k) with the line.
    ix, iy = [], []
    for k in range(m):
        km = k - 1                      # python negative index == cyclic prev
        den = d[km] - d[k]
        # sign-preserving clamp away from 0; the value is only *selected* when
        # d[km], d[k] have opposite signs, where |den| = |d[km]| + |d[k]| > 0.
        den = jnp.where(jnp.abs(den) < _TINY,
                        jnp.where(den < 0.0, -_TINY, _TINY), den)
        t = d[km] * pl.reciprocal(den, approx=True)
        ix.append(vx[km] + t * (vx[k] - vx[km]))
        iy.append(vy[km] + t * (vy[k] - vy[km]))

    # at most one entering transition (outside -> inside) exists for a convex
    # polygon; pick its intersection point and slot index (last match wins,
    # which also keeps near-degenerate cases bounded).
    enter_x = jnp.zeros_like(ax)
    enter_y = jnp.zeros_like(ay)
    enter_pos = jnp.full_like(ax, float(m))      # default: append at the end
    for k in range(m):
        ent = jnp.logical_and(jnp.logical_not(inside[k - 1]), inside[k])
        enter_x = jnp.where(ent, ix[k], enter_x)
        enter_y = jnp.where(ent, iy[k], enter_y)
        enter_pos = jnp.where(ent, float(k), enter_pos)
    has_enter = enter_pos < float(m)

    # same-count, order-preserving mapping of every slot:
    #   inside vertex                  -> itself
    #   first outside (prev inside)    -> exit intersection on edge (prev, k)
    #   other outside                  -> entering intersection (duplicate)
    mx, my = [], []
    for k in range(m):
        exit_x = jnp.where(inside[k - 1], ix[k], enter_x)
        exit_y = jnp.where(inside[k - 1], iy[k], enter_y)
        mx.append(jnp.where(inside[k], vx[k], exit_x))
        my.append(jnp.where(inside[k], vy[k], exit_y))

    # vertex inserted at slot `enter_pos`: the entering intersection, or a
    # duplicate of the last mapped slot when nothing enters.
    vix = jnp.where(has_enter, enter_x, mx[m - 1])
    viy = jnp.where(has_enter, enter_y, my[m - 1])

    out_x, out_y = [], []
    for s in range(m + 1):
        before = enter_pos > float(s)
        at_ins = enter_pos == float(s)
        cur_x = mx[s] if s < m else mx[m - 1]       # selected only when before
        cur_y = my[s] if s < m else my[m - 1]
        prv_x = mx[s - 1] if s > 0 else mx[m - 1]   # selected only when after
        prv_y = my[s - 1] if s > 0 else my[m - 1]
        out_x.append(jnp.where(before, cur_x, jnp.where(at_ins, vix, prv_x)))
        out_y.append(jnp.where(before, cur_y, jnp.where(at_ins, viy, prv_y)))
    return out_x, out_y


def _shoelace(vx, vy):
    """Polygon area from fixed vertex slots; pure VPU, no XLU reductions."""
    m = len(vx)
    area2 = vx[m - 1] * vy[0] - vy[m - 1] * vx[0]
    for k in range(m - 1):
        area2 = area2 + (vx[k] * vy[k + 1] - vy[k] * vx[k + 1])
    return 0.5 * jnp.abs(area2)


# --------------------------------- kernel ------------------------------------
def _riou_kernel(pred_ref, tgt_ref, out_ref, *, mode, eps):
    p = pred_ref[...].astype(jnp.float32)   # (5, SUB, 128)
    t = tgt_ref[...].astype(jnp.float32)    # (5, SUB, 128)
    px, py, pw, ph, pa = p[0], p[1], p[2], p[3], p[4]
    tx, ty, tw, th, ta = t[0], t[1], t[2], t[3], t[4]

    pcx, pcy = _corners(px, py, pw, ph, pa)
    tcx, tcy = _corners(tx, ty, tw, th, ta)

    # Sutherland-Hodgman: clip pred box by the 4 CCW edges of the target box.
    # Fixed slot growth 4 -> 5 -> 6 -> 7 -> 8 (max possible vertex count).
    poly_x, poly_y = list(pcx), list(pcy)
    for j in range(4):
        jn = (j + 1) % 4
        poly_x, poly_y = _clip(poly_x, poly_y,
                               tcx[j], tcy[j], tcx[jn], tcy[jn])

    inter = _shoelace(poly_x, poly_y)            # (SUB, 128)
    union = pw * ph + tw * th - inter
    iou = jnp.maximum(inter / union, eps)        # ious.clamp(min=eps)
    if mode == 'linear':
        loss = 1.0 - iou
    elif mode == 'square':
        loss = 1.0 - iou * iou
    else:  # 'log'
        loss = -jnp.log(iou)
    out_ref[...] = loss.astype(out_ref.dtype)


# --------------------------------- wrapper ------------------------------------
@functools.partial(jax.jit, static_argnames=('mode', 'eps'))
def rotated_iou_loss_elementwise(pred, target, mode='log', eps=1e-6):
    """Per-box rotated IoU loss, input (n, 5) [x, y, w, h, angle] -> (n,)."""
    assert pred.ndim == 2 and pred.shape[-1] == 5 and pred.shape == target.shape
    n = pred.shape[0]
    rows = max(_SUB, -(-n // _LANES))            # ceil(n / 128), >= 8
    rows = -(-rows // _SUB) * _SUB               # multiple of 8
    n_pad = rows * _LANES
    dummy = jnp.array([0.0, 0.0, 1.0, 1.0, 0.0], jnp.float32)

    def prep(b):
        b = b.astype(jnp.float32)
        pad = jnp.tile(dummy[None, :], (n_pad - n, 1))
        b = jnp.concatenate([b, pad], axis=0)    # (n_pad, 5)
        # field-major, lane-dense: (5, rows, 128); box index = r * 128 + lane
        return b.T.reshape(5, rows, _LANES)

    kern = functools.partial(_riou_kernel, mode=mode, eps=float(eps))
    out = pl.pallas_call(
        kern,
        out_shape=jax.ShapeDtypeStruct((rows, _LANES), jnp.float32),
        grid_spec=pltpu.PrefetchScalarGridSpec(
            num_scalar_prefetch=0,
            grid=(rows // _SUB,),
            in_specs=[pl.BlockSpec((5, _SUB, _LANES), lambda i: (0, i, 0)),
                      pl.BlockSpec((5, _SUB, _LANES), lambda i: (0, i, 0))],
            out_specs=pl.BlockSpec((_SUB, _LANES), lambda i: (i, 0))),
        compiler_params=pltpu.CompilerParams(
            dimension_semantics=("parallel",)),
    )(prep(pred), prep(target))
    return out.reshape(-1)[:n]


def weight_reduce_loss(loss, weight=None, reduction='mean', avg_factor=None):
    if weight is not None:
        loss = loss * weight
    if avg_factor is None:
        if reduction == 'mean':
            return loss.mean()
        if reduction == 'sum':
            return loss.sum()
        return loss
    if reduction == 'mean':
        return loss.sum() / avg_factor
    if reduction == 'none':
        return loss
    raise ValueError('avg_factor can not be used with reduction="sum"')


class RotatedIoULossPallas:
    """JAX/Pallas port of mmdet3d RotatedIoULoss (forward only)."""

    def __init__(self, linear=False, eps=1e-6, reduction='mean',
                 loss_weight=1.0, mode='log'):
        assert mode in ('linear', 'square', 'log')
        if linear:
            mode = 'linear'
        self.mode = mode
        self.eps = eps
        self.reduction = reduction
        self.loss_weight = loss_weight

    def __call__(self, pred, target, weight=None, avg_factor=None,
                 reduction_override=None):
        assert reduction_override in (None, 'none', 'mean', 'sum')
        reduction = reduction_override if reduction_override else self.reduction
        if (weight is not None and (not bool(jnp.any(weight > 0)))
                and reduction != 'none'):
            if pred.ndim == weight.ndim + 1:
                weight = weight[:, None]
            return (pred * weight).sum()
        if weight is not None and weight.ndim > 1:
            assert weight.shape == pred.shape
            weight = weight.mean(-1)
        loss_elem = rotated_iou_loss_elementwise(
            pred, target, mode=self.mode, eps=self.eps)
        return self.loss_weight * weight_reduce_loss(
            loss_elem, weight, reduction, avg_factor)


# ----------------------------------- demo -------------------------------------
if __name__ == "__main__":
    key = jax.random.PRNGKey(0)
    n = 8
    ks = jax.random.split(key, 6)
    xy_p = jax.random.uniform(ks[0], (n, 2), minval=-2.0, maxval=2.0)
    wh_p = jax.random.uniform(ks[1], (n, 2), minval=0.5, maxval=2.0)
    ang_p = jax.random.uniform(ks[2], (n, 1), minval=-3.1, maxval=3.1)
    pred = jnp.concatenate([xy_p, wh_p, ang_p], axis=-1)          # (8, 5)

    xy_t = xy_p + jax.random.uniform(ks[3], (n, 2), minval=-0.3, maxval=0.3)
    wh_t = jax.random.uniform(ks[4], (n, 2), minval=0.5, maxval=2.0)
    ang_t = ang_p + jax.random.uniform(ks[5], (n, 1), minval=-0.3, maxval=0.3)
    target = jnp.concatenate([xy_t, wh_t, ang_t], axis=-1)        # (8, 5)

    loss_fn = RotatedIoULossPallas(mode='log', reduction='mean', loss_weight=1.0)
    loss = jax.block_until_ready(loss_fn(pred, target))
    assert bool(jnp.isfinite(loss)), loss

    # sanity 1: identical boxes -> IoU 1 -> -log(1) ~ 0
    loss_same = jax.block_until_ready(loss_fn(pred, pred))
    assert abs(float(loss_same)) < 1e-3, float(loss_same)

    # sanity 2: axis-aligned analytic case, IoU = 1/3
    # (tolerance loosened: approx EUP reciprocal adds ~1e-3-level IoU error)
    p0 = jnp.array([[0.0, 0.0, 2.0, 2.0, 0.0]], jnp.float32)
    t0 = jnp.array([[1.0, 0.0, 2.0, 2.0, 0.0]], jnp.float32)
    l0 = jax.block_until_ready(loss_fn(p0, t0, reduction_override='none'))
    assert abs(float(l0[0]) - (-math.log(1.0 / 3.0))) < 2e-2, l0

    # sanity 3: square vs its 45-degree rotation (octagon intersection)
    p1 = jnp.array([[0.0, 0.0, 2.0, 2.0, 0.0]], jnp.float32)
    t1 = jnp.array([[0.0, 0.0, 2.0, 2.0, math.pi / 4.0]], jnp.float32)
    inter = 8.0 * (math.sqrt(2.0) - 1.0)
    iou_exp = inter / (8.0 - inter)
    l1 = jax.block_until_ready(loss_fn(p1, t1, reduction_override='none'))
    assert abs(float(l1[0]) - (-math.log(iou_exp))) < 2e-2, l1

    # multi-grid-step path (>= 2 steps of 1024 boxes)
    kb = jax.random.split(jax.random.PRNGKey(1), 6)
    nb = 2500
    xy_pb = jax.random.uniform(kb[0], (nb, 2), minval=-4.0, maxval=4.0)
    wh_pb = jax.random.uniform(kb[1], (nb, 2), minval=0.5, maxval=3.0)
    an_pb = jax.random.uniform(kb[2], (nb, 1), minval=-3.1, maxval=3.1)
    pred_b = jnp.concatenate([xy_pb, wh_pb, an_pb], axis=-1)
    xy_tb = xy_pb + jax.random.uniform(kb[3], (nb, 2), minval=-0.5, maxval=0.5)
    wh_tb = jax.random.uniform(kb[4], (nb, 2), minval=0.5, maxval=3.0)
    an_tb = an_pb + jax.random.uniform(kb[5], (nb, 1), minval=-0.5, maxval=0.5)
    target_b = jnp.concatenate([xy_tb, wh_tb, an_tb], axis=-1)
    loss_big = jax.block_until_ready(loss_fn(pred_b, target_b))
    assert bool(jnp.isfinite(loss_big)), loss_big

    print("KERNEL_OK")
</pallas_src>

<mosaic_0001>
module attributes {stable_mosaic.version = 11 : i64} {
  func.func @_riou_kernel(%arg0: i32, %arg1: memref<5x8x128xf32, #tpu.memory_space<vmem>>, %arg2: memref<5x8x128xf32, #tpu.memory_space<vmem>>, %arg3: memref<8x128xf32, #tpu.memory_space<vmem>>) attributes {dimension_semantics = [#tpu.dimension_semantics<parallel>], iteration_bounds = array<i64: 1>, scalar_prefetch = 0 : i64, scratch_operands = 0 : i64, tpu.core_type = #tpu.core_type<tc>, window_params = [{transform_indices = @transform_0, window_bounds = array<i64: 5, 8, 128>}, {transform_indices = @transform_1, window_bounds = array<i64: 5, 8, 128>}, {transform_indices = @transform_2, window_bounds = array<i64: 8, 128>}]} {
    %c0 = arith.constant 0 : index
    %c0_0 = arith.constant 0 : index
    %c0_1 = arith.constant 0 : index
    %0 = vector.load %arg1[%c0, %c0_0, %c0_1] : memref<5x8x128xf32, #tpu.memory_space<vmem>>, vector<5x8x128xf32>
    %c0_2 = arith.constant 0 : index
    %c0_3 = arith.constant 0 : index
    %c0_4 = arith.constant 0 : index
    %1 = vector.load %arg2[%c0_2, %c0_3, %c0_4] : memref<5x8x128xf32, #tpu.memory_space<vmem>>, vector<5x8x128xf32>
    %2 = vector.extract_strided_slice %0 {offsets = [0, 0, 0], sizes = [1, 8, 128], strides = [1, 1, 1]} : vector<5x8x128xf32> to vector<1x8x128xf32>
    %3 = vector.shape_cast %2 : vector<1x8x128xf32> to vector<8x128xf32>
    %4 = vector.extract_strided_slice %0 {offsets = [1, 0, 0], sizes = [1, 8, 128], strides = [1, 1, 1]} : vector<5x8x128xf32> to vector<1x8x128xf32>
    %5 = vector.shape_cast %4 : vector<1x8x128xf32> to vector<8x128xf32>
    %6 = vector.extract_strided_slice %0 {offsets = [2, 0, 0], sizes = [1, 8, 128], strides = [1, 1, 1]} : vector<5x8x128xf32> to vector<1x8x128xf32>
    %7 = vector.shape_cast %6 : vector<1x8x128xf32> to vector<8x128xf32>
    %8 = vector.extract_strided_slice %0 {offsets = [3, 0, 0], sizes = [1, 8, 128], strides = [1, 1, 1]} : vector<5x8x128xf32> to vector<1x8x128xf32>
    %9 = vector.shape_cast %8 : vector<1x8x128xf32> to vector<8x128xf32>
    %10 = vector.extract_strided_slice %0 {offsets = [4, 0, 0], sizes = [1, 8, 128], strides = [1, 1, 1]} : vector<5x8x128xf32> to vector<1x8x128xf32>
    %11 = vector.shape_cast %10 : vector<1x8x128xf32> to vector<8x128xf32>
    %12 = vector.extract_strided_slice %1 {offsets = [0, 0, 0], sizes = [1, 8, 128], strides = [1, 1, 1]} : vector<5x8x128xf32> to vector<1x8x128xf32>
    %13 = vector.shape_cast %12 : vector<1x8x128xf32> to vector<8x128xf32>
    %14 = vector.extract_strided_slice %1 {offsets = [1, 0, 0], sizes = [1, 8, 128], strides = [1, 1, 1]} : vector<5x8x128xf32> to vector<1x8x128xf32>
    %15 = vector.shape_cast %14 : vector<1x8x128xf32> to vector<8x128xf32>
    %16 = vector.extract_strided_slice %1 {offsets = [2, 0, 0], sizes = [1, 8, 128], strides = [1, 1, 1]} : vector<5x8x128xf32> to vector<1x8x128xf32>
    %17 = vector.shape_cast %16 : vector<1x8x128xf32> to vector<8x128xf32>
    %18 = vector.extract_strided_slice %1 {offsets = [3, 0, 0], sizes = [1, 8, 128], strides = [1, 1, 1]} : vector<5x8x128xf32> to vector<1x8x128xf32>
    %19 = vector.shape_cast %18 : vector<1x8x128xf32> to vector<8x128xf32>
    %20 = vector.extract_strided_slice %1 {offsets = [4, 0, 0], sizes = [1, 8, 128], strides = [1, 1, 1]} : vector<5x8x128xf32> to vector<1x8x128xf32>
    %21 = vector.shape_cast %20 : vector<1x8x128xf32> to vector<8x128xf32>
    %22 = math.cos %11 : vector<8x128xf32>
    %23 = math.sin %11 : vector<8x128xf32>
    %cst = arith.constant 5.000000e-01 : f32
    %24 = vector.broadcast %cst : f32 to vector<8x128xf32>
    %25 = arith.mulf %24, %7 : vector<8x128xf32>
    %26 = arith.mulf %25, %22 : vector<8x128xf32>
    %cst_5 = arith.constant 5.000000e-01 : f32
    %27 = vector.broadcast %cst_5 : f32 to vector<8x128xf32>
    %28 = arith.mulf %27, %7 : vector<8x128xf32>
    %29 = arith.mulf %28, %23 : vector<8x128xf32>
    %cst_6 = arith.constant 5.000000e-01 : f32
    %30 = vector.broadcast %cst_6 : f32 to vector<8x128xf32>
    %31 = arith.mulf %30, %9 : vector<8x128xf32>
    %32 = arith.mulf %31, %22 : vector<8x128xf32>
    %cst_7 = arith.constant 5.000000e-01 : f32
    %33 = vector.broadcast %cst_7 : f32 to vector<8x128xf32>
    %34 = arith.mulf %33, %9 : vector<8x128xf32>
    %35 = arith.mulf %34, %23 : vector<8x128xf32>
    %36 = arith.addf %3, %26 : vector<8x128xf32>
    %37 = arith.subf %36, %35 : vector<8x128xf32>
    %38 = arith.subf %3, %26 : vector<8x128xf32>
    %39 = arith.subf %38, %35 : vector<8x128xf32>
    %40 = arith.subf %3, %26 : vector<8x128xf32>
    %41 = arith.addf %40, %35 : vector<8x128xf32>
    %42 = arith.addf %3, %26 : vector<8x128xf32>
    %43 = arith.addf %42, %35 : vector<8x128xf32>
    %44 = arith.addf %5, %29 : vector<8x128xf32>
    %45 = arith.addf %44, %32 : vector<8x128xf32>
    %46 = arith.subf %5, %29 : vector<8x128xf32>
    %47 = arith.addf %46, %32 : vector<8x128xf32>
    %48 = arith.subf %5, %29 : vector<8x128xf32>
    %49 = arith.subf %48, %32 : vector<8x128xf32>
    %50 = arith.addf %5, %29 : vector<8x128xf32>
    %51 = arith.subf %50, %32 : vector<8x128xf32>
    %52 = math.cos %21 : vector<8x128xf32>
    %53 = math.sin %21 : vector<8x128xf32>
    %cst_8 = arith.constant 5.000000e-01 : f32
    %54 = vector.broadcast %cst_8 : f32 to vector<8x128xf32>
    %55 = arith.mulf %54, %17 : vector<8x128xf32>
    %56 = arith.mulf %55, %52 : vector<8x128xf32>
    %cst_9 = arith.constant 5.000000e-01 : f32
    %57 = vector.broadcast %cst_9 : f32 to vector<8x128xf32>
    %58 = arith.mulf %57, %17 : vector<8x128xf32>
    %59 = arith.mulf %58, %53 : vector<8x128xf32>
    %cst_10 = arith.constant 5.000000e-01 : f32
    %60 = vector.broadcast %cst_10 : f32 to vector<8x128xf32>
    %61 = arith.mulf %60, %19 : vector<8x128xf32>
    %62 = arith.mulf %61, %52 : vector<8x128xf32>
    %cst_11 = arith.constant 5.000000e-01 : f32
    %63 = vector.broadcast %cst_11 : f32 to vector<8x128xf32>
    %64 = arith.mulf %63, %19 : vector<8x128xf32>
    %65 = arith.mulf %64, %53 : vector<8x128xf32>
    %66 = arith.addf %13, %56 : vector<8x128xf32>
    %67 = arith.subf %66, %65 : vector<8x128xf32>
    %68 = arith.subf %13, %56 : vector<8x128xf32>
    %69 = arith.subf %68, %65 : vector<8x128xf32>
    %70 = arith.subf %13, %56 : vector<8x128xf32>
    %71 = arith.addf %70, %65 : vector<8x128xf32>
    %72 = arith.addf %13, %56 : vector<8x128xf32>
    %73 = arith.addf %72, %65 : vector<8x128xf32>
    %74 = arith.addf %15, %59 : vector<8x128xf32>
    %75 = arith.addf %74, %62 : vector<8x128xf32>
    %76 = arith.subf %15, %59 : vector<8x128xf32>
    %77 = arith.addf %76, %62 : vector<8x128xf32>
    %78 = arith.subf %15, %59 : vector<8x128xf32>
    %79 = arith.subf %78, %62 : vector<8x128xf32>
    %80 = arith.addf %15, %59 : vector<8x128xf32>
    %81 = arith.subf %80, %62 : vector<8x128xf32>
    %82 = arith.subf %69, %67 : vector<8x128xf32>
    %83 = arith.subf %77, %75 : vector<8x128xf32>
    %84 = arith.subf %45, %75 : vector<8x128xf32>
    %85 = arith.mulf %82, %84 : vector<8x128xf32>
    %86 = arith.subf %37, %67 : vector<8x128xf32>
    %87 = arith.mulf %83, %86 : vector<8x128xf32>
    %88 = arith.subf %85, %87 : vector<8x128xf32>
    %89 = arith.subf %47, %75 : vector<8x128xf32>
    %90 = arith.mulf %82, %89 : vector<8x128xf32>
    %91 = arith.subf %39, %67 : vector<8x128xf32>
    %92 = arith.mulf %83, %91 : vector<8x128xf32>
    %93 = arith.subf %90, %92 : vector<8x128xf32>
    %94 = arith.subf %49, %75 : vector<8x128xf32>
    %95 = arith.mulf %82, %94 : vector<8x128xf32>
    %96 = arith.subf %41, %67 : vector<8x128xf32>
    %97 = arith.mulf %83, %96 : vector<8x128xf32>
    %98 = arith.subf %95, %97 : vector<8x128xf32>
    %99 = arith.subf %51, %75 : vector<8x128xf32>
    %100 = arith.mulf %82, %99 : vector<8x128xf32>
    %101 = arith.subf %43, %67 : vector<8x128xf32>
    %102 = arith.mulf %83, %101 : vector<8x128xf32>
    %103 = arith.subf %100, %102 : vector<8x128xf32>
    %cst_12 = arith.constant 0.000000e+00 : f32
    %104 = vector.broadcast %cst_12 : f32 to vector<8x128xf32>
    %105 = arith.cmpf oge, %88, %104 : vector<8x128xf32>
    %cst_13 = arith.constant 0.000000e+00 : f32
    %106 = vector.broadcast %cst_13 : f32 to vector<8x128xf32>
    %107 = arith.cmpf oge, %93, %106 : vector<8x128xf32>
    %cst_14 = arith.constant 0.000000e+00 : f32
    %108 = vector.broadcast %cst_14 : f32 to vector<8x128xf32>
    %109 = arith.cmpf oge, %98, %108 : vector<8x128xf32>
    %cst_15 = arith.constant 0.000000e+00 : f32
    %110 = vector.broadcast %cst_15 : f32 to vector<8x128xf32>
    %111 = arith.cmpf oge, %103, %110 : vector<8x128xf32>
    %112 = arith.subf %103, %88 : vector<8x128xf32>
    %113 = math.absf %112 : vector<8x128xf32>
    %cst_16 = arith.constant 9.99999996E-13 : f32
    %114 = vector.broadcast %cst_16 : f32 to vector<8x128xf32>
    %115 = arith.cmpf olt, %113, %114 : vector<8x128xf32>
    %cst_17 = arith.constant 0.000000e+00 : f32
    %116 = vector.broadcast %cst_17 : f32 to vector<8x128xf32>
    %117 = arith.cmpf olt, %112, %116 : vector<8x128xf32>
    %cst_18 = arith.constant -9.99999996E-13 : f32
    %cst_19 = arith.constant 9.99999996E-13 : f32
    %118 = vector.broadcast %cst_18 : f32 to vector<8x128xf32>
    %119 = vector.broadcast %cst_19 : f32 to vector<8x128xf32>
    %120 = arith.select %117, %118, %119 : vector<8x128xi1>, vector<8x128xf32>
    %121 = arith.select %115, %120, %112 : vector<8x128xi1>, vector<8x128xf32>
    %122 = tpu.reciprocal %121 {approx = true} : vector<8x128xf32> -> vector<8x128xf32>
    %123 = arith.mulf %103, %122 : vector<8x128xf32>
    %124 = arith.subf %37, %43 : vector<8x128xf32>
    %125 = arith.mulf %123, %124 : vector<8x128xf32>
    %126 = arith.addf %43, %125 : vector<8x128xf32>
    %127 = arith.subf %45, %51 : vector<8x128xf32>
    %128 = arith.mulf %123, %127 : vector<8x128xf32>
    %129 = arith.addf %51, %128 : vector<8x128xf32>
    %130 = arith.subf %88, %93 : vector<8x128xf32>
    %131 = math.absf %130 : vector<8x128xf32>
    %cst_20 = arith.constant 9.99999996E-13 : f32
    %132 = vector.broadcast %cst_20 : f32 to vector<8x128xf32>
    %133 = arith.cmpf olt, %131, %132 : vector<8x128xf32>
    %cst_21 = arith.constant 0.000000e+00 : f32
    %134 = vector.broadcast %cst_21 : f32 to vector<8x128xf32>
    %135 = arith.cmpf olt, %130, %134 : vector<8x128xf32>
    %cst_22 = arith.constant -9.99999996E-13 : f32
    %cst_23 = arith.constant 9.99999996E-13 : f32
    %136 = vector.broadcast %cst_22 : f32 to vector<8x128xf32>
    %137 = vector.broadcast %cst_23 : f32 to vector<8x128xf32>
    %138 = arith.select %135, %136, %137 : vector<8x128xi1>, vector<8x128xf32>
    %139 = arith.select %133, %138, %130 : vector<8x128xi1>, vector<8x128xf32>
    %140 = tpu.reciprocal %139 {approx = true} : vector<8x128xf32> -> vector<8x128xf32>
    %141 = arith.mulf %88, %140 : vector<8x128xf32>
    %142 = arith.subf %39, %37 : vector<8x128xf32>
    %143 = arith.mulf %141, %142 : vector<8x128xf32>
    %144 = arith.addf %37, %143 : vector<8x128xf32>
    %145 = arith.subf %47, %45 : vector<8x128xf32>
    %146 = arith.mulf %141, %145 : vector<8x128xf32>
    %147 = arith.addf %45, %146 : vector<8x128xf32>
    %148 = arith.subf %93, %98 : vector<8x128xf32>
    %149 = math.absf %148 : vector<8x128xf32>
    %cst_24 = arith.constant 9.99999996E-13 : f32
    %150 = vector.broadcast %cst_24 : f32 to vector<8x128xf32>
    %151 = arith.cmpf olt, %149, %150 : vector<8x128xf32>
    %cst_25 = arith.constant 0.000000e+00 : f32
    %152 = vector.broadcast %cst_25 : f32 to vector<8x128xf32>
    %153 = arith.cmpf olt, %148, %152 : vector<8x128xf32>
    %cst_26 = arith.constant -9.99999996E-13 : f32
    %cst_27 = arith.constant 9.99999996E-13 : f32
    %154 = vector.broadcast %cst_26 : f32 to vector<8x128xf32>
    %155 = vector.broadcast %cst_27 : f32 to vector<8x128xf32>
    %156 = arith.select %153, %154, %155 : vector<8x128xi1>, vector<8x128xf32>
    %157 = arith.select %151, %156, %148 : vector<8x128xi1>, vector<8x128xf32>
    %158 = tpu.reciprocal %157 {approx = true} : vector<8x128xf32> -> vector<8x128xf32>
    %159 = arith.mulf %93, %158 : vector<8x128xf32>
    %160 = arith.subf %41, %39 : vector<8x128xf32>
    %161 = arith.mulf %159, %160 : vector<8x128xf32>
    %162 = arith.addf %39, %161 : vector<8x128xf32>
    %163 = arith.subf %49, %47 : vector<8x128xf32>
    %164 = arith.mulf %159, %163 : vector<8x128xf32>
    %165 = arith.addf %47, %164 : vector<8x128xf32>
    %166 = arith.subf %98, %103 : vector<8x128xf32>
    %167 = math.absf %166 : vector<8x128xf32>
    %cst_28 = arith.constant 9.99999996E-13 : f32
    %168 = vector.broadcast %cst_28 : f32 to vector<8x128xf32>
    %169 = arith.cmpf olt, %167, %168 : vector<8x128xf32>
    %cst_29 = arith.constant 0.000000e+00 : f32
    %170 = vector.broadcast %cst_29 : f32 to vector<8x128xf32>
    %171 = arith.cmpf olt, %166, %170 : vector<8x128xf32>
    %cst_30 = arith.constant -9.99999996E-13 : f32
    %cst_31 = arith.constant 9.99999996E-13 : f32
    %172 = vector.broadcast %cst_30 : f32 to vector<8x128xf32>
    %173 = vector.broadcast %cst_31 : f32 to vector<8x128xf32>
    %174 = arith.select %171, %172, %173 : vector<8x128xi1>, vector<8x128xf32>
    %175 = arith.select %169, %174, %166 : vector<8x128xi1>, vector<8x128xf32>
    %176 = tpu.reciprocal %175 {approx = true} : vector<8x128xf32> -> vector<8x128xf32>
    %177 = arith.mulf %98, %176 : vector<8x128xf32>
    %178 = arith.subf %43, %41 : vector<8x128xf32>
    %179 = arith.mulf %177, %178 : vector<8x128xf32>
    %180 = arith.addf %41, %179 : vector<8x128xf32>
    %181 = arith.subf %51, %49 : vector<8x128xf32>
    %182 = arith.mulf %177, %181 : vector<8x128xf32>
    %183 = arith.addf %49, %182 : vector<8x128xf32>
    %cst_32 = arith.constant 0.000000e+00 : f32
    %184 = vector.broadcast %cst_32 : f32 to vector<8x128xf32>
    %cst_33 = arith.constant 0.000000e+00 : f32
    %185 = vector.broadcast %cst_33 : f32 to vector<8x128xf32>
    %cst_34 = arith.constant 4.000000e+00 : f32
    %186 = vector.broadcast %cst_34 : f32 to vector<8x128xf32>
    %cst_35 = arith.constant dense<true> : vector<8x128xi1>
    %187 = arith.xori %111, %cst_35 : vector<8x128xi1>
    %188 = arith.andi %187, %105 : vector<8x128xi1>
    %189 = arith.select %188, %126, %184 : vector<8x128xi1>, vector<8x128xf32>
    %190 = arith.select %188, %129, %185 : vector<8x128xi1>, vector<8x128xf32>
    %cst_36 = arith.constant 0.000000e+00 : f32
    %191 = vector.broadcast %cst_36 : f32 to vector<8x128xf32>
    %192 = arith.select %188, %191, %186 : vector<8x128xi1>, vector<8x128xf32>
    %cst_37 = arith.constant dense<true> : vector<8x128xi1>
    %193 = arith.xori %105, %cst_37 : vector<8x128xi1>
    %194 = arith.andi %193, %107 : vector<8x128xi1>
    %195 = arith.select %194, %144, %189 : vector<8x128xi1>, vector<8x128xf32>
    %196 = arith.select %194, %147, %190 : vector<8x128xi1>, vector<8x128xf32>
    %cst_38 = arith.constant 1.000000e+00 : f32
    %197 = vector.broadcast %cst_38 : f32 to vector<8x128xf32>
    %198 = arith.select %194, %197, %192 : vector<8x128xi1>, vector<8x128xf32>
    %cst_39 = arith.constant dense<true> : vector<8x128xi1>
    %199 = arith.xori %107, %cst_39 : vector<8x128xi1>
    %200 = arith.andi %199, %109 : vector<8x128xi1>
    %201 = arith.select %200, %162, %195 : vector<8x128xi1>, vector<8x128xf32>
    %202 = arith.select %200, %165, %196 : vector<8x128xi1>, vector<8x128xf32>
    %cst_40 = arith.constant 2.000000e+00 : f32
    %203 = vector.broadcast %cst_40 : f32 to vector<8x128xf32>
    %204 = arith.select %200, %203, %198 : vector<8x128xi1>, vector<8x128xf32>
    %cst_41 = arith.constant dense<true> : vector<8x128xi1>
    %205 = arith.xori %109, %cst_41 : vector<8x128xi1>
    %206 = arith.andi %205, %111 : vector<8x128xi1>
    %207 = arith.select %206, %180, %201 : vector<8x128xi1>, vector<8x128xf32>
    %208 = arith.select %206, %183, %202 : vector<8x128xi1>, vector<8x128xf32>
    %cst_42 = arith.constant 3.000000e+00 : f32
    %209 = vector.broadcast %cst_42 : f32 to vector<8x128xf32>
    %210 = arith.select %206, %209, %204 : vector<8x128xi1>, vector<8x128xf32>
    %cst_43 = arith.constant 4.000000e+00 : f32
    %211 = vector.broadcast %cst_43 : f32 to vector<8x128xf32>
    %212 = arith.cmpf olt, %210, %211 : vector<8x128xf32>
    %213 = arith.select %111, %126, %207 : vector<8x128xi1>, vector<8x128xf32>
    %214 = arith.select %111, %129, %208 : vector<8x128xi1>, vector<8x128xf32>
    %215 = arith.select %105, %37, %213 : vector<8x128xi1>, vector<8x128xf32>
    %216 = arith.select %105, %45, %214 : vector<8x128xi1>, vector<8x128xf32>
    %217 = arith.select %105, %144, %207 : vector<8x128xi1>, vector<8x128xf32>
    %218 = arith.select %105, %147, %208 : vector<8x128xi1>, vector<8x128xf32>
    %219 = arith.select %107, %39, %217 : vector<8x128xi1>, vector<8x128xf32>
    %220 = arith.select %107, %47, %218 : vector<8x128xi1>, vector<8x128xf32>
    %221 = arith.select %107, %162, %207 : vector<8x128xi1>, vector<8x128xf32>
    %222 = arith.select %107, %165, %208 : vector<8x128xi1>, vector<8x128xf32>
    %223 = arith.select %109, %41, %221 : vector<8x128xi1>, vector<8x128xf32>
    %224 = arith.select %109, %49, %222 : vector<8x128xi1>, vector<8x128xf32>
    %225 = arith.select %109, %180, %207 : vector<8x128xi1>, vector<8x128xf32>
    %226 = arith.select %109, %183, %208 : vector<8x128xi1>, vector<8x128xf32>
    %227 = arith.select %111, %43, %225 : vector<8x128xi1>, vector<8x128xf32>
    %228 = arith.select %111, %51, %226 : vector<8x128xi1>, vector<8x128xf32>
    %229 = arith.select %212, %207, %227 : vector<8x128xi1>, vector<8x128xf32>
    %230 = arith.select %212, %208, %228 : vector<8x128xi1>, vector<8x128xf32>
    %cst_44 = arith.constant 0.000000e+00 : f32
    %231 = vector.broadcast %cst_44 : f32 to vector<8x128xf32>
    %232 = arith.cmpf ogt, %210, %231 : vector<8x128xf32>
    %cst_45 = arith.constant 0.000000e+00 : f32
    %233 = vector.broadcast %cst_45 : f32 to vector<8x128xf32>
    %234 = arith.cmpf oeq, %210, %233 : vector<8x128xf32>
    %235 = arith.select %234, %229, %227 : vector<8x128xi1>, vector<8x128xf32>
    %236 = arith.select %232, %215, %235 : vector<8x128xi1>, vector<8x128xf32>
    %237 = arith.select %234, %230, %228 : vector<8x128xi1>, vector<8x128xf32>
    %238 = arith.select %232, %216, %237 : vector<8x128xi1>, vector<8x128xf32>
    %cst_46 = arith.constant 1.000000e+00 : f32
    %239 = vector.broadcast %cst_46 : f32 to vector<8x128xf32>
    %240 = arith.cmpf ogt, %210, %239 : vector<8x128xf32>
    %cst_47 = arith.constant 1.000000e+00 : f32
    %241 = vector.broadcast %cst_47 : f32 to vector<8x128xf32>
    %242 = arith.cmpf oeq, %210, %241 : vector<8x128xf32>
    %243 = arith.select %242, %229, %215 : vector<8x128xi1>, vector<8x128xf32>
    %244 = arith.select %240, %219, %243 : vector<8x128xi1>, vector<8x128xf32>
    %245 = arith.select %242, %230, %216 : vector<8x128xi1>, vector<8x128xf32>
    %246 = arith.select %240, %220, %245 : vector<8x128xi1>, vector<8x128xf32>
    %cst_48 = arith.constant 2.000000e+00 : f32
    %247 = vector.broadcast %cst_48 : f32 to vector<8x128xf32>
    %248 = arith.cmpf ogt, %210, %247 : vector<8x128xf32>
    %cst_49 = arith.constant 2.000000e+00 : f32
    %249 = vector.broadcast %cst_49 : f32 to vector<8x128xf32>
    %250 = arith.cmpf oeq, %210, %249 : vector<8x128xf32>
    %251 = arith.select %250, %229, %219 : vector<8x128xi1>, vector<8x128xf32>
    %252 = arith.select %248, %223, %251 : vector<8x128xi1>, vector<8x128xf32>
    %253 = arith.select %250, %230, %220 : vector<8x128xi1>, vector<8x128xf32>
    %254 = arith.select %248, %224, %253 : vector<8x128xi1>, vector<8x128xf32>
    %cst_50 = arith.constant 3.000000e+00 : f32
    %255 = vector.broadcast %cst_50 : f32 to vector<8x128xf32>
    %256 = arith.cmpf ogt, %210, %255 : vector<8x128xf32>
    %cst_51 = arith.constant 3.000000e+00 : f32
    %257 = vector.broadcast %cst_51 : f32 to vector<8x128xf32>
    %258 = arith.cmpf oeq, %210, %257 : vector<8x128xf32>
    %259 = arith.select %258, %229, %223 : vector<8x128xi1>, vector<8x128xf32>
    %260 = arith.select %256, %227, %259 : vector<8x128xi1>, vector<8x128xf32>
    %261 = arith.select %258, %230, %224 : vector<8x128xi1>, vector<8x128xf32>
    %262 = arith.select %256, %228, %261 : vector<8x128xi1>, vector<8x128xf32>
    %cst_52 = arith.constant 4.000000e+00 : f32
    %263 = vector.broadcast %cst_52 : f32 to vector<8x128xf32>
    %264 = arith.cmpf ogt, %210, %263 : vector<8x128xf32>
    %cst_53 = arith.constant 4.000000e+00 : f32
    %265 = vector.broadcast %cst_53 : f32 to vector<8x128xf32>
    %266 = arith.cmpf oeq, %210, %265 : vector<8x128xf32>
    %267 = arith.select %266, %229, %227 : vector<8x128xi1>, vector<8x128xf32>
    %268 = arith.select %264, %227, %267 : vector<8x128xi1>, vector<8x128xf32>
    %269 = arith.select %266, %230, %228 : vector<8x128xi1>, vector<8x128xf32>
    %270 = arith.select %264, %228, %269 : vector<8x128xi1>, vector<8x128xf32>
    %271 = arith.subf %71, %69 : vector<8x128xf32>
    %272 = arith.subf %79, %77 : vector<8x128xf32>
    %273 = arith.subf %238, %77 : vector<8x128xf32>
    %274 = arith.mulf %271, %273 : vector<8x128xf32>
    %275 = arith.subf %236, %69 : vector<8x128xf32>
    %276 = arith.mulf %272, %275 : vector<8x128xf32>
    %277 = arith.subf %274, %276 : vector<8x128xf32>
    %278 = arith.subf %246, %77 : vector<8x128xf32>
    %279 = arith.mulf %271, %278 : vector<8x128xf32>
    %280 = arith.subf %244, %69 : vector<8x128xf32>
    %281 = arith.mulf %272, %280 : vector<8x128xf32>
    %282 = arith.subf %279, %281 : vector<8x128xf32>
    %283 = arith.subf %254, %77 : vector<8x128xf32>
    %284 = arith.mulf %271, %283 : vector<8x128xf32>
    %285 = arith.subf %252, %69 : vector<8x128xf32>
    %286 = arith.mulf %272, %285 : vector<8x128xf32>
    %287 = arith.subf %284, %286 : vector<8x128xf32>
    %288 = arith.subf %262, %77 : vector<8x128xf32>
    %289 = arith.mulf %271, %288 : vector<8x128xf32>
    %290 = arith.subf %260, %69 : vector<8x128xf32>
    %291 = arith.mulf %272, %290 : vector<8x128xf32>
    %292 = arith.subf %289, %291 : vector<8x128xf32>
    %293 = arith.subf %270, %77 : vector<8x128xf32>
    %294 = arith.mulf %271, %293 : vector<8x128xf32>
    %295 = arith.subf %268, %69 : vector<8x128xf32>
    %296 = arith.mulf %272, %295 : vector<8x128xf32>
    %297 = arith.subf %294, %296 : vector<8x128xf32>
    %cst_54 = arith.constant 0.000000e+00 : f32
    %298 = vector.broadcast %cst_54 : f32 to vector<8x128xf32>
    %299 = arith.cmpf oge, %277, %298 : vector<8x128xf32>
    %cst_55 = arith.constant 0.000000e+00 : f32
    %300 = vector.broadcast %cst_55 : f32 to vector<8x128xf32>
    %301 = arith.cmpf oge, %282, %300 : vector<8x128xf32>
    %cst_56 = arith.constant 0.000000e+00 : f32
    %302 = vector.broadcast %cst_56 : f32 to vector<8x128xf32>
    %303 = arith.cmpf oge, %287, %302 : vector<8x128xf32>
    %cst_57 = arith.constant 0.000000e+00 : f32
    %304 = vector.broadcast %cst_57 : f32 to vector<8x128xf32>
    %305 = arith.cmpf oge, %292, %304 : vector<8x128xf32>
    %cst_58 = arith.constant 0.000000e+00 : f32
    %306 = vector.broadcast %cst_58 : f32 to vector<8x128xf32>
    %307 = arith.cmpf oge, %297, %306 : vector<8x128xf32>
    %308 = arith.subf %297, %277 : vector<8x128xf32>
    %309 = math.absf %308 : vector<8x128xf32>
    %cst_59 = arith.constant 9.99999996E-13 : f32
    %310 = vector.broadcast %cst_59 : f32 to vector<8x128xf32>
    %311 = arith.cmpf olt, %309, %310 : vector<8x128xf32>
    %cst_60 = arith.constant 0.000000e+00 : f32
    %312 = vector.broadcast %cst_60 : f32 to vector<8x128xf32>
    %313 = arith.cmpf olt, %308, %312 : vector<8x128xf32>
    %cst_61 = arith.constant -9.99999996E-13 : f32
    %cst_62 = arith.constant 9.99999996E-13 : f32
    %314 = vector.broadcast %cst_61 : f32 to vector<8x128xf32>
    %315 = vector.broadcast %cst_62 : f32 to vector<8x128xf32>
    %316 = arith.select %313, %314, %315 : vector<8x128xi1>, vector<8x128xf32>
    %317 = arith.select %311, %316, %308 : vector<8x128xi1>, vector<8x128xf32>
    %318 = tpu.reciprocal %317 {approx = true} : vector<8x128xf32> -> vector<8x128xf32>
    %319 = arith.mulf %297, %318 : vector<8x128xf32>
    %320 = arith.subf %236, %268 : vector<8x128xf32>
    %321 = arith.mulf %319, %320 : vector<8x128xf32>
    %322 = arith.addf %268, %321 : vector<8x128xf32>
    %323 = arith.subf %238, %270 : vector<8x128xf32>
    %324 = arith.mulf %319, %323 : vector<8x128xf32>
    %325 = arith.addf %270, %324 : vector<8x128xf32>
    %326 = arith.subf %277, %282 : vector<8x128xf32>
    %327 = math.absf %326 : vector<8x128xf32>
    %cst_63 = arith.constant 9.99999996E-13 : f32
    %328 = vector.broadcast %cst_63 : f32 to vector<8x128xf32>
    %329 = arith.cmpf olt, %327, %328 : vector<8x128xf32>
    %cst_64 = arith.constant 0.000000e+00 : f32
    %330 = vector.broadcast %cst_64 : f32 to vector<8x128xf32>
    %331 = arith.cmpf olt, %326, %330 : vector<8x128xf32>
    %cst_65 = arith.constant -9.99999996E-13 : f32
    %cst_66 = arith.constant 9.99999996E-13 : f32
    %332 = vector.broadcast %cst_65 : f32 to vector<8x128xf32>
    %333 = vector.broadcast %cst_66 : f32 to vector<8x128xf32>
    %334 = arith.select %331, %332, %333 : vector<8x128xi1>, vector<8x128xf32>
    %335 = arith.select %329, %334, %326 : vector<8x128xi1>, vector<8x128xf32>
    %336 = tpu.reciprocal %335 {approx = true} : vector<8x128xf32> -> vector<8x128xf32>
    %337 = arith.mulf %277, %336 : vector<8x128xf32>
    %338 = arith.subf %244, %236 : vector<8x128xf32>
    %339 = arith.mulf %337, %338 : vector<8x128xf32>
    %340 = arith.addf %236, %339 : vector<8x128xf32>
    %341 = arith.subf %246, %238 : vector<8x128xf32>
    %342 = arith.mulf %337, %341 : vector<8x128xf32>
    %343 = arith.addf %238, %342 : vector<8x128xf32>
    %344 = arith.subf %282, %287 : vector<8x128xf32>
    %345 = math.absf %344 : vector<8x128xf32>
    %cst_67 = arith.constant 9.99999996E-13 : f32
    %346 = vector.broadcast %cst_67 : f32 to vector<8x128xf32>
    %347 = arith.cmpf olt, %345, %346 : vector<8x128xf32>
    %cst_68 = arith.constant 0.000000e+00 : f32
    %348 = vector.broadcast %cst_68 : f32 to vector<8x128xf32>
    %349 = arith.cmpf olt, %344, %348 : vector<8x128xf32>
    %cst_69 = arith.constant -9.99999996E-13 : f32
    %cst_70 = arith.constant 9.99999996E-13 : f32
    %350 = vector.broadcast %cst_69 : f32 to vector<8x128xf32>
    %351 = vector.broadcast %cst_70 : f32 to vector<8x128xf32>
    %352 = arith.select %349, %350, %351 : vector<8x128xi1>, vector<8x128xf32>
    %353 = arith.select %347, %352, %344 : vector<8x128xi1>, vector<8x128xf32>
    %354 = tpu.reciprocal %353 {approx = true} : vector<8x128xf32> -> vector<8x128xf32>
    %355 = arith.mulf %282, %354 : vector<8x128xf32>
    %356 = arith.subf %252, %244 : vector<8x128xf32>
    %357 = arith.mulf %355, %356 : vector<8x128xf32>
    %358 = arith.addf %244, %357 : vector<8x128xf32>
    %359 = arith.subf %254, %246 : vector<8x128xf32>
    %360 = arith.mulf %355, %359 : vector<8x128xf32>
    %361 = arith.addf %246, %360 : vector<8x128xf32>
    %362 = arith.subf %287, %292 : vector<8x128xf32>
    %363 = math.absf %362 : vector<8x128xf32>
    %cst_71 = arith.constant 9.99999996E-13 : f32
    %364 = vector.broadcast %cst_71 : f32 to vector<8x128xf32>
    %365 = arith.cmpf olt, %363, %364 : vector<8x128xf32>
    %cst_72 = arith.constant 0.000000e+00 : f32
    %366 = vector.broadcast %cst_72 : f32 to vector<8x128xf32>
    %367 = arith.cmpf olt, %362, %366 : vector<8x128xf32>
    %cst_73 = arith.constant -9.99999996E-13 : f32
    %cst_74 = arith.constant 9.99999996E-13 : f32
    %368 = vector.broadcast %cst_73 : f32 to vector<8x128xf32>
    %369 = vector.broadcast %cst_74 : f32 to vector<8x128xf32>
    %370 = arith.select %367, %368, %369 : vector<8x128xi1>, vector<8x128xf32>
    %371 = arith.select %365, %370, %362 : vector<8x128xi1>, vector<8x128xf32>
    %372 = tpu.reciprocal %371 {approx = true} : vector<8x128xf32> -> vector<8x128xf32>
    %373 = arith.mulf %287, %372 : vector<8x128xf32>
    %374 = arith.subf %260, %252 : vector<8x128xf32>
    %375 = arith.mulf %373, %374 : vector<8x128xf32>
    %376 = arith.addf %252, %375 : vector<8x128xf32>
    %377 = arith.subf %262, %254 : vector<8x128xf32>
    %378 = arith.mulf %373, %377 : vector<8x128xf32>
    %379 = arith.addf %254, %378 : vector<8x128xf32>
    %380 = arith.subf %292, %297 : vector<8x128xf32>
    %381 = math.absf %380 : vector<8x128xf32>
    %cst_75 = arith.constant 9.99999996E-13 : f32
    %382 = vector.broadcast %cst_75 : f32 to vector<8x128xf32>
    %383 = arith.cmpf olt, %381, %382 : vector<8x128xf32>
    %cst_76 = arith.constant 0.000000e+00 : f32
    %384 = vector.broadcast %cst_76 : f32 to vector<8x128xf32>
    %385 = arith.cmpf olt, %380, %384 : vector<8x128xf32>
    %cst_77 = arith.constant -9.99999996E-13 : f32
    %cst_78 = arith.constant 9.99999996E-13 : f32
    %386 = vector.broadcast %cst_77 : f32 to vector<8x128xf32>
    %387 = vector.broadcast %cst_78 : f32 to vector<8x128xf32>
    %388 = arith.select %385, %386, %387 : vector<8x128xi1>, vector<8x128xf32>
    %389 = arith.select %383, %388, %380 : vector<8x128xi1>, vector<8x128xf32>
    %390 = tpu.reciprocal %389 {approx = true} : vector<8x128xf32> -> vector<8x128xf32>
    %391 = arith.mulf %292, %390 : vector<8x128xf32>
    %392 = arith.subf %268, %260 : vector<8x128xf32>
    %393 = arith.mulf %391, %392 : vector<8x128xf32>
    %394 = arith.addf %260, %393 : vector<8x128xf32>
    %395 = arith.subf %270, %262 : vector<8x128xf32>
    %396 = arith.mulf %391, %395 : vector<8x128xf32>
    %397 = arith.addf %262, %396 : vector<8x128xf32>
    %cst_79 = arith.constant 0.000000e+00 : f32
    %398 = vector.broadcast %cst_79 : f32 to vector<8x128xf32>
    %cst_80 = arith.constant 0.000000e+00 : f32
    %399 = vector.broadcast %cst_80 : f32 to vector<8x128xf32>
    %cst_81 = arith.constant 5.000000e+00 : f32
    %400 = vector.broadcast %cst_81 : f32 to vector<8x128xf32>
    %cst_82 = arith.constant dense<true> : vector<8x128xi1>
    %401 = arith.xori %307, %cst_82 : vector<8x128xi1>
    %402 = arith.andi %401, %299 : vector<8x128xi1>
    %403 = arith.select %402, %322, %398 : vector<8x128xi1>, vector<8x128xf32>
    %404 = arith.select %402, %325, %399 : vector<8x128xi1>, vector<8x128xf32>
    %cst_83 = arith.constant 0.000000e+00 : f32
    %405 = vector.broadcast %cst_83 : f32 to vector<8x128xf32>
    %406 = arith.select %402, %405, %400 : vector<8x128xi1>, vector<8x128xf32>
    %cst_84 = arith.constant dense<true> : vector<8x128xi1>
    %407 = arith.xori %299, %cst_84 : vector<8x128xi1>
    %408 = arith.andi %407, %301 : vector<8x128xi1>
    %409 = arith.select %408, %340, %403 : vector<8x128xi1>, vector<8x128xf32>
    %410 = arith.select %408, %343, %404 : vector<8x128xi1>, vector<8x128xf32>
    %cst_85 = arith.constant 1.000000e+00 : f32
    %411 = vector.broadcast %cst_85 : f32 to vector<8x128xf32>
    %412 = arith.select %408, %411, %406 : vector<8x128xi1>, vector<8x128xf32>
    %cst_86 = arith.constant dense<true> : vector<8x128xi1>
    %413 = arith.xori %301, %cst_86 : vector<8x128xi1>
    %414 = arith.andi %413, %303 : vector<8x128xi1>
    %415 = arith.select %414, %358, %409 : vector<8x128xi1>, vector<8x128xf32>
    %416 = arith.select %414, %361, %410 : vector<8x128xi1>, vector<8x128xf32>
    %cst_87 = arith.constant 2.000000e+00 : f32
    %417 = vector.broadcast %cst_87 : f32 to vector<8x128xf32>
    %418 = arith.select %414, %417, %412 : vector<8x128xi1>, vector<8x128xf32>
    %cst_88 = arith.constant dense<true> : vector<8x128xi1>
    %419 = arith.xori %303, %cst_88 : vector<8x128xi1>
    %420 = arith.andi %419, %305 : vector<8x128xi1>
    %421 = arith.select %420, %376, %415 : vector<8x128xi1>, vector<8x128xf32>
    %422 = arith.select %420, %379, %416 : vector<8x128xi1>, vector<8x128xf32>
    %cst_89 = arith.constant 3.000000e+00 : f32
    %423 = vector.broadcast %cst_89 : f32 to vector<8x128xf32>
    %424 = arith.select %420, %423, %418 : vector<8x128xi1>, vector<8x128xf32>
    %cst_90 = arith.constant dense<true> : vector<8x128xi1>
    %425 = arith.xori %305, %cst_90 : vector<8x128xi1>
    %426 = arith.andi %425, %307 : vector<8x128xi1>
    %427 = arith.select %426, %394, %421 : vector<8x128xi1>, vector<8x128xf32>
    %428 = arith.select %426, %397, %422 : vector<8x128xi1>, vector<8x128xf32>
    %cst_91 = arith.constant 4.000000e+00 : f32
    %429 = vector.broadcast %cst_91 : f32 to vector<8x128xf32>
    %430 = arith.select %426, %429, %424 : vector<8x128xi1>, vector<8x128xf32>
    %cst_92 = arith.constant 5.000000e+00 : f32
    %431 = vector.broadcast %cst_92 : f32 to vector<8x128xf32>
    %432 = arith.cmpf olt, %430, %431 : vector<8x128xf32>
    %433 = arith.select %307, %322, %427 : vector<8x128xi1>, vector<8x128xf32>
    %434 = arith.select %307, %325, %428 : vector<8x128xi1>, vector<8x128xf32>
    %435 = arith.select %299, %236, %433 : vector<8x128xi1>, vector<8x128xf32>
    %436 = arith.select %299, %238, %434 : vector<8x128xi1>, vector<8x128xf32>
    %437 = arith.select %299, %340, %427 : vector<8x128xi1>, vector<8x128xf32>
    %438 = arith.select %299, %343, %428 : vector<8x128xi1>, vector<8x128xf32>
    %439 = arith.select %301, %244, %437 : vector<8x128xi1>, vector<8x128xf32>
    %440 = arith.select %301, %246, %438 : vector<8x128xi1>, vector<8x128xf32>
    %441 = arith.select %301, %358, %427 : vector<8x128xi1>, vector<8x128xf32>
    %442 = arith.select %301, %361, %428 : vector<8x128xi1>, vector<8x128xf32>
    %443 = arith.select %303, %252, %441 : vector<8x128xi1>, vector<8x128xf32>
    %444 = arith.select %303, %254, %442 : vector<8x128xi1>, vector<8x128xf32>
    %445 = arith.select %303, %376, %427 : vector<8x128xi1>, vector<8x128xf32>
    %446 = arith.select %303, %379, %428 : vector<8x128xi1>, vector<8x128xf32>
    %447 = arith.select %305, %260, %445 : vector<8x128xi1>, vector<8x128xf32>
    %448 = arith.select %305, %262, %446 : vector<8x128xi1>, vector<8x128xf32>
    %449 = arith.select %305, %394, %427 : vector<8x128xi1>, vector<8x128xf32>
    %450 = arith.select %305, %397, %428 : vector<8x128xi1>, vector<8x128xf32>
    %451 = arith.select %307, %268, %449 : vector<8x128xi1>, vector<8x128xf32>
    %452 = arith.select %307, %270, %450 : vector<8x128xi1>, vector<8x128xf32>
    %453 = arith.select %432, %427, %451 : vector<8x128xi1>, vector<8x128xf32>
    %454 = arith.select %432, %428, %452 : vector<8x128xi1>, vector<8x128xf32>
    %cst_93 = arith.constant 0.000000e+00 : f32
    %455 = vector.broadcast %cst_93 : f32 to vector<8x128xf32>
    %456 = arith.cmpf ogt, %430, %455 : vector<8x128xf32>
    %cst_94 = arith.constant 0.000000e+00 : f32
    %457 = vector.broadcast %cst_94 : f32 to vector<8x128xf32>
    %458 = arith.cmpf oeq, %430, %457 : vector<8x128xf32>
    %459 = arith.select %458, %453, %451 : vector<8x128xi1>, vector<8x128xf32>
    %460 = arith.select %456, %435, %459 : vector<8x128xi1>, vector<8x128xf32>
    %461 = arith.select %458, %454, %452 : vector<8x128xi1>, vector<8x128xf32>
    %462 = arith.select %456, %436, %461 : vector<8x128xi1>, vector<8x128xf32>
    %cst_95 = arith.constant 1.000000e+00 : f32
    %463 = vector.broadcast %cst_95 : f32 to vector<8x128xf32>
    %464 = arith.cmpf ogt, %430, %463 : vector<8x128xf32>
    %cst_96 = arith.constant 1.000000e+00 : f32
    %465 = vector.broadcast %cst_96 : f32 to vector<8x128xf32>
    %466 = arith.cmpf oeq, %430, %465 : vector<8x128xf32>
    %467 = arith.select %466, %453, %435 : vector<8x128xi1>, vector<8x128xf32>
    %468 = arith.select %464, %439, %467 : vector<8x128xi1>, vector<8x128xf32>
    %469 = arith.select %466, %454, %436 : vector<8x128xi1>, vector<8x128xf32>
    %470 = arith.select %464, %440, %469 : vector<8x128xi1>, vector<8x128xf32>
    %cst_97 = arith.constant 2.000000e+00 : f32
    %471 = vector.broadcast %cst_97 : f32 to vector<8x128xf32>
    %472 = arith.cmpf ogt, %430, %471 : vector<8x128xf32>
    %cst_98 = arith.constant 2.000000e+00 : f32
    %473 = vector.broadcast %cst_98 : f32 to vector<8x128xf32>
    %474 = arith.cmpf oeq, %430, %473 : vector<8x128xf32>
    %475 = arith.select %474, %453, %439 : vector<8x128xi1>, vector<8x128xf32>
    %476 = arith.select %472, %443, %475 : vector<8x128xi1>, vector<8x128xf32>
    %477 = arith.select %474, %454, %440 : vector<8x128xi1>, vector<8x128xf32>
    %478 = arith.select %472, %444, %477 : vector<8x128xi1>, vector<8x128xf32>
    %cst_99 = arith.constant 3.000000e+00 : f32
    %479 = vector.broadcast %cst_99 : f32 to vector<8x128xf32>
    %480 = arith.cmpf ogt, %430, %479 : vector<8x128xf32>
    %cst_100 = arith.constant 3.000000e+00 : f32
    %481 = vector.broadcast %cst_100 : f32 to vector<8x128xf32>
    %482 = arith.cmpf oeq, %430, %481 : vector<8x128xf32>
    %483 = arith.select %482, %453, %443 : vector<8x128xi1>, vector<8x128xf32>
    %484 = arith.select %480, %447, %483 : vector<8x128xi1>, vector<8x128xf32>
    %485 = arith.select %482, %454, %444 : vector<8x128xi1>, vector<8x128xf32>
    %486 = arith.select %480, %448, %485 : vector<8x128xi1>, vector<8x128xf32>
    %cst_101 = arith.constant 4.000000e+00 : f32
    %487 = vector.broadcast %cst_101 : f32 to vector<8x128xf32>
    %488 = arith.cmpf ogt, %430, %487 : vector<8x128xf32>
    %cst_102 = arith.constant 4.000000e+00 : f32
    %489 = vector.broadcast %cst_102 : f32 to vector<8x128xf32>
    %490 = arith.cmpf oeq, %430, %489 : vector<8x128xf32>
    %491 = arith.select %490, %453, %447 : vector<8x128xi1>, vector<8x128xf32>
    %492 = arith.select %488, %451, %491 : vector<8x128xi1>, vector<8x128xf32>
    %493 = arith.select %490, %454, %448 : vector<8x128xi1>, vector<8x128xf32>
    %494 = arith.select %488, %452, %493 : vector<8x128xi1>, vector<8x128xf32>
    %cst_103 = arith.constant 5.000000e+00 : f32
    %495 = vector.broadcast %cst_103 : f32 to vector<8x128xf32>
    %496 = arith.cmpf ogt, %430, %495 : vector<8x128xf32>
    %cst_104 = arith.constant 5.000000e+00 : f32
    %497 = vector.broadcast %cst_104 : f32 to vector<8x128xf32>
    %498 = arith.cmpf oeq, %430, %497 : vector<8x128xf32>
    %499 = arith.select %498, %453, %451 : vector<8x128xi1>, vector<8x128xf32>
    %500 = arith.select %496, %451, %499 : vector<8x128xi1>, vector<8x128xf32>
    %501 = arith.select %498, %454, %452 : vector<8x128xi1>, vector<8x128xf32>
    %502 = arith.select %496, %452, %501 : vector<8x128xi1>, vector<8x128xf32>
    %503 = arith.subf %73, %71 : vector<8x128xf32>
    %504 = arith.subf %81, %79 : vector<8x128xf32>
    %505 = arith.subf %462, %79 : vector<8x128xf32>
    %506 = arith.mulf %503, %505 : vector<8x128xf32>
    %507 = arith.subf %460, %71 : vector<8x128xf32>
    %508 = arith.mulf %504, %507 : vector<8x128xf32>
    %509 = arith.subf %506, %508 : vector<8x128xf32>
    %510 = arith.subf %470, %79 : vector<8x128xf32>
    %511 = arith.mulf %503, %510 : vector<8x128xf32>
    %512 = arith.subf %468, %71 : vector<8x128xf32>
    %513 = arith.mulf %504, %512 : vector<8x128xf32>
    %514 = arith.subf %511, %513 : vector<8x128xf32>
    %515 = arith.subf %478, %79 : vector<8x128xf32>
    %516 = arith.mulf %503, %515 : vector<8x128xf32>
    %517 = arith.subf %476, %71 : vector<8x128xf32>
    %518 = arith.mulf %504, %517 : vector<8x128xf32>
    %519 = arith.subf %516, %518 : vector<8x128xf32>
    %520 = arith.subf %486, %79 : vector<8x128xf32>
    %521 = arith.mulf %503, %520 : vector<8x128xf32>
    %522 = arith.subf %484, %71 : vector<8x128xf32>
    %523 = arith.mulf %504, %522 : vector<8x128xf32>
    %524 = arith.subf %521, %523 : vector<8x128xf32>
    %525 = arith.subf %494, %79 : vector<8x128xf32>
    %526 = arith.mulf %503, %525 : vector<8x128xf32>
    %527 = arith.subf %492, %71 : vector<8x128xf32>
    %528 = arith.mulf %504, %527 : vector<8x128xf32>
    %529 = arith.subf %526, %528 : vector<8x128xf32>
    %530 = arith.subf %502, %79 : vector<8x128xf32>
    %531 = arith.mulf %503, %530 : vector<8x128xf32>
    %532 = arith.subf %500, %71 : vector<8x128xf32>
    %533 = arith.mulf %504, %532 : vector<8x128xf32>
    %534 = arith.subf %531, %533 : vector<8x128xf32>
    %cst_105 = arith.constant 0.000000e+00 : f32
    %535 = vector.broadcast %cst_105 : f32 to vector<8x128xf32>
    %536 = arith.cmpf oge, %509, %535 : vector<8x128xf32>
    %cst_106 = arith.constant 0.000000e+00 : f32
    %537 = vector.broadcast %cst_106 : f32 to vector<8x128xf32>
    %538 = arith.cmpf oge, %514, %537 : vector<8x128xf32>
    %cst_107 = arith.constant 0.000000e+00 : f32
    %539 = vector.broadcast %cst_107 : f32 to vector<8x128xf32>
    %540 = arith.cmpf oge, %519, %539 : vector<8x128xf32>
    %cst_108 = arith.constant 0.000000e+00 : f32
    %541 = vector.broadcast %cst_108 : f32 to vector<8x128xf32>
    %542 = arith.cmpf oge, %524, %541 : vector<8x128xf32>
    %cst_109 = arith.constant 0.000000e+00 : f32
    %543 = vector.broadcast %cst_109 : f32 to vector<8x128xf32>
    %544 = arith.cmpf oge, %529, %543 : vector<8x128xf32>
    %cst_110 = arith.constant 0.000000e+00 : f32
    %545 = vector.broadcast %cst_110 : f32 to vector<8x128xf32>
    %546 = arith.cmpf oge, %534, %545 : vector<8x128xf32>
    %547 = arith.subf %534, %509 : vector<8x128xf32>
    %548 = math.absf %547 : vector<8x128xf32>
    %cst_111 = arith.constant 9.99999996E-13 : f32
    %549 = vector.broadcast %cst_111 : f32 to vector<8x128xf32>
    %550 = arith.cmpf olt, %548, %549 : vector<8x128xf32>
    %cst_112 = arith.constant 0.000000e+00 : f32
    %551 = vector.broadcast %cst_112 : f32 to vector<8x128xf32>
    %552 = arith.cmpf olt, %547, %551 : vector<8x128xf32>
    %cst_113 = arith.constant -9.99999996E-13 : f32
    %cst_114 = arith.constant 9.99999996E-13 : f32
    %553 = vector.broadcast %cst_113 : f32 to vector<8x128xf32>
    %554 = vector.broadcast %cst_114 : f32 to vector<8x128xf32>
    %555 = arith.select %552, %553, %554 : vector<8x128xi1>, vector<8x128xf32>
    %556 = arith.select %550, %555, %547 : vector<8x128xi1>, vector<8x128xf32>
    %557 = tpu.reciprocal %556 {approx = true} : vector<8x128xf32> -> vector<8x128xf32>
    %558 = arith.mulf %534, %557 : vector<8x128xf32>
    %559 = arith.subf %460, %500 : vector<8x128xf32>
    %560 = arith.mulf %558, %559 : vector<8x128xf32>
    %561 = arith.addf %500, %560 : vector<8x128xf32>
    %562 = arith.subf %462, %502 : vector<8x128xf32>
    %563 = arith.mulf %558, %562 : vector<8x128xf32>
    %564 = arith.addf %502, %563 : vector<8x128xf32>
    %565 = arith.subf %509, %514 : vector<8x128xf32>
    %566 = math.absf %565 : vector<8x128xf32>
    %cst_115 = arith.constant 9.99999996E-13 : f32
    %567 = vector.broadcast %cst_115 : f32 to vector<8x128xf32>
    %568 = arith.cmpf olt, %566, %567 : vector<8x128xf32>
    %cst_116 = arith.constant 0.000000e+00 : f32
    %569 = vector.broadcast %cst_116 : f32 to vector<8x128xf32>
    %570 = arith.cmpf olt, %565, %569 : vector<8x128xf32>
    %cst_117 = arith.constant -9.99999996E-13 : f32
    %cst_118 = arith.constant 9.99999996E-13 : f32
    %571 = vector.broadcast %cst_117 : f32 to vector<8x128xf32>
    %572 = vector.broadcast %cst_118 : f32 to vector<8x128xf32>
    %573 = arith.select %570, %571, %572 : vector<8x128xi1>, vector<8x128xf32>
    %574 = arith.select %568, %573, %565 : vector<8x128xi1>, vector<8x128xf32>
    %575 = tpu.reciprocal %574 {approx = true} : vector<8x128xf32> -> vector<8x128xf32>
    %576 = arith.mulf %509, %575 : vector<8x128xf32>
    %577 = arith.subf %468, %460 : vector<8x128xf32>
    %578 = arith.mulf %576, %577 : vector<8x128xf32>
    %579 = arith.addf %460, %578 : vector<8x128xf32>
    %580 = arith.subf %470, %462 : vector<8x128xf32>
    %581 = arith.mulf %576, %580 : vector<8x128xf32>
    %582 = arith.addf %462, %581 : vector<8x128xf32>
    %583 = arith.subf %514, %519 : vector<8x128xf32>
    %584 = math.absf %583 : vector<8x128xf32>
    %cst_119 = arith.constant 9.99999996E-13 : f32
    %585 = vector.broadcast %cst_119 : f32 to vector<8x128xf32>
    %586 = arith.cmpf olt, %584, %585 : vector<8x128xf32>
    %cst_120 = arith.constant 0.000000e+00 : f32
    %587 = vector.broadcast %cst_120 : f32 to vector<8x128xf32>
    %588 = arith.cmpf olt, %583, %587 : vector<8x128xf32>
    %cst_121 = arith.constant -9.99999996E-13 : f32
    %cst_122 = arith.constant 9.99999996E-13 : f32
    %589 = vector.broadcast %cst_121 : f32 to vector<8x128xf32>
    %590 = vector.broadcast %cst_122 : f32 to vector<8x128xf32>
    %591 = arith.select %588, %589, %590 : vector<8x128xi1>, vector<8x128xf32>
    %592 = arith.select %586, %591, %583 : vector<8x128xi1>, vector<8x128xf32>
    %593 = tpu.reciprocal %592 {approx = true} : vector<8x128xf32> -> vector<8x128xf32>
    %594 = arith.mulf %514, %593 : vector<8x128xf32>
    %595 = arith.subf %476, %468 : vector<8x128xf32>
    %596 = arith.mulf %594, %595 : vector<8x128xf32>
    %597 = arith.addf %468, %596 : vector<8x128xf32>
    %598 = arith.subf %478, %470 : vector<8x128xf32>
    %599 = arith.mulf %594, %598 : vector<8x128xf32>
    %600 = arith.addf %470, %599 : vector<8x128xf32>
    %601 = arith.subf %519, %524 : vector<8x128xf32>
    %602 = math.absf %601 : vector<8x128xf32>
    %cst_123 = arith.constant 9.99999996E-13 : f32
    %603 = vector.broadcast %cst_123 : f32 to vector<8x128xf32>
    %604 = arith.cmpf olt, %602, %603 : vector<8x128xf32>
    %cst_124 = arith.constant 0.000000e+00 : f32
    %605 = vector.broadcast %cst_124 : f32 to vector<8x128xf32>
    %606 = arith.cmpf olt, %601, %605 : vector<8x128xf32>
    %cst_125 = arith.constant -9.99999996E-13 : f32
    %cst_126 = arith.constant 9.99999996E-13 : f32
    %607 = vector.broadcast %cst_125 : f32 to vector<8x128xf32>
    %608 = vector.broadcast %cst_126 : f32 to vector<8x128xf32>
    %609 = arith.select %606, %607, %608 : vector<8x128xi1>, vector<8x128xf32>
    %610 = arith.select %604, %609, %601 : vector<8x128xi1>, vector<8x128xf32>
    %611 = tpu.reciprocal %610 {approx = true} : vector<8x128xf32> -> vector<8x128xf32>
    %612 = arith.mulf %519, %611 : vector<8x128xf32>
    %613 = arith.subf %484, %476 : vector<8x128xf32>
    %614 = arith.mulf %612, %613 : vector<8x128xf32>
    %615 = arith.addf %476, %614 : vector<8x128xf32>
    %616 = arith.subf %486, %478 : vector<8x128xf32>
    %617 = arith.mulf %612, %616 : vector<8x128xf32>
    %618 = arith.addf %478, %617 : vector<8x128xf32>
    %619 = arith.subf %524, %529 : vector<8x128xf32>
    %620 = math.absf %619 : vector<8x128xf32>
    %cst_127 = arith.constant 9.99999996E-13 : f32
    %621 = vector.broadcast %cst_127 : f32 to vector<8x128xf32>
    %622 = arith.cmpf olt, %620, %621 : vector<8x128xf32>
    %cst_128 = arith.constant 0.000000e+00 : f32
    %623 = vector.broadcast %cst_128 : f32 to vector<8x128xf32>
    %624 = arith.cmpf olt, %619, %623 : vector<8x128xf32>
    %cst_129 = arith.constant -9.99999996E-13 : f32
    %cst_130 = arith.constant 9.99999996E-13 : f32
    %625 = vector.broadcast %cst_129 : f32 to vector<8x128xf32>
    %626 = vector.broadcast %cst_130 : f32 to vector<8x128xf32>
    %627 = arith.select %624, %625, %626 : vector<8x128xi1>, vector<8x128xf32>
    %628 = arith.select %622, %627, %619 : vector<8x128xi1>, vector<8x128xf32>
    %629 = tpu.reciprocal %628 {approx = true} : vector<8x128xf32> -> vector<8x128xf32>
    %630 = arith.mulf %524, %629 : vector<8x128xf32>
    %631 = arith.subf %492, %484 : vector<8x128xf32>
    %632 = arith.mulf %630, %631 : vector<8x128xf32>
    %633 = arith.addf %484, %632 : vector<8x128xf32>
    %634 = arith.subf %494, %486 : vector<8x128xf32>
    %635 = arith.mulf %630, %634 : vector<8x128xf32>
    %636 = arith.addf %486, %635 : vector<8x128xf32>
    %637 = arith.subf %529, %534 : vector<8x128xf32>
    %638 = math.absf %637 : vector<8x128xf32>
    %cst_131 = arith.constant 9.99999996E-13 : f32
    %639 = vector.broadcast %cst_131 : f32 to vector<8x128xf32>
    %640 = arith.cmpf olt, %638, %639 : vector<8x128xf32>
    %cst_132 = arith.constant 0.000000e+00 : f32
    %641 = vector.broadcast %cst_132 : f32 to vector<8x128xf32>
    %642 = arith.cmpf olt, %637, %641 : vector<8x128xf32>
    %cst_133 = arith.constant -9.99999996E-13 : f32
    %cst_134 = arith.constant 9.99999996E-13 : f32
    %643 = vector.broadcast %cst_133 : f32 to vector<8x128xf32>
    %644 = vector.broadcast %cst_134 : f32 to vector<8x128xf32>
    %645 = arith.select %642, %643, %644 : vector<8x128xi1>, vector<8x128xf32>
    %646 = arith.select %640, %645, %637 : vector<8x128xi1>, vector<8x128xf32>
    %647 = tpu.reciprocal %646 {approx = true} : vector<8x128xf32> -> vector<8x128xf32>
    %648 = arith.mulf %529, %647 : vector<8x128xf32>
    %649 = arith.subf %500, %492 : vector<8x128xf32>
    %650 = arith.mulf %648, %649 : vector<8x128xf32>
    %651 = arith.addf %492, %650 : vector<8x128xf32>
    %652 = arith.subf %502, %494 : vector<8x128xf32>
    %653 = arith.mulf %648, %652 : vector<8x128xf32>
    %654 = arith.addf %494, %653 : vector<8x128xf32>
    %cst_135 = arith.constant 0.000000e+00 : f32
    %655 = vector.broadcast %cst_135 : f32 to vector<8x128xf32>
    %cst_136 = arith.constant 0.000000e+00 : f32
    %656 = vector.broadcast %cst_136 : f32 to vector<8x128xf32>
    %cst_137 = arith.constant 6.000000e+00 : f32
    %657 = vector.broadcast %cst_137 : f32 to vector<8x128xf32>
    %cst_138 = arith.constant dense<true> : vector<8x128xi1>
    %658 = arith.xori %546, %cst_138 : vector<8x128xi1>
    %659 = arith.andi %658, %536 : vector<8x128xi1>
    %660 = arith.select %659, %561, %655 : vector<8x128xi1>, vector<8x128xf32>
    %661 = arith.select %659, %564, %656 : vector<8x128xi1>, vector<8x128xf32>
    %cst_139 = arith.constant 0.000000e+00 : f32
    %662 = vector.broadcast %cst_139 : f32 to vector<8x128xf32>
    %663 = arith.select %659, %662, %657 : vector<8x128xi1>, vector<8x128xf32>
    %cst_140 = arith.constant dense<true> : vector<8x128xi1>
    %664 = arith.xori %536, %cst_140 : vector<8x128xi1>
    %665 = arith.andi %664, %538 : vector<8x128xi1>
    %666 = arith.select %665, %579, %660 : vector<8x128xi1>, vector<8x128xf32>
    %667 = arith.select %665, %582, %661 : vector<8x128xi1>, vector<8x128xf32>
    %cst_141 = arith.constant 1.000000e+00 : f32
    %668 = vector.broadcast %cst_141 : f32 to vector<8x128xf32>
    %669 = arith.select %665, %668, %663 : vector<8x128xi1>, vector<8x128xf32>
    %cst_142 = arith.constant dense<true> : vector<8x128xi1>
    %670 = arith.xori %538, %cst_142 : vector<8x128xi1>
    %671 = arith.andi %670, %540 : vector<8x128xi1>
    %672 = arith.select %671, %597, %666 : vector<8x128xi1>, vector<8x128xf32>
    %673 = arith.select %671, %600, %667 : vector<8x128xi1>, vector<8x128xf32>
    %cst_143 = arith.constant 2.000000e+00 : f32
    %674 = vector.broadcast %cst_143 : f32 to vector<8x128xf32>
    %675 = arith.select %671, %674, %669 : vector<8x128xi1>, vector<8x128xf32>
    %cst_144 = arith.constant dense<true> : vector<8x128xi1>
    %676 = arith.xori %540, %cst_144 : vector<8x128xi1>
    %677 = arith.andi %676, %542 : vector<8x128xi1>
    %678 = arith.select %677, %615, %672 : vector<8x128xi1>, vector<8x128xf32>
    %679 = arith.select %677, %618, %673 : vector<8x128xi1>, vector<8x128xf32>
    %cst_145 = arith.constant 3.000000e+00 : f32
    %680 = vector.broadcast %cst_145 : f32 to vector<8x128xf32>
    %681 = arith.select %677, %680, %675 : vector<8x128xi1>, vector<8x128xf32>
    %cst_146 = arith.constant dense<true> : vector<8x128xi1>
    %682 = arith.xori %542, %cst_146 : vector<8x128xi1>
    %683 = arith.andi %682, %544 : vector<8x128xi1>
    %684 = arith.select %683, %633, %678 : vector<8x128xi1>, vector<8x128xf32>
    %685 = arith.select %683, %636, %679 : vector<8x128xi1>, vector<8x128xf32>
    %cst_147 = arith.constant 4.000000e+00 : f32
    %686 = vector.broadcast %cst_147 : f32 to vector<8x128xf32>
    %687 = arith.select %683, %686, %681 : vector<8x128xi1>, vector<8x128xf32>
    %cst_148 = arith.constant dense<true> : vector<8x128xi1>
    %688 = arith.xori %544, %cst_148 : vector<8x128xi1>
    %689 = arith.andi %688, %546 : vector<8x128xi1>
    %690 = arith.select %689, %651, %684 : vector<8x128xi1>, vector<8x128xf32>
    %691 = arith.select %689, %654, %685 : vector<8x128xi1>, vector<8x128xf32>
    %cst_149 = arith.constant 5.000000e+00 : f32
    %692 = vector.broadcast %cst_149 : f32 to vector<8x128xf32>
    %693 = arith.select %689, %692, %687 : vector<8x128xi1>, vector<8x128xf32>
    %cst_150 = arith.constant 6.000000e+00 : f32
    %694 = vector.broadcast %cst_150 : f32 to vector<8x128xf32>
    %695 = arith.cmpf olt, %693, %694 : vector<8x128xf32>
    %696 = arith.select %546, %561, %690 : vector<8x128xi1>, vector<8x128xf32>
    %697 = arith.select %546, %564, %691 : vector<8x128xi1>, vector<8x128xf32>
    %698 = arith.select %536, %460, %696 : vector<8x128xi1>, vector<8x128xf32>
    %699 = arith.select %536, %462, %697 : vector<8x128xi1>, vector<8x128xf32>
    %700 = arith.select %536, %579, %690 : vector<8x128xi1>, vector<8x128xf32>
    %701 = arith.select %536, %582, %691 : vector<8x128xi1>, vector<8x128xf32>
    %702 = arith.select %538, %468, %700 : vector<8x128xi1>, vector<8x128xf32>
    %703 = arith.select %538, %470, %701 : vector<8x128xi1>, vector<8x128xf32>
    %704 = arith.select %538, %597, %690 : vector<8x128xi1>, vector<8x128xf32>
    %705 = arith.select %538, %600, %691 : vector<8x128xi1>, vector<8x128xf32>
    %706 = arith.select %540, %476, %704 : vector<8x128xi1>, vector<8x128xf32>
    %707 = arith.select %540, %478, %705 : vector<8x128xi1>, vector<8x128xf32>
    %708 = arith.select %540, %615, %690 : vector<8x128xi1>, vector<8x128xf32>
    %709 = arith.select %540, %618, %691 : vector<8x128xi1>, vector<8x128xf32>
    %710 = arith.select %542, %484, %708 : vector<8x128xi1>, vector<8x128xf32>
    %711 = arith.select %542, %486, %709 : vector<8x128xi1>, vector<8x128xf32>
    %712 = arith.select %542, %633, %690 : vector<8x128xi1>, vector<8x128xf32>
    %713 = arith.select %542, %636, %691 : vector<8x128xi1>, vector<8x128xf32>
    %714 = arith.select %544, %492, %712 : vector<8x128xi1>, vector<8x128xf32>
    %715 = arith.select %544, %494, %713 : vector<8x128xi1>, vector<8x128xf32>
    %716 = arith.select %544, %651, %690 : vector<8x128xi1>, vector<8x128xf32>
    %717 = arith.select %544, %654, %691 : vector<8x128xi1>, vector<8x128xf32>
    %718 = arith.select %546, %500, %716 : vector<8x128xi1>, vector<8x128xf32>
    %719 = arith.select %546, %502, %717 : vector<8x128xi1>, vector<8x128xf32>
    %720 = arith.select %695, %690, %718 : vector<8x128xi1>, vector<8x128xf32>
    %721 = arith.select %695, %691, %719 : vector<8x128xi1>, vector<8x128xf32>
    %cst_151 = arith.constant 0.000000e+00 : f32
    %722 = vector.broadcast %cst_151 : f32 to vector<8x128xf32>
    %723 = arith.cmpf ogt, %693, %722 : vector<8x128xf32>
    %cst_152 = arith.constant 0.000000e+00 : f32
    %724 = vector.broadcast %cst_152 : f32 to vector<8x128xf32>
    %725 = arith.cmpf oeq, %693, %724 : vector<8x128xf32>
    %726 = arith.select %725, %720, %718 : vector<8x128xi1>, vector<8x128xf32>
    %727 = arith.select %723, %698, %726 : vector<8x128xi1>, vector<8x128xf32>
    %728 = arith.select %725, %721, %719 : vector<8x128xi1>, vector<8x128xf32>
    %729 = arith.select %723, %699, %728 : vector<8x128xi1>, vector<8x128xf32>
    %cst_153 = arith.constant 1.000000e+00 : f32
    %730 = vector.broadcast %cst_153 : f32 to vector<8x128xf32>
    %731 = arith.cmpf ogt, %693, %730 : vector<8x128xf32>
    %cst_154 = arith.constant 1.000000e+00 : f32
    %732 = vector.broadcast %cst_154 : f32 to vector<8x128xf32>
    %733 = arith.cmpf oeq, %693, %732 : vector<8x128xf32>
    %734 = arith.select %733, %720, %698 : vector<8x128xi1>, vector<8x128xf32>
    %735 = arith.select %731, %702, %734 : vector<8x128xi1>, vector<8x128xf32>
    %736 = arith.select %733, %721, %699 : vector<8x128xi1>, vector<8x128xf32>
    %737 = arith.select %731, %703, %736 : vector<8x128xi1>, vector<8x128xf32>
    %cst_155 = arith.constant 2.000000e+00 : f32
    %738 = vector.broadcast %cst_155 : f32 to vector<8x128xf32>
    %739 = arith.cmpf ogt, %693, %738 : vector<8x128xf32>
    %cst_156 = arith.constant 2.000000e+00 : f32
    %740 = vector.broadcast %cst_156 : f32 to vector<8x128xf32>
    %741 = arith.cmpf oeq, %693, %740 : vector<8x128xf32>
    %742 = arith.select %741, %720, %702 : vector<8x128xi1>, vector<8x128xf32>
    %743 = arith.select %739, %706, %742 : vector<8x128xi1>, vector<8x128xf32>
    %744 = arith.select %741, %721, %703 : vector<8x128xi1>, vector<8x128xf32>
    %745 = arith.select %739, %707, %744 : vector<8x128xi1>, vector<8x128xf32>
    %cst_157 = arith.constant 3.000000e+00 : f32
    %746 = vector.broadcast %cst_157 : f32 to vector<8x128xf32>
    %747 = arith.cmpf ogt, %693, %746 : vector<8x128xf32>
    %cst_158 = arith.constant 3.000000e+00 : f32
    %748 = vector.broadcast %cst_158 : f32 to vector<8x128xf32>
    %749 = arith.cmpf oeq, %693, %748 : vector<8x128xf32>
    %750 = arith.select %749, %720, %706 : vector<8x128xi1>, vector<8x128xf32>
    %751 = arith.select %747, %710, %750 : vector<8x128xi1>, vector<8x128xf32>
    %752 = arith.select %749, %721, %707 : vector<8x128xi1>, vector<8x128xf32>
    %753 = arith.select %747, %711, %752 : vector<8x128xi1>, vector<8x128xf32>
    %cst_159 = arith.constant 4.000000e+00 : f32
    %754 = vector.broadcast %cst_159 : f32 to vector<8x128xf32>
    %755 = arith.cmpf ogt, %693, %754 : vector<8x128xf32>
    %cst_160 = arith.constant 4.000000e+00 : f32
    %756 = vector.broadcast %cst_160 : f32 to vector<8x128xf32>
    %757 = arith.cmpf oeq, %693, %756 : vector<8x128xf32>
    %758 = arith.select %757, %720, %710 : vector<8x128xi1>, vector<8x128xf32>
    %759 = arith.select %755, %714, %758 : vector<8x128xi1>, vector<8x128xf32>
    %760 = arith.select %757, %721, %711 : vector<8x128xi1>, vector<8x128xf32>
    %761 = arith.select %755, %715, %760 : vector<8x128xi1>, vector<8x128xf32>
    %cst_161 = arith.constant 5.000000e+00 : f32
    %762 = vector.broadcast %cst_161 : f32 to vector<8x128xf32>
    %763 = arith.cmpf ogt, %693, %762 : vector<8x128xf32>
    %cst_162 = arith.constant 5.000000e+00 : f32
    %764 = vector.broadcast %cst_162 : f32 to vector<8x128xf32>
    %765 = arith.cmpf oeq, %693, %764 : vector<8x128xf32>
    %766 = arith.select %765, %720, %714 : vector<8x128xi1>, vector<8x128xf32>
    %767 = arith.select %763, %718, %766 : vector<8x128xi1>, vector<8x128xf32>
    %768 = arith.select %765, %721, %715 : vector<8x128xi1>, vector<8x128xf32>
    %769 = arith.select %763, %719, %768 : vector<8x128xi1>, vector<8x128xf32>
    %cst_163 = arith.constant 6.000000e+00 : f32
    %770 = vector.broadcast %cst_163 : f32 to vector<8x128xf32>
    %771 = arith.cmpf ogt, %693, %770 : vector<8x128xf32>
    %cst_164 = arith.constant 6.000000e+00 : f32
    %772 = vector.broadcast %cst_164 : f32 to vector<8x128xf32>
    %773 = arith.cmpf oeq, %693, %772 : vector<8x128xf32>
    %774 = arith.select %773, %720, %718 : vector<8x128xi1>, vector<8x128xf32>
    %775 = arith.select %771, %718, %774 : vector<8x128xi1>, vector<8x128xf32>
    %776 = arith.select %773, %721, %719 : vector<8x128xi1>, vector<8x128xf32>
    %777 = arith.select %771, %719, %776 : vector<8x128xi1>, vector<8x128xf32>
    %778 = arith.subf %67, %73 : vector<8x128xf32>
    %779 = arith.subf %75, %81 : vector<8x128xf32>
    %780 = arith.subf %729, %81 : vector<8x128xf32>
    %781 = arith.mulf %778, %780 : vector<8x128xf32>
    %782 = arith.subf %727, %73 : vector<8x128xf32>
    %783 = arith.mulf %779, %782 : vector<8x128xf32>
    %784 = arith.subf %781, %783 : vector<8x128xf32>
    %785 = arith.subf %737, %81 : vector<8x128xf32>
    %786 = arith.mulf %778, %785 : vector<8x128xf32>
    %787 = arith.subf %735, %73 : vector<8x128xf32>
    %788 = arith.mulf %779, %787 : vector<8x128xf32>
    %789 = arith.subf %786, %788 : vector<8x128xf32>
    %790 = arith.subf %745, %81 : vector<8x128xf32>
    %791 = arith.mulf %778, %790 : vector<8x128xf32>
    %792 = arith.subf %743, %73 : vector<8x128xf32>
    %793 = arith.mulf %779, %792 : vector<8x128xf32>
    %794 = arith.subf %791, %793 : vector<8x128xf32>
    %795 = arith.subf %753, %81 : vector<8x128xf32>
    %796 = arith.mulf %778, %795 : vector<8x128xf32>
    %797 = arith.subf %751, %73 : vector<8x128xf32>
    %798 = arith.mulf %779, %797 : vector<8x128xf32>
    %799 = arith.subf %796, %798 : vector<8x128xf32>
    %800 = arith.subf %761, %81 : vector<8x128xf32>
    %801 = arith.mulf %778, %800 : vector<8x128xf32>
    %802 = arith.subf %759, %73 : vector<8x128xf32>
    %803 = arith.mulf %779, %802 : vector<8x128xf32>
    %804 = arith.subf %801, %803 : vector<8x128xf32>
    %805 = arith.subf %769, %81 : vector<8x128xf32>
    %806 = arith.mulf %778, %805 : vector<8x128xf32>
    %807 = arith.subf %767, %73 : vector<8x128xf32>
    %808 = arith.mulf %779, %807 : vector<8x128xf32>
    %809 = arith.subf %806, %808 : vector<8x128xf32>
    %810 = arith.subf %777, %81 : vector<8x128xf32>
    %811 = arith.mulf %778, %810 : vector<8x128xf32>
    %812 = arith.subf %775, %73 : vector<8x128xf32>
    %813 = arith.mulf %779, %812 : vector<8x128xf32>
    %814 = arith.subf %811, %813 : vector<8x128xf32>
    %cst_165 = arith.constant 0.000000e+00 : f32
    %815 = vector.broadcast %cst_165 : f32 to vector<8x128xf32>
    %816 = arith.cmpf oge, %784, %815 : vector<8x128xf32>
    %cst_166 = arith.constant 0.000000e+00 : f32
    %817 = vector.broadcast %cst_166 : f32 to vector<8x128xf32>
    %818 = arith.cmpf oge, %789, %817 : vector<8x128xf32>
    %cst_167 = arith.constant 0.000000e+00 : f32
    %819 = vector.broadcast %cst_167 : f32 to vector<8x128xf32>
    %820 = arith.cmpf oge, %794, %819 : vector<8x128xf32>
    %cst_168 = arith.constant 0.000000e+00 : f32
    %821 = vector.broadcast %cst_168 : f32 to vector<8x128xf32>
    %822 = arith.cmpf oge, %799, %821 : vector<8x128xf32>
    %cst_169 = arith.constant 0.000000e+00 : f32
    %823 = vector.broadcast %cst_169 : f32 to vector<8x128xf32>
    %824 = arith.cmpf oge, %804, %823 : vector<8x128xf32>
    %cst_170 = arith.constant 0.000000e+00 : f32
    %825 = vector.broadcast %cst_170 : f32 to vector<8x128xf32>
    %826 = arith.cmpf oge, %809, %825 : vector<8x128xf32>
    %cst_171 = arith.constant 0.000000e+00 : f32
    %827 = vector.broadcast %cst_171 : f32 to vector<8x128xf32>
    %828 = arith.cmpf oge, %814, %827 : vector<8x128xf32>
    %829 = arith.subf %814, %784 : vector<8x128xf32>
    %830 = math.absf %829 : vector<8x128xf32>
    %cst_172 = arith.constant 9.99999996E-13 : f32
    %831 = vector.broadcast %cst_172 : f32 to vector<8x128xf32>
    %832 = arith.cmpf olt, %830, %831 : vector<8x128xf32>
    %cst_173 = arith.constant 0.000000e+00 : f32
    %833 = vector.broadcast %cst_173 : f32 to vector<8x128xf32>
    %834 = arith.cmpf olt, %829, %833 : vector<8x128xf32>
    %cst_174 = arith.constant -9.99999996E-13 : f32
    %cst_175 = arith.constant 9.99999996E-13 : f32
    %835 = vector.broadcast %cst_174 : f32 to vector<8x128xf32>
    %836 = vector.broadcast %cst_175 : f32 to vector<8x128xf32>
    %837 = arith.select %834, %835, %836 : vector<8x128xi1>, vector<8x128xf32>
    %838 = arith.select %832, %837, %829 : vector<8x128xi1>, vector<8x128xf32>
    %839 = tpu.reciprocal %838 {approx = true} : vector<8x128xf32> -> vector<8x128xf32>
    %840 = arith.mulf %814, %839 : vector<8x128xf32>
    %841 = arith.subf %727, %775 : vector<8x128xf32>
    %842 = arith.mulf %840, %841 : vector<8x128xf32>
    %843 = arith.addf %775, %842 : vector<8x128xf32>
    %844 = arith.subf %729, %777 : vector<8x128xf32>
    %845 = arith.mulf %840, %844 : vector<8x128xf32>
    %846 = arith.addf %777, %845 : vector<8x128xf32>
    %847 = arith.subf %784, %789 : vector<8x128xf32>
    %848 = math.absf %847 : vector<8x128xf32>
    %cst_176 = arith.constant 9.99999996E-13 : f32
    %849 = vector.broadcast %cst_176 : f32 to vector<8x128xf32>
    %850 = arith.cmpf olt, %848, %849 : vector<8x128xf32>
    %cst_177 = arith.constant 0.000000e+00 : f32
    %851 = vector.broadcast %cst_177 : f32 to vector<8x128xf32>
    %852 = arith.cmpf olt, %847, %851 : vector<8x128xf32>
    %cst_178 = arith.constant -9.99999996E-13 : f32
    %cst_179 = arith.constant 9.99999996E-13 : f32
    %853 = vector.broadcast %cst_178 : f32 to vector<8x128xf32>
    %854 = vector.broadcast %cst_179 : f32 to vector<8x128xf32>
    %855 = arith.select %852, %853, %854 : vector<8x128xi1>, vector<8x128xf32>
    %856 = arith.select %850, %855, %847 : vector<8x128xi1>, vector<8x128xf32>
    %857 = tpu.reciprocal %856 {approx = true} : vector<8x128xf32> -> vector<8x128xf32>
    %858 = arith.mulf %784, %857 : vector<8x128xf32>
    %859 = arith.subf %735, %727 : vector<8x128xf32>
    %860 = arith.mulf %858, %859 : vector<8x128xf32>
    %861 = arith.addf %727, %860 : vector<8x128xf32>
    %862 = arith.subf %737, %729 : vector<8x128xf32>
    %863 = arith.mulf %858, %862 : vector<8x128xf32>
    %864 = arith.addf %729, %863 : vector<8x128xf32>
    %865 = arith.subf %789, %794 : vector<8x128xf32>
    %866 = math.absf %865 : vector<8x128xf32>
    %cst_180 = arith.constant 9.99999996E-13 : f32
    %867 = vector.broadcast %cst_180 : f32 to vector<8x128xf32>
    %868 = arith.cmpf olt, %866, %867 : vector<8x128xf32>
    %cst_181 = arith.constant 0.000000e+00 : f32
    %869 = vector.broadcast %cst_181 : f32 to vector<8x128xf32>
    %870 = arith.cmpf olt, %865, %869 : vector<8x128xf32>
    %cst_182 = arith.constant -9.99999996E-13 : f32
    %cst_183 = arith.constant 9.99999996E-13 : f32
    %871 = vector.broadcast %cst_182 : f32 to vector<8x128xf32>
    %872 = vector.broadcast %cst_183 : f32 to vector<8x128xf32>
    %873 = arith.select %870, %871, %872 : vector<8x128xi1>, vector<8x128xf32>
    %874 = arith.select %868, %873, %865 : vector<8x128xi1>, vector<8x128xf32>
    %875 = tpu.reciprocal %874 {approx = true} : vector<8x128xf32> -> vector<8x128xf32>
    %876 = arith.mulf %789, %875 : vector<8x128xf32>
    %877 = arith.subf %743, %735 : vector<8x128xf32>
    %878 = arith.mulf %876, %877 : vector<8x128xf32>
    %879 = arith.addf %735, %878 : vector<8x128xf32>
    %880 = arith.subf %745, %737 : vector<8x128xf32>
    %881 = arith.mulf %876, %880 : vector<8x128xf32>
    %882 = arith.addf %737, %881 : vector<8x128xf32>
    %883 = arith.subf %794, %799 : vector<8x128xf32>
    %884 = math.absf %883 : vector<8x128xf32>
    %cst_184 = arith.constant 9.99999996E-13 : f32
    %885 = vector.broadcast %cst_184 : f32 to vector<8x128xf32>
    %886 = arith.cmpf olt, %884, %885 : vector<8x128xf32>
    %cst_185 = arith.constant 0.000000e+00 : f32
    %887 = vector.broadcast %cst_185 : f32 to vector<8x128xf32>
    %888 = arith.cmpf olt, %883, %887 : vector<8x128xf32>
    %cst_186 = arith.constant -9.99999996E-13 : f32
    %cst_187 = arith.constant 9.99999996E-13 : f32
    %889 = vector.broadcast %cst_186 : f32 to vector<8x128xf32>
    %890 = vector.broadcast %cst_187 : f32 to vector<8x128xf32>
    %891 = arith.select %888, %889, %890 : vector<8x128xi1>, vector<8x128xf32>
    %892 = arith.select %886, %891, %883 : vector<8x128xi1>, vector<8x128xf32>
    %893 = tpu.reciprocal %892 {approx = true} : vector<8x128xf32> -> vector<8x128xf32>
    %894 = arith.mulf %794, %893 : vector<8x128xf32>
    %895 = arith.subf %751, %743 : vector<8x128xf32>
    %896 = arith.mulf %894, %895 : vector<8x128xf32>
    %897 = arith.addf %743, %896 : vector<8x128xf32>
    %898 = arith.subf %753, %745 : vector<8x128xf32>
    %899 = arith.mulf %894, %898 : vector<8x128xf32>
    %900 = arith.addf %745, %899 : vector<8x128xf32>
    %901 = arith.subf %799, %804 : vector<8x128xf32>
    %902 = math.absf %901 : vector<8x128xf32>
    %cst_188 = arith.constant 9.99999996E-13 : f32
    %903 = vector.broadcast %cst_188 : f32 to vector<8x128xf32>
    %904 = arith.cmpf olt, %902, %903 : vector<8x128xf32>
    %cst_189 = arith.constant 0.000000e+00 : f32
    %905 = vector.broadcast %cst_189 : f32 to vector<8x128xf32>
    %906 = arith.cmpf olt, %901, %905 : vector<8x128xf32>
    %cst_190 = arith.constant -9.99999996E-13 : f32
    %cst_191 = arith.constant 9.99999996E-13 : f32
    %907 = vector.broadcast %cst_190 : f32 to vector<8x128xf32>
    %908 = vector.broadcast %cst_191 : f32 to vector<8x128xf32>
    %909 = arith.select %906, %907, %908 : vector<8x128xi1>, vector<8x128xf32>
    %910 = arith.select %904, %909, %901 : vector<8x128xi1>, vector<8x128xf32>
    %911 = tpu.reciprocal %910 {approx = true} : vector<8x128xf32> -> vector<8x128xf32>
    %912 = arith.mulf %799, %911 : vector<8x128xf32>
    %913 = arith.subf %759, %751 : vector<8x128xf32>
    %914 = arith.mulf %912, %913 : vector<8x128xf32>
    %915 = arith.addf %751, %914 : vector<8x128xf32>
    %916 = arith.subf %761, %753 : vector<8x128xf32>
    %917 = arith.mulf %912, %916 : vector<8x128xf32>
    %918 = arith.addf %753, %917 : vector<8x128xf32>
    %919 = arith.subf %804, %809 : vector<8x128xf32>
    %920 = math.absf %919 : vector<8x128xf32>
    %cst_192 = arith.constant 9.99999996E-13 : f32
    %921 = vector.broadcast %cst_192 : f32 to vector<8x128xf32>
    %922 = arith.cmpf olt, %920, %921 : vector<8x128xf32>
    %cst_193 = arith.constant 0.000000e+00 : f32
    %923 = vector.broadcast %cst_193 : f32 to vector<8x128xf32>
    %924 = arith.cmpf olt, %919, %923 : vector<8x128xf32>
    %cst_194 = arith.constant -9.99999996E-13 : f32
    %cst_195 = arith.constant 9.99999996E-13 : f32
    %925 = vector.broadcast %cst_194 : f32 to vector<8x128xf32>
    %926 = vector.broadcast %cst_195 : f32 to vector<8x128xf32>
    %927 = arith.select %924, %925, %926 : vector<8x128xi1>, vector<8x128xf32>
    %928 = arith.select %922, %927, %919 : vector<8x128xi1>, vector<8x128xf32>
    %929 = tpu.reciprocal %928 {approx = true} : vector<8x128xf32> -> vector<8x128xf32>
    %930 = arith.mulf %804, %929 : vector<8x128xf32>
    %931 = arith.subf %767, %759 : vector<8x128xf32>
    %932 = arith.mulf %930, %931 : vector<8x128xf32>
    %933 = arith.addf %759, %932 : vector<8x128xf32>
    %934 = arith.subf %769, %761 : vector<8x128xf32>
    %935 = arith.mulf %930, %934 : vector<8x128xf32>
    %936 = arith.addf %761, %935 : vector<8x128xf32>
    %937 = arith.subf %809, %814 : vector<8x128xf32>
    %938 = math.absf %937 : vector<8x128xf32>
    %cst_196 = arith.constant 9.99999996E-13 : f32
    %939 = vector.broadcast %cst_196 : f32 to vector<8x128xf32>
    %940 = arith.cmpf olt, %938, %939 : vector<8x128xf32>
    %cst_197 = arith.constant 0.000000e+00 : f32
    %941 = vector.broadcast %cst_197 : f32 to vector<8x128xf32>
    %942 = arith.cmpf olt, %937, %941 : vector<8x128xf32>
    %cst_198 = arith.constant -9.99999996E-13 : f32
    %cst_199 = arith.constant 9.99999996E-13 : f32
    %943 = vector.broadcast %cst_198 : f32 to vector<8x128xf32>
    %944 = vector.broadcast %cst_199 : f32 to vector<8x128xf32>
    %945 = arith.select %942, %943, %944 : vector<8x128xi1>, vector<8x128xf32>
    %946 = arith.select %940, %945, %937 : vector<8x128xi1>, vector<8x128xf32>
    %947 = tpu.reciprocal %946 {approx = true} : vector<8x128xf32> -> vector<8x128xf32>
    %948 = arith.mulf %809, %947 : vector<8x128xf32>
    %949 = arith.subf %775, %767 : vector<8x128xf32>
    %950 = arith.mulf %948, %949 : vector<8x128xf32>
    %951 = arith.addf %767, %950 : vector<8x128xf32>
    %952 = arith.subf %777, %769 : vector<8x128xf32>
    %953 = arith.mulf %948, %952 : vector<8x128xf32>
    %954 = arith.addf %769, %953 : vector<8x128xf32>
    %cst_200 = arith.constant 0.000000e+00 : f32
    %955 = vector.broadcast %cst_200 : f32 to vector<8x128xf32>
    %cst_201 = arith.constant 0.000000e+00 : f32
    %956 = vector.broadcast %cst_201 : f32 to vector<8x128xf32>
    %cst_202 = arith.constant 7.000000e+00 : f32
    %957 = vector.broadcast %cst_202 : f32 to vector<8x128xf32>
    %cst_203 = arith.constant dense<true> : vector<8x128xi1>
    %958 = arith.xori %828, %cst_203 : vector<8x128xi1>
    %959 = arith.andi %958, %816 : vector<8x128xi1>
    %960 = arith.select %959, %843, %955 : vector<8x128xi1>, vector<8x128xf32>
    %961 = arith.select %959, %846, %956 : vector<8x128xi1>, vector<8x128xf32>
    %cst_204 = arith.constant 0.000000e+00 : f32
    %962 = vector.broadcast %cst_204 : f32 to vector<8x128xf32>
    %963 = arith.select %959, %962, %957 : vector<8x128xi1>, vector<8x128xf32>
    %cst_205 = arith.constant dense<true> : vector<8x128xi1>
    %964 = arith.xori %816, %cst_205 : vector<8x128xi1>
    %965 = arith.andi %964, %818 : vector<8x128xi1>
    %966 = arith.select %965, %861, %960 : vector<8x128xi1>, vector<8x128xf32>
    %967 = arith.select %965, %864, %961 : vector<8x128xi1>, vector<8x128xf32>
    %cst_206 = arith.constant 1.000000e+00 : f32
    %968 = vector.broadcast %cst_206 : f32 to vector<8x128xf32>
    %969 = arith.select %965, %968, %963 : vector<8x128xi1>, vector<8x128xf32>
    %cst_207 = arith.constant dense<true> : vector<8x128xi1>
    %970 = arith.xori %818, %cst_207 : vector<8x128xi1>
    %971 = arith.andi %970, %820 : vector<8x128xi1>
    %972 = arith.select %971, %879, %966 : vector<8x128xi1>, vector<8x128xf32>
    %973 = arith.select %971, %882, %967 : vector<8x128xi1>, vector<8x128xf32>
    %cst_208 = arith.constant 2.000000e+00 : f32
    %974 = vector.broadcast %cst_208 : f32 to vector<8x128xf32>
    %975 = arith.select %971, %974, %969 : vector<8x128xi1>, vector<8x128xf32>
    %cst_209 = arith.constant dense<true> : vector<8x128xi1>
    %976 = arith.xori %820, %cst_209 : vector<8x128xi1>
    %977 = arith.andi %976, %822 : vector<8x128xi1>
    %978 = arith.select %977, %897, %972 : vector<8x128xi1>, vector<8x128xf32>
    %979 = arith.select %977, %900, %973 : vector<8x128xi1>, vector<8x128xf32>
    %cst_210 = arith.constant 3.000000e+00 : f32
    %980 = vector.broadcast %cst_210 : f32 to vector<8x128xf32>
    %981 = arith.select %977, %980, %975 : vector<8x128xi1>, vector<8x128xf32>
    %cst_211 = arith.constant dense<true> : vector<8x128xi1>
    %982 = arith.xori %822, %cst_211 : vector<8x128xi1>
    %983 = arith.andi %982, %824 : vector<8x128xi1>
    %984 = arith.select %983, %915, %978 : vector<8x128xi1>, vector<8x128xf32>
    %985 = arith.select %983, %918, %979 : vector<8x128xi1>, vector<8x128xf32>
    %cst_212 = arith.constant 4.000000e+00 : f32
    %986 = vector.broadcast %cst_212 : f32 to vector<8x128xf32>
    %987 = arith.select %983, %986, %981 : vector<8x128xi1>, vector<8x128xf32>
    %cst_213 = arith.constant dense<true> : vector<8x128xi1>
    %988 = arith.xori %824, %cst_213 : vector<8x128xi1>
    %989 = arith.andi %988, %826 : vector<8x128xi1>
    %990 = arith.select %989, %933, %984 : vector<8x128xi1>, vector<8x128xf32>
    %991 = arith.select %989, %936, %985 : vector<8x128xi1>, vector<8x128xf32>
    %cst_214 = arith.constant 5.000000e+00 : f32
    %992 = vector.broadcast %cst_214 : f32 to vector<8x128xf32>
    %993 = arith.select %989, %992, %987 : vector<8x128xi1>, vector<8x128xf32>
    %cst_215 = arith.constant dense<true> : vector<8x128xi1>
    %994 = arith.xori %826, %cst_215 : vector<8x128xi1>
    %995 = arith.andi %994, %828 : vector<8x128xi1>
    %996 = arith.select %995, %951, %990 : vector<8x128xi1>, vector<8x128xf32>
    %997 = arith.select %995, %954, %991 : vector<8x128xi1>, vector<8x128xf32>
    %cst_216 = arith.constant 6.000000e+00 : f32
    %998 = vector.broadcast %cst_216 : f32 to vector<8x128xf32>
    %999 = arith.select %995, %998, %993 : vector<8x128xi1>, vector<8x128xf32>
    %cst_217 = arith.constant 7.000000e+00 : f32
    %1000 = vector.broadcast %cst_217 : f32 to vector<8x128xf32>
    %1001 = arith.cmpf olt, %999, %1000 : vector<8x128xf32>
    %1002 = arith.select %828, %843, %996 : vector<8x128xi1>, vector<8x128xf32>
    %1003 = arith.select %828, %846, %997 : vector<8x128xi1>, vector<8x128xf32>
    %1004 = arith.select %816, %727, %1002 : vector<8x128xi1>, vector<8x128xf32>
    %1005 = arith.select %816, %729, %1003 : vector<8x128xi1>, vector<8x128xf32>
    %1006 = arith.select %816, %861, %996 : vector<8x128xi1>, vector<8x128xf32>
    %1007 = arith.select %816, %864, %997 : vector<8x128xi1>, vector<8x128xf32>
    %1008 = arith.select %818, %735, %1006 : vector<8x128xi1>, vector<8x128xf32>
    %1009 = arith.select %818, %737, %1007 : vector<8x128xi1>, vector<8x128xf32>
    %1010 = arith.select %818, %879, %996 : vector<8x128xi1>, vector<8x128xf32>
    %1011 = arith.select %818, %882, %997 : vector<8x128xi1>, vector<8x128xf32>
    %1012 = arith.select %820, %743, %1010 : vector<8x128xi1>, vector<8x128xf32>
    %1013 = arith.select %820, %745, %1011 : vector<8x128xi1>, vector<8x128xf32>
    %1014 = arith.select %820, %897, %996 : vector<8x128xi1>, vector<8x128xf32>
    %1015 = arith.select %820, %900, %997 : vector<8x128xi1>, vector<8x128xf32>
    %1016 = arith.select %822, %751, %1014 : vector<8x128xi1>, vector<8x128xf32>
    %1017 = arith.select %822, %753, %1015 : vector<8x128xi1>, vector<8x128xf32>
    %1018 = arith.select %822, %915, %996 : vector<8x128xi1>, vector<8x128xf32>
    %1019 = arith.select %822, %918, %997 : vector<8x128xi1>, vector<8x128xf32>
    %1020 = arith.select %824, %759, %1018 : vector<8x128xi1>, vector<8x128xf32>
    %1021 = arith.select %824, %761, %1019 : vector<8x128xi1>, vector<8x128xf32>
    %1022 = arith.select %824, %933, %996 : vector<8x128xi1>, vector<8x128xf32>
    %1023 = arith.select %824, %936, %997 : vector<8x128xi1>, vector<8x128xf32>
    %1024 = arith.select %826, %767, %1022 : vector<8x128xi1>, vector<8x128xf32>
    %1025 = arith.select %826, %769, %1023 : vector<8x128xi1>, vector<8x128xf32>
    %1026 = arith.select %826, %951, %996 : vector<8x128xi1>, vector<8x128xf32>
    %1027 = arith.select %826, %954, %997 : vector<8x128xi1>, vector<8x128xf32>
    %1028 = arith.select %828, %775, %1026 : vector<8x128xi1>, vector<8x128xf32>
    %1029 = arith.select %828, %777, %1027 : vector<8x128xi1>, vector<8x128xf32>
    %1030 = arith.select %1001, %996, %1028 : vector<8x128xi1>, vector<8x128xf32>
    %1031 = arith.select %1001, %997, %1029 : vector<8x128xi1>, vector<8x128xf32>
    %cst_218 = arith.constant 0.000000e+00 : f32
    %1032 = vector.broadcast %cst_218 : f32 to vector<8x128xf32>
    %1033 = arith.cmpf ogt, %999, %1032 : vector<8x128xf32>
    %cst_219 = arith.constant 0.000000e+00 : f32
    %1034 = vector.broadcast %cst_219 : f32 to vector<8x128xf32>
    %1035 = arith.cmpf oeq, %999, %1034 : vector<8x128xf32>
    %1036 = arith.select %1035, %1030, %1028 : vector<8x128xi1>, vector<8x128xf32>
    %1037 = arith.select %1033, %1004, %1036 : vector<8x128xi1>, vector<8x128xf32>
    %1038 = arith.select %1035, %1031, %1029 : vector<8x128xi1>, vector<8x128xf32>
    %1039 = arith.select %1033, %1005, %1038 : vector<8x128xi1>, vector<8x128xf32>
    %cst_220 = arith.constant 1.000000e+00 : f32
    %1040 = vector.broadcast %cst_220 : f32 to vector<8x128xf32>
    %1041 = arith.cmpf ogt, %999, %1040 : vector<8x128xf32>
    %cst_221 = arith.constant 1.000000e+00 : f32
    %1042 = vector.broadcast %cst_221 : f32 to vector<8x128xf32>
    %1043 = arith.cmpf oeq, %999, %1042 : vector<8x128xf32>
    %1044 = arith.select %1043, %1030, %1004 : vector<8x128xi1>, vector<8x128xf32>
    %1045 = arith.select %1041, %1008, %1044 : vector<8x128xi1>, vector<8x128xf32>
    %1046 = arith.select %1043, %1031, %1005 : vector<8x128xi1>, vector<8x128xf32>
    %1047 = arith.select %1041, %1009, %1046 : vector<8x128xi1>, vector<8x128xf32>
    %cst_222 = arith.constant 2.000000e+00 : f32
    %1048 = vector.broadcast %cst_222 : f32 to vector<8x128xf32>
    %1049 = arith.cmpf ogt, %999, %1048 : vector<8x128xf32>
    %cst_223 = arith.constant 2.000000e+00 : f32
    %1050 = vector.broadcast %cst_223 : f32 to vector<8x128xf32>
    %1051 = arith.cmpf oeq, %999, %1050 : vector<8x128xf32>
    %1052 = arith.select %1051, %1030, %1008 : vector<8x128xi1>, vector<8x128xf32>
    %1053 = arith.select %1049, %1012, %1052 : vector<8x128xi1>, vector<8x128xf32>
    %1054 = arith.select %1051, %1031, %1009 : vector<8x128xi1>, vector<8x128xf32>
    %1055 = arith.select %1049, %1013, %1054 : vector<8x128xi1>, vector<8x128xf32>
    %cst_224 = arith.constant 3.000000e+00 : f32
    %1056 = vector.broadcast %cst_224 : f32 to vector<8x128xf32>
    %1057 = arith.cmpf ogt, %999, %1056 : vector<8x128xf32>
    %cst_225 = arith.constant 3.000000e+00 : f32
    %1058 = vector.broadcast %cst_225 : f32 to vector<8x128xf32>
    %1059 = arith.cmpf oeq, %999, %1058 : vector<8x128xf32>
    %1060 = arith.select %1059, %1030, %1012 : vector<8x128xi1>, vector<8x128xf32>
    %1061 = arith.select %1057, %1016, %1060 : vector<8x128xi1>, vector<8x128xf32>
    %1062 = arith.select %1059, %1031, %1013 : vector<8x128xi1>, vector<8x128xf32>
    %1063 = arith.select %1057, %1017, %1062 : vector<8x128xi1>, vector<8x128xf32>
    %cst_226 = arith.constant 4.000000e+00 : f32
    %1064 = vector.broadcast %cst_226 : f32 to vector<8x128xf32>
    %1065 = arith.cmpf ogt, %999, %1064 : vector<8x128xf32>
    %cst_227 = arith.constant 4.000000e+00 : f32
    %1066 = vector.broadcast %cst_227 : f32 to vector<8x128xf32>
    %1067 = arith.cmpf oeq, %999, %1066 : vector<8x128xf32>
    %1068 = arith.select %1067, %1030, %1016 : vector<8x128xi1>, vector<8x128xf32>
    %1069 = arith.select %1065, %1020, %1068 : vector<8x128xi1>, vector<8x128xf32>
    %1070 = arith.select %1067, %1031, %1017 : vector<8x128xi1>, vector<8x128xf32>
    %1071 = arith.select %1065, %1021, %1070 : vector<8x128xi1>, vector<8x128xf32>
    %cst_228 = arith.constant 5.000000e+00 : f32
    %1072 = vector.broadcast %cst_228 : f32 to vector<8x128xf32>
    %1073 = arith.cmpf ogt, %999, %1072 : vector<8x128xf32>
    %cst_229 = arith.constant 5.000000e+00 : f32
    %1074 = vector.broadcast %cst_229 : f32 to vector<8x128xf32>
    %1075 = arith.cmpf oeq, %999, %1074 : vector<8x128xf32>
    %1076 = arith.select %1075, %1030, %1020 : vector<8x128xi1>, vector<8x128xf32>
    %1077 = arith.select %1073, %1024, %1076 : vector<8x128xi1>, vector<8x128xf32>
    %1078 = arith.select %1075, %1031, %1021 : vector<8x128xi1>, vector<8x128xf32>
    %1079 = arith.select %1073, %1025, %1078 : vector<8x128xi1>, vector<8x128xf32>
    %cst_230 = arith.constant 6.000000e+00 : f32
    %1080 = vector.broadcast %cst_230 : f32 to vector<8x128xf32>
    %1081 = arith.cmpf ogt, %999, %1080 : vector<8x128xf32>
    %cst_231 = arith.constant 6.000000e+00 : f32
    %1082 = vector.broadcast %cst_231 : f32 to vector<8x128xf32>
    %1083 = arith.cmpf oeq, %999, %1082 : vector<8x128xf32>
    %1084 = arith.select %1083, %1030, %1024 : vector<8x128xi1>, vector<8x128xf32>
    %1085 = arith.select %1081, %1028, %1084 : vector<8x128xi1>, vector<8x128xf32>
    %1086 = arith.select %1083, %1031, %1025 : vector<8x128xi1>, vector<8x128xf32>
    %1087 = arith.select %1081, %1029, %1086 : vector<8x128xi1>, vector<8x128xf32>
    %cst_232 = arith.constant 7.000000e+00 : f32
    %1088 = vector.broadcast %cst_232 : f32 to vector<8x128xf32>
    %1089 = arith.cmpf ogt, %999, %1088 : vector<8x128xf32>
    %cst_233 = arith.constant 7.000000e+00 : f32
    %1090 = vector.broadcast %cst_233 : f32 to vector<8x128xf32>
    %1091 = arith.cmpf oeq, %999, %1090 : vector<8x128xf32>
    %1092 = arith.select %1091, %1030, %1028 : vector<8x128xi1>, vector<8x128xf32>
    %1093 = arith.select %1089, %1028, %1092 : vector<8x128xi1>, vector<8x128xf32>
    %1094 = arith.select %1091, %1031, %1029 : vector<8x128xi1>, vector<8x128xf32>
    %1095 = arith.select %1089, %1029, %1094 : vector<8x128xi1>, vector<8x128xf32>
    %1096 = arith.mulf %1093, %1039 : vector<8x128xf32>
    %1097 = arith.mulf %1095, %1037 : vector<8x128xf32>
    %1098 = arith.subf %1096, %1097 : vector<8x128xf32>
    %1099 = arith.mulf %1037, %1047 : vector<8x128xf32>
    %1100 = arith.mulf %1039, %1045 : vector<8x128xf32>
    %1101 = arith.subf %1099, %1100 : vector<8x128xf32>
    %1102 = arith.addf %1098, %1101 : vector<8x128xf32>
    %1103 = arith.mulf %1045, %1055 : vector<8x128xf32>
    %1104 = arith.mulf %1047, %1053 : vector<8x128xf32>
    %1105 = arith.subf %1103, %1104 : vector<8x128xf32>
    %1106 = arith.addf %1102, %1105 : vector<8x128xf32>
    %1107 = arith.mulf %1053, %1063 : vector<8x128xf32>
    %1108 = arith.mulf %1055, %1061 : vector<8x128xf32>
    %1109 = arith.subf %1107, %1108 : vector<8x128xf32>
    %1110 = arith.addf %1106, %1109 : vector<8x128xf32>
    %1111 = arith.mulf %1061, %1071 : vector<8x128xf32>
    %1112 = arith.mulf %1063, %1069 : vector<8x128xf32>
    %1113 = arith.subf %1111, %1112 : vector<8x128xf32>
    %1114 = arith.addf %1110, %1113 : vector<8x128xf32>
    %1115 = arith.mulf %1069, %1079 : vector<8x128xf32>
    %1116 = arith.mulf %1071, %1077 : vector<8x128xf32>
    %1117 = arith.subf %1115, %1116 : vector<8x128xf32>
    %1118 = arith.addf %1114, %1117 : vector<8x128xf32>
    %1119 = arith.mulf %1077, %1087 : vector<8x128xf32>
    %1120 = arith.mulf %1079, %1085 : vector<8x128xf32>
    %1121 = arith.subf %1119, %1120 : vector<8x128xf32>
    %1122 = arith.addf %1118, %1121 : vector<8x128xf32>
    %1123 = arith.mulf %1085, %1095 : vector<8x128xf32>
    %1124 = arith.mulf %1087, %1093 : vector<8x128xf32>
    %1125 = arith.subf %1123, %1124 : vector<8x128xf32>
    %1126 = arith.addf %1122, %1125 : vector<8x128xf32>
    %1127 = math.absf %1126 : vector<8x128xf32>
    %cst_234 = arith.constant 5.000000e-01 : f32
    %1128 = vector.broadcast %cst_234 : f32 to vector<8x128xf32>
    %1129 = arith.mulf %1128, %1127 : vector<8x128xf32>
    %1130 = arith.mulf %7, %9 : vector<8x128xf32>
    %1131 = arith.mulf %17, %19 : vector<8x128xf32>
    %1132 = arith.addf %1130, %1131 : vector<8x128xf32>
    %1133 = arith.subf %1132, %1129 : vector<8x128xf32>
    %1134 = arith.divf %1129, %1133 : vector<8x128xf32>
    %cst_235 = arith.constant 9.99999997E-7 : f32
    %1135 = vector.broadcast %cst_235 : f32 to vector<8x128xf32>
    %1136 = arith.maximumf %1134, %1135 : vector<8x128xf32>
    %1137 = math.log %1136 : vector<8x128xf32>
    %cst_236 = arith.constant 0.000000e+00 : f32
    %1138 = vector.broadcast %cst_236 : f32 to vector<8x128xf32>
    %1139 = arith.subf %1138, %1137 : vector<8x128xf32>
    %c0_237 = arith.constant 0 : index
    %c0_238 = arith.constant 0 : index
    %1140 = vector.load %arg3[%c0_237, %c0_238] : memref<8x128xf32, #tpu.memory_space<vmem>>, vector<8x128xf32>
    tpu.vector_store %arg3[%c0_237, %c0_238], %1139 {strides = array<i32>} : memref<8x128xf32, #tpu.memory_space<vmem>>, vector<8x128xf32>,
    return
  }
  func.func @transform_0(%arg0: i32) -> (i32, i32, i32) {
    %c0_i32 = arith.constant 0 : i32
    %c0_i32_0 = arith.constant 0 : i32
    %c0_i32_1 = arith.constant 0 : i32
    return %c0_i32, %arg0, %c0_i32_0 : i32, i32, i32
  }
  func.func @transform_1(%arg0: i32) -> (i32, i32, i32) {
    %c0_i32 = arith.constant 0 : i32
    %c0_i32_0 = arith.constant 0 : i32
    %c0_i32_1 = arith.constant 0 : i32
    return %c0_i32, %arg0, %c0_i32_0 : i32, i32, i32
  }
  func.func @transform_2(%arg0: i32) -> (i32, i32) {
    %c0_i32 = arith.constant 0 : i32
    %c0_i32_0 = arith.constant 0 : i32
    return %arg0, %c0_i32 : i32, i32
  }
}

</mosaic_0001>

<bundles_post_ra>
// kernel: rotated_iou_loss_elementwise.1
= control target key start
LH: loop header
LB: loop body
LE: loop exit
PB: predicated region body
PF: predicated region fallthrough
CT: control target
= control target key end

     0   :  { %v1429_v21 = vmov 683565275   ;;  %v1430_v23 = vmov 2475754826   ;;  %v1431_v25 = vmov 2131351028   ;;  %s3059_s0 = inlined_call_operand.vmem [shape: f32[5,8,128], index: 0, kind: input, shape index: {}]   ;;  %s3060_s1 = inlined_call_operand.vmem [shape: f32[5,8,128], index: 1, kind: input, shape index: {}]   ;;  %s3061_s2 = inlined_call_operand.vmem [shape: f32[8,128], index: 2, kind: output, shape index: {}]  }
   0x1   :  { %v1459_v0 = vld [vmem:[%s3059_s0 + $0x20] sm:$0xff]  ;;  %v1432_v27 = vmov 2102212464   ;;  %v1433_v29 = vmov 920167782  }
   0x2   :  { %v21_v1 = vand.u32 2147483647, %v1459_v0  ;;  %v1465_v2 = vld [vmem:[%s3060_s1 + $0x20] sm:$0xff]  ;;  %v24_v3 = vand.u32 2139095040, %v1459_v0  ;;  %v1434_v37 = vmov 1326507024  }
   0x3   :  { %v249_v5 = vand.u32 2139095040, %v1465_v2  ;;  %v246_v7 = vand.u32 2147483647, %v1465_v2  ;;  %vm23_vm14 = vcmp.lt.s32.totalorder %v1459_v0, 0 }
   0x4   :  { %v25_v4 = vshrl.u32 %v24_v3, 23  ;;  %v28_v6 = vand.u32 8388607, %v21_v1  ;;  %vm22_vm15 = vcmp.le.f32.partialorder %v21_v1, 0.7853982 }
   0x5   :  { %v250_v9 = vshrl.u32 %v249_v5, 23  ;;  %v1474_v13 = vand.u32 8388607, %v246_v7 }
   0x6   :  { %v1333_v8 = vadd.s32 4294967169, %v25_v4  ;;  %v29_v12 = vor.u32 8388608, %v28_v6 }
   0x7   :  { %v1341_v11 = vadd.s32 4294967169, %v250_v9  ;;  %v254_v19 = vor.u32 8388608, %v1474_v13 }
   0x8   :  { %v31_v10 = vadd.s32 1, %v1333_v8  ;;  %v1476_v18 = vshll.u32 %v29_v12, 8 }
   0x9   :  { %v256_v14 = vadd.s32 1, %v1341_v11 }
   0xa   :  { %vm32_vm0 = vcmp.gt.s32.totalorder %v31_v10, 0 }
   0xb   :  { %v33_v15 = vsel %vm32_vm0, %v31_v10, 0  ;;  %vm257_vm1 = vcmp.gt.s32.totalorder %v256_v14, 0  ;;  %vm248_vm0 = vcmp.lt.s32.totalorder %v1465_v2, 0 }
   0xc   :  { %v34_v16 = vshrl.u32 %v33_v15, 5  ;;  %v35_v17 = vand.u32 31, %v33_v15  ;;  %v258_v31 = vsel %vm257_vm1, %v256_v14, 0  ;;  %vm247_vm1 = vcmp.le.f32.partialorder %v246_v7, 0.7853982  ;;  %v13_v7 = vld [vmem:[%s3059_s0 + $0x10] sm:$0xff] }
   0xd   :  { %v259_v44 = vshrl.u32 %v258_v31, 5  ;;  %v260_v45 = vand.u32 31, %v258_v31 }
   0xe   :  { %v36_v20 = vsub.s32 32, %v35_v17  ;;  %v38_v22 = vshll.u32 %v1429_v21, %v35_v17  ;;  %v41_v24 = vshll.u32 %v1430_v23, %v35_v17  ;;  %v44_v26 = vshll.u32 %v1431_v25, %v35_v17 }
   0xf   :  { %v47_v28 = vshll.u32 %v1432_v27, %v35_v17  ;;  %v50_v30 = vshll.u32 %v1433_v29, %v35_v17  ;;  %vm53_vm2 = vcmp.lt.s32.totalorder %v34_v16, 1  ;;  %vm54_vm3 = vcmp.lt.s32.totalorder %v34_v16, 2 }
  0x10   :  { %v37_v32 = vshrl.u32 %v1429_v21, %v36_v20  ;;  %v39_v33 = vshrl.u32 %v1430_v23, %v36_v20  ;;  %v42_v34 = vshrl.u32 %v1431_v25, %v36_v20  ;;  %v45_v35 = vshrl.u32 %v1432_v27, %v36_v20 }
  0x11   :  { %v48_v36 = vshrl.u32 %v1433_v29, %v36_v20  ;;  %v51_v38 = vshrl.u32 %v1434_v37, %v36_v20  ;;  %vm55_vm4 = vcmp.lt.s32.totalorder %v34_v16, 3  ;;  %vm56_vm5 = vcmp.lt.s32.totalorder %v34_v16, 4 }
  0x12   :  { %v40_v39 = vor.u32 %v39_v33, %v38_v22  ;;  %v43_v40 = vor.u32 %v42_v34, %v41_v24  ;;  %v46_v41 = vor.u32 %v45_v35, %v44_v26  ;;  %v261_v53 = vsub.s32 32, %v260_v45 }
  0x13   :  { %v49_v42 = vor.u32 %v48_v36, %v47_v28  ;;  %v52_v43 = vor.u32 %v51_v38, %v50_v30  ;;  %v263_v57 = vshll.u32 %v1429_v21, %v260_v45  ;;  %v266_v6 = vshll.u32 %v1430_v23, %v260_v45 }
  0x14   :  { %v57_v46 = vsel %vm53_vm2, %v37_v32, %v40_v39  ;;  %v58_v47 = vsel %vm56_vm5, %v46_v41, 2102212464  ;;  %v61_v48 = vsel %vm53_vm2, %v40_v39, %v43_v40  ;;  %v65_v49 = vsel %vm53_vm2, %v43_v40, %v46_v41 }
  0x15   :  { %v59_v50 = vsel %vm55_vm4, %v43_v40, %v58_v47  ;;  %v62_v51 = vsel %vm56_vm5, %v49_v42, 920167782  ;;  %v66_v52 = vsel %vm56_vm5, %v52_v43, 1326507024  ;;  %v262_v61 = vshrl.u32 %v1429_v21, %v261_v53 }
  0x16   :  { %v60_v54 = vsel %vm54_vm3, %v57_v46, %v59_v50  ;;  %v63_v55 = vsel %vm55_vm4, %v46_v41, %v62_v51  ;;  %v67_v56 = vsel %vm55_vm4, %v49_v42, %v66_v52  ;;  %v264_v5 = vshrl.u32 %v1430_v23, %v261_v53 }
  0x17   :  { %v64_v58 = vsel %vm54_vm3, %v61_v48, %v63_v55  ;;  %v68_v59 = vsel %vm54_vm3, %v65_v49, %v67_v56  ;;  %v76_v60 = vmul.u32 %v1476_v18, %v60_v54  ;;  %v267_v8 = vshrl.u32 %v1431_v25, %v261_v53 }
  0x18   :  { %v1490_v62 = vmul.u32.u64.low %v1476_v18, %v68_v59  ;;  %v1491_v63 = vmul.u32.u64.high %v1476_v18, %v68_v59, %v1490_v62  ;;  %v1494_v3 = vmul.u32.u64.low %v1476_v18, %v64_v58  ;;  %v1495_v4 = vmul.u32.u64.high %v1476_v18, %v64_v58, %v1494_v3 }
  0x19   :  { %v269_v9 = vshll.u32 %v1431_v25, %v260_v45  ;;  %v270_v10 = vshrl.u32 %v1432_v27, %v261_v53  ;;  %v272_v11 = vshll.u32 %v1432_v27, %v260_v45  ;;  %v273_v12 = vshrl.u32 %v1433_v29, %v261_v53 }
  0x1a   :  { %v275_v14 = vshll.u32 %v1433_v29, %v260_v45  ;;  %v265_v15 = vor.u32 %v264_v5, %v263_v57  ;;  %v268_v16 = vor.u32 %v267_v8, %v266_v6  ;;  %v276_v17 = vshrl.u32 %v1434_v37, %v261_v53 }
  0x1b   :  { %vm278_vm6 = vcmp.lt.s32.totalorder %v259_v44, 1  ;;  %vm78_vm7 = vc.u32 %v1491_v63, %v1494_v3  ;;  %v79_v20 = vadd.s32 1, %v1495_v4  ;;  %v271_v21 = vor.u32 %v270_v10, %v269_v9 }
  0x1c   :  { %v294_v18 = vshll.u32 %v254_v19, 8  ;;  %v274_v22 = vor.u32 %v273_v12, %v272_v11  ;;  %v277_v23 = vor.u32 %v276_v17, %v275_v14  ;;  %vm279_vm8 = vcmp.lt.s32.totalorder %v259_v44, 2 }
  0x1d   :  { %vm280_vm9 = vcmp.lt.s32.totalorder %v259_v44, 3  ;;  %v80_v24 = vsel %vm78_vm7, %v79_v20, %v1495_v4  ;;  %vm281_vm10 = vcmp.lt.s32.totalorder %v259_v44, 4  ;;  %v282_v25 = vsel %vm278_vm6, %v262_v61, %v265_v15 }
  0x1e   :  { %v286_v26 = vsel %vm278_vm6, %v265_v15, %v268_v16  ;;  %v81_v27 = vadd.s32 %v80_v24, %v76_v60  ;;  %v283_v28 = vsel %vm281_vm10, %v271_v21, 2102212464  ;;  %v287_v29 = vsel %vm281_vm10, %v274_v22, 920167782 }
  0x1f   :  { %v290_v30 = vsel %vm278_vm6, %v268_v16, %v271_v21  ;;  %v284_v31 = vsel %vm280_vm9, %v268_v16, %v283_v28  ;;  %v288_v32 = vsel %vm280_vm9, %v271_v21, %v287_v29  ;;  %v291_v13 = vsel %vm281_vm10, %v277_v23, 1326507024 }
  0x20   :  { %v82_v19 = vadd.s32 536870912, %v81_v27  ;;  %v289_v33 = vsel %vm279_vm8, %v286_v26, %v288_v32  ;;  %v292_v34 = vsel %vm280_vm9, %v274_v22, %v291_v13  ;;  %v285_v35 = vsel %vm279_vm8, %v282_v25, %v284_v31 }
  0x21   :  { %v293_v36 = vsel %vm279_vm8, %v290_v30, %v292_v34  ;;  %v1508_v37 = vmul.u32.u64.low %v294_v18, %v289_v33  ;;  %v1509_v38 = vmul.u32.u64.high %v294_v18, %v289_v33, %v1508_v37  ;;  %v301_v43 = vmul.u32 %v294_v18, %v285_v35 }
  0x22   :  { %v83_v39 = vshrl.u32 %v82_v19, 30  ;;  %v1511_v40 = vmul.u32.u64.low %v294_v18, %v293_v36  ;;  %v1512_v41 = vmul.u32.u64.high %v294_v18, %v293_v36, %v1511_v40  ;;  %v77_v55 = vadd.s32 %v1494_v3, %v1491_v63 }
  0x23   :  { %v304_v45 = vadd.s32 1, %v1509_v38  ;;  %vm113_vm7 = vweird.f32 %v1459_v0  ;;  %vm338_vm9 = vweird.f32 %v1465_v2 }
  0x24   :  { %v84_v42 = vshll.u32 %v83_v39, 30  ;;  %vm303_vm11 = vc.u32 %v1512_v41, %v1508_v37  ;;  %v107_v15 = vsub.s32 4, %v83_v39  ;;  %v302_v63 = vadd.s32 %v1508_v37, %v1512_v41 }
  0x25   :  { %v305_v47 = vsel %vm303_vm11, %v304_v45, %v1509_v38 }
  0x26   :  { %v85_v46 = vsub.s32 %v81_v27, %v84_v42  ;;  %v306_v49 = vadd.s32 %v305_v47, %v301_v43  ;;  %v108_v22 = vsel %vm23_vm14, %v107_v15, %v83_v39 }
  0x27   :  { %v110_v27 = vsel %vm22_vm15, 0, %v108_v22  ;;  %v17_v22 = vld [vmem:[%s3060_s1 + $0x8] sm:$0xff] }
  0x28   :  { %v87_v48 = vsub.s32 0, %v85_v46  ;;  %v307_v50 = vadd.s32 536870912, %v306_v49  ;;  %v217_v32 = vadd.s32 3, %v110_v27  ;;  %v114_v34 = vand.u32 3, %v110_v27 }
  0x2a   :  { %v1334_v44 = vmin.u32 %v87_v48, %v85_v46  ;;  %v308_v52 = vshrl.u32 %v307_v50, 30  ;;  %v218_v1 = vand.u32 3, %v217_v32  ;;  %vm116_vm2 = vcmp.eq.s32.totalorder %v114_v34, 0 }
  0x2b   :  { %vm119_vm3 = vcmp.eq.s32.totalorder %v114_v34, 2  ;;  %vm115_vm6 = vcmp.lt.s32.totalorder %v114_v34, 2  ;;  %v228_v50 = vmul.f32 0.5, %v13_v7 }
  0x2c   :  { %v89_v51 = vclz %v1334_v44  ;;  %v309_v54 = vshll.u32 %v308_v52, 30  ;;  %v332_v19 = vsub.s32 4, %v308_v52  ;;  %vm220_vm4 = vcmp.eq.s32.totalorder %v218_v1, 0 }
  0x2d   :  { %vm223_vm5 = vcmp.eq.s32.totalorder %v218_v1, 2  ;;  %vm219_vm8 = vcmp.lt.s32.totalorder %v218_v1, 2 }
  0x2e   :  { %v1335_v53 = vadd.s32 4294967294, %v89_v51  ;;  %v310_v57 = vsub.s32 %v306_v49, %v309_v54  ;;  %v333_v36 = vsel %vm248_vm0, %v332_v19, %v308_v52  ;;  %v14_v51 = vld [vmem:[%s3059_s0 + $0x18] sm:$0xff] }
  0x2f   :  { %v335_v42 = vsel %vm247_vm1, 0, %v333_v36 }
  0x30   :  { %vm1336_vm12 = vcmp.lt.s32.totalorder %v1335_v53, 0  ;;  %v312_v61 = vsub.s32 0, %v310_v57  ;;  %v442_v49 = vadd.s32 3, %v335_v42  ;;  %v339_v54 = vand.u32 3, %v335_v42 }
  0x31   :  { %v92_v56 = vsel %vm1336_vm12, 0, %v1335_v53 }
  0x32   :  { %v93_v58 = vsub.s32 32, %v92_v56  ;;  %v94_v59 = vshll.u32 %v85_v46, %v92_v56  ;;  %v97_v60 = vsub.s32 4294967266, %v92_v56  ;;  %v1342_v5 = vmin.u32 %v312_v61, %v310_v57  ;;  %v19_v61 = vld [vmem:[%s3060_s1 + $0x18] sm:$0xff] }
  0x33   :  { %vm340_vm10 = vcmp.lt.s32.totalorder %v339_v54, 2  ;;  %vm341_vm11 = vcmp.eq.s32.totalorder %v339_v54, 0  ;;  %vm344_vm12 = vcmp.eq.s32.totalorder %v339_v54, 2 }
  0x34   :  { %v95_v62 = vshrl.u32 %v77_v55, %v93_v58  ;;  %v98_v4 = vadd.s32 127, %v97_v60  ;;  %v314_v9 = vclz %v1342_v5  ;;  %v443_v55 = vand.u32 3, %v442_v49  ;;  %v11_v60 = vld [vmem:[%s3059_s0] sm:$0xff] }
  0x35   :  { %v231_v58 = vmul.f32 0.5, %v14_v51 }
  0x36   :  { %v96_v6 = vor.u32 %v95_v62, %v94_v59  ;;  %v99_v8 = vshll.u32 %v98_v4, 23  ;;  %v1343_v12 = vadd.s32 4294967294, %v314_v9  ;;  %v12_v9 = vld [vmem:[%s3059_s0 + $0x8] sm:$0xff] }
  0x38   :  { %v100_v10 = vor.u32 4788187, %v99_v8  ;;  %v103_v11 = vcvt.s32.f32 %v96_v6  ;;  %vm1344_vm13 = vcmp.lt.s32.totalorder %v1343_v12, 0 }
  0x39   :  { %v317_v16 = vsel %vm1344_vm13, 0, %v1343_v12  ;;  %vm445_vm13 = vcmp.eq.s32.totalorder %v443_v55, 0 }
  0x3a   :  { %v101_v14 = vand.u32 2147483647, %v100_v10  ;;  %v318_v17 = vsub.s32 32, %v317_v16  ;;  %v319_v20 = vshll.u32 %v310_v57, %v317_v16  ;;  %v322_v21 = vsub.s32 4294967266, %v317_v16 }
  0x3c   :  { %v104_v3 = vmul.f32 %v103_v11, %v101_v14  ;;  %v320_v23 = vshrl.u32 %v302_v63, %v318_v17  ;;  %v323_v24 = vadd.s32 127, %v322_v21  ;;  %v456_v14 = vmul.f32 0.5, %v19_v61 }
  0x3e   :  { %v105_v18 = vxor.u32 2147483648, %v104_v3  ;;  %v321_v28 = vor.u32 %v320_v23, %v319_v20  ;;  %v324_v29 = vshll.u32 %v323_v24, 23 }
  0x40   :  { %v106_v25 = vsel %vm23_vm14, %v105_v18, %v104_v3  ;;  %v325_v30 = vor.u32 4788187, %v324_v29  ;;  %v328_v31 = vcvt.s32.f32 %v321_v28  ;;  %vm448_vm14 = vcmp.eq.s32.totalorder %v443_v55, 2  ;;  %v16_v18 = vld [vmem:[%s3060_s1] sm:$0xff] }
  0x41   :  { %v109_v26 = vsel %vm22_vm15, %v1459_v0, %v106_v25  ;;  %v18_v0 = vld [vmem:[%s3060_s1 + $0x10] sm:$0xff]  ;;  %vm444_vm15 = vcmp.lt.s32.totalorder %v443_v55, 2 }
  0x42   :  { %1369 = vcosq.f32 %v109_v26  ;;  %v326_v13 = vand.u32 2147483647, %v325_v30  ;;  %v453_v62 = vmul.f32 0.5, %v18_v0 }
  0x43   :  { %1371 = vsinq.f32 %v109_v26 }
  0x44   :  { %v329_v33 = vmul.f32 %v328_v31, %v326_v13 }
  0x46   :  { %v330_v35 = vxor.u32 2147483648, %v329_v33 }
  0x48   :  { %v331_v37 = vsel %vm248_vm0, %v330_v35, %v329_v33 }
  0x49   :  { %v334_v39 = vsel %vm247_vm1, %v1465_v2, %v331_v37 }
  0x4a   :  { %1373 = vcosq.f32 %v334_v39 }
  0x4b   :  { %1375 = vsinq.f32 %v334_v39 }
  0x4c   :  { %v1370_v38 = vpop.eup %1369 }
  0x4d   :  { %v1372_v40 = vpop.eup %1371  ;;  %v120_v41 = vxor.u32 2147483648, %v1370_v38 }
  0x4e   :  { %v117_v43 = vxor.u32 2147483648, %v1372_v40 }
  0x4f   :  { %v121_v45 = vsel %vm119_vm3, %v120_v41, %v1372_v40  ;;  %v225_v48 = vsel %vm223_vm5, %v120_v41, %v1372_v40  ;;  %vm3064_vm3 = vmmov 1  }
  0x50   :  { %v118_v46 = vsel %vm116_vm2, %v1370_v38, %v117_v43  ;;  %v222_v47 = vsel %vm220_vm4, %v1370_v38, %v117_v43 }
  0x51   :  { %v122_v44 = vsel %vm115_vm6, %v118_v46, %v121_v45  ;;  %v226_v53 = vsel %vm219_vm8, %v222_v47, %v225_v48 }
  0x52   :  { %v123_v52 = vsel %vm113_vm7, nan, %v122_v44  ;;  %v227_v56 = vsel %vm113_vm7, nan, %v226_v53 }
  0x53   :  { %v229_v57 = vmul.f32 %v228_v50, %v123_v52  ;;  %v230_v5 = vmul.f32 %v228_v50, %v227_v56  ;;  %v233_v10 = vmul.f32 %v231_v58, %v227_v56  ;;  %v232_v17 = vmul.f32 %v231_v58, %v123_v52 }
  0x54   :  { %v1374_v59 = vpop.eup %1373 }
  0x55   :  { %v1376_v4 = vpop.eup %1375  ;;  %v345_v8 = vxor.u32 2147483648, %v1374_v59  ;;  %v234_v11 = vadd.f32 %v229_v57, %v11_v60  ;;  %v236_v12 = vsub.f32 %v11_v60, %v229_v57  ;;  %v240_v23 = vadd.f32 %v230_v5, %v12_v9 }
  0x56   :  { %v342_v6 = vxor.u32 2147483648, %v1376_v4  ;;  %v242_v24 = vsub.f32 %v12_v9, %v230_v5 }
  0x57   :  { %v346_v63 = vsel %vm344_vm12, %v345_v8, %v1376_v4  ;;  %v450_v16 = vsel %vm448_vm14, %v345_v8, %v1376_v4  ;;  %v1559_v30 = vsub.f32 %v234_v11, %v233_v10  ;;  %v1561_v31 = vsub.f32 %v236_v12, %v233_v10 }
  0x58   :  { %v343_v15 = vsel %vm341_vm11, %v1374_v59, %v342_v6  ;;  %v447_v3 = vsel %vm445_vm13, %v1374_v59, %v342_v6  ;;  %v1563_v32 = vadd.f32 %v236_v12, %v233_v10  ;;  %v1565_v35 = vadd.f32 %v234_v11, %v233_v10 }
  0x59   :  { %v347_v20 = vsel %vm340_vm10, %v343_v15, %v346_v63  ;;  %v451_v21 = vsel %vm444_vm15, %v447_v3, %v450_v16  ;;  %v1567_v36 = vadd.f32 %v240_v23, %v232_v17  ;;  %v1569_v2 = vadd.f32 %v242_v24, %v232_v17 }
  0x5a   :  { %v348_v25 = vsel %vm338_vm9, nan, %v347_v20  ;;  %v452_v26 = vsel %vm338_vm9, nan, %v451_v21  ;;  %v1571_v37 = vsub.f32 %v242_v24, %v232_v17  ;;  %v1573_v38 = vsub.f32 %v240_v23, %v232_v17 }
  0x5b   :  { %v454_v27 = vmul.f32 %v453_v62, %v348_v25  ;;  %v455_v28 = vmul.f32 %v453_v62, %v452_v26  ;;  %v458_v29 = vmul.f32 %v456_v14, %v452_v26  ;;  %v457_v13 = vmul.f32 %v456_v14, %v348_v25 }
  0x5c   :  { %v1436_v17 = vmov 1e-12  }
  0x5d   :  { %v459_v19 = vadd.f32 %v454_v27, %v16_v18  ;;  %v461_v33 = vsub.f32 %v16_v18, %v454_v27  ;;  %v465_v34 = vadd.f32 %v455_v28, %v17_v22  ;;  %v467_v1 = vsub.f32 %v17_v22, %v455_v28 }
  0x5f   :  { %v1575_v39 = vsub.f32 %v459_v19, %v458_v29  ;;  %v1577_v40 = vsub.f32 %v461_v33, %v458_v29  ;;  %v1579_v41 = vadd.f32 %v459_v19, %v458_v29  ;;  %v1581_v42 = vadd.f32 %v465_v34, %v457_v13 }
  0x60   :  { %v1583_v43 = vadd.f32 %v467_v1, %v457_v13  ;;  %v1585_v7 = vsub.f32 %v465_v34, %v457_v13  ;;  %v1603_v52 = vadd.f32 %v461_v33, %v458_v29  ;;  %v1605_v53 = vsub.f32 %v467_v1, %v457_v13 }
  0x61   :  { %v471_v45 = vsub.f32 %v1577_v40, %v1575_v39  ;;  %v475_v46 = vsub.f32 %v1559_v30, %v1575_v39  ;;  %v480_v47 = vsub.f32 %v1561_v31, %v1575_v39  ;;  %v485_v48 = vsub.f32 %v1563_v32, %v1575_v39 }
  0x62   :  { %v472_v49 = vsub.f32 %v1583_v43, %v1581_v42  ;;  %v473_v44 = vsub.f32 %v1567_v36, %v1581_v42  ;;  %v478_v50 = vsub.f32 %v1569_v2, %v1581_v42  ;;  %v483_v51 = vsub.f32 %v1571_v37, %v1581_v42 }
  0x63   :  { %v488_v54 = vsub.f32 %v1573_v38, %v1581_v42  ;;  %v490_v0 = vsub.f32 %v1565_v35, %v1575_v39  ;;  %v1617_v6 = vsub.f32 %v1579_v41, %v1603_v52  ;;  %v1621_v8 = vsub.f32 %v1585_v7, %v1605_v53 }
  0x64   :  { %v474_v55 = vmul.f32 %v473_v44, %v471_v45  ;;  %v476_v56 = vmul.f32 %v475_v46, %v472_v49  ;;  %v479_v57 = vmul.f32 %v478_v50, %v471_v45  ;;  %v481_v58 = vmul.f32 %v480_v47, %v472_v49 }
  0x65   :  { %v484_v59 = vmul.f32 %v483_v51, %v471_v45  ;;  %v486_v60 = vmul.f32 %v485_v48, %v472_v49  ;;  %v489_v61 = vmul.f32 %v488_v54, %v471_v45  ;;  %v491_v62 = vmul.f32 %v490_v0, %v472_v49 }
  0x66   :  { %v1611_v4 = vsub.f32 %v474_v55, %v476_v56  ;;  %v1613_v5 = vsub.f32 %v479_v57, %v481_v58  ;;  %v1437_v33 = vmov 4.0   ;;  %v519_v48 = vsub.f32 %v1561_v31, %v1559_v30 }
  0x67   :  { %v1623_v9 = vsub.f32 %v484_v59, %v486_v60  ;;  %v1625_v10 = vsub.f32 %v489_v61, %v491_v62  ;;  %v522_v49 = vsub.f32 %v1569_v2, %v1567_v36  ;;  %v505_v50 = vsub.f32 %v1559_v30, %v1565_v35 }
  0x68   :  { %vm493_vm0 = vcmp.ge.f32.partialorder %v1611_v4, 0.0  ;;  %v511_v11 = vsub.f32 %v1611_v4, %v1613_v5  ;;  %vm494_vm1 = vcmp.ge.f32.partialorder %v1613_v5, 0.0  ;;  %v508_v51 = vsub.f32 %v1567_v36, %v1573_v38 }
  0x69   :  { %vm496_vm2 = vcmp.ge.f32.partialorder %v1625_v10, 0.0  ;;  %v497_v12 = vsub.f32 %v1625_v10, %v1611_v4  ;;  %v525_v14 = vsub.f32 %v1613_v5, %v1623_v9  ;;  %vm1639_vm4 = vmxor %vm493_vm0, %vm3064_vm3  ;;  %vm495_vm5 = vcmp.ge.f32.partialorder %v1623_v9, 0.0 }
  0x6a   :  { %v512_v63 = vand.u32 2147483647, %v511_v11  ;;  %vm514_vm6 = vcmp.lt.f32.partialorder %v511_v11, 0.0  ;;  %v539_v3 = vsub.f32 %v1623_v9, %v1625_v10  ;;  %vm553_vm7 = vmxor %vm496_vm2, %vm3064_vm3  ;;  %v533_v55 = vsub.f32 %v1563_v32, %v1561_v31 }
  0x6b   :  { %v498_v16 = vand.u32 2147483647, %v497_v12  ;;  %vm500_vm8 = vcmp.lt.f32.partialorder %v497_v12, 0.0  ;;  %v515_v20 = vsel %vm514_vm6, -1e-12, %v1436_v17  ;;  %vm528_vm9 = vcmp.lt.f32.partialorder %v525_v14, 0.0  ;;  %vm1652_vm10 = vmand %vm553_vm7, %vm493_vm0 }
  0x6c   :  { %v501_v18 = vsel %vm500_vm8, -1e-12, %v1436_v17  ;;  %vm513_vm11 = vcmp.lt.f32.partialorder %v512_v63, 1e-12  ;;  %v526_v22 = vand.u32 2147483647, %v525_v14  ;;  %vm1661_vm12 = vmand %vm1639_vm4, %vm494_vm1  ;;  %v536_v56 = vsub.f32 %v1571_v37, %v1569_v2 }
  0x6d   :  { %vm499_vm13 = vcmp.lt.f32.partialorder %v498_v16, 1e-12  ;;  %v516_v24 = vsel %vm513_vm11, %v515_v20, %v511_v11  ;;  %v529_v25 = vsel %vm528_vm9, -1e-12, %v1436_v17  ;;  %v540_v26 = vand.u32 2147483647, %v539_v3  ;;  %vm563_vm14 = vmxor %vm494_vm1, %vm3064_vm3 }
  0x6e   :  { %v502_v27 = vsel %vm499_vm13, %v501_v18, %v497_v12  ;;  %1377 = vrcp.f32 %v516_v24  ;;  %vm527_vm15 = vcmp.lt.f32.partialorder %v526_v22, 1e-12  ;;  %vm542_vm6 = vcmp.lt.f32.partialorder %v539_v3, 0.0  ;;  %vm1671_vm7 = vmand %vm563_vm14, %vm495_vm5 }
  0x6f   :  { %1379 = vrcp.f32 %v502_v27  ;;  %v530_v29 = vsel %vm527_vm15, %v529_v25, %v525_v14  ;;  %vm541_vm4 = vcmp.lt.f32.partialorder %v540_v26, 1e-12  ;;  %v543_v13 = vsel %vm542_vm6, -1e-12, %v1436_v17  ;;  %vm568_vm8 = vmxor %vm495_vm5, %vm3064_vm3 }
  0x70   :  { %1381 = vrcp.f32 %v530_v29  ;;  %v544_v19 = vsel %vm541_vm4, %v543_v13, %v539_v3  ;;  %v557_v34 = vsel %vm1652_vm10, 0.0, %v1437_v33  ;;  %vm1683_vm9 = vmand %vm568_vm8, %vm496_vm2  ;;  %v547_v57 = vsub.f32 %v1565_v35, %v1563_v32 }
  0x71   :  { %1383 = vrcp.f32 %v544_v19  ;;  %v562_v45 = vsel %vm1661_vm12, 1.0, %v557_v34  ;;  %v550_v60 = vsub.f32 %v1573_v38, %v1571_v37  ;;  %v1715_v61 = vsub.f32 %v1603_v52, %v1577_v40 }
  0x72   :  { %v567_v46 = vsel %vm1671_vm7, 2.0, %v562_v45  ;;  %v1719_v62 = vsub.f32 %v1605_v53, %v1583_v43  ;;  %v1724_v63 = vsub.f32 %v1575_v39, %v1579_v41  ;;  %v1729_v18 = vsub.f32 %v1581_v42, %v1585_v7 }
  0x73   :  { %v1693_v47 = vsel %vm1683_vm9, 3.0, %v567_v46 }
  0x74   :  { %vm573_vm11 = vcmp.lt.f32.partialorder %v1693_v47, 4.0  ;;  %vm592_vm13 = vcmp.gt.f32.partialorder %v1693_v47, 0.0  ;;  %vm593_vm14 = vcmp.eq.f32.partialorder %v1693_v47, 0.0  ;;  %vm598_vm15 = vcmp.gt.f32.partialorder %v1693_v47, 1.0 }
  0x75   :  { %vm599_vm6 = vcmp.eq.f32.partialorder %v1693_v47, 1.0  ;;  %vm604_vm4 = vcmp.gt.f32.partialorder %v1693_v47, 2.0  ;;  %vm611_vm8 = vcmp.eq.f32.partialorder %v1693_v47, 3.0 }
  0x78   :  { %v1378_v44 = vpop.eup %1377 }
  0x79   :  { %v1380_v54 = vpop.eup %1379  ;;  %v518_v0 = vmul.f32 %v1378_v44, %v1611_v4 }
  0x7a   :  { %v1382_v58 = vpop.eup %1381  ;;  %v504_v59 = vmul.f32 %v1380_v54, %v1625_v10 }
  0x7b   :  { %v1384_v11 = vpop.eup %1383  ;;  %v520_v12 = vmul.f32 %v519_v48, %v518_v0  ;;  %v523_v14 = vmul.f32 %v522_v49, %v518_v0  ;;  %v532_v15 = vmul.f32 %v1382_v58, %v1613_v5 }
  0x7c   :  { %v506_v3 = vmul.f32 %v505_v50, %v504_v59  ;;  %v509_v16 = vmul.f32 %v508_v51, %v504_v59  ;;  %v546_v20 = vmul.f32 %v1384_v11, %v1623_v9 }
  0x7d   :  { %v521_v22 = vadd.f32 %v520_v12, %v1559_v30  ;;  %v524_v24 = vadd.f32 %v523_v14, %v1567_v36  ;;  %v534_v25 = vmul.f32 %v533_v55, %v532_v15  ;;  %v537_v26 = vmul.f32 %v536_v56, %v532_v15 }
  0x7e   :  { %v507_v27 = vadd.f32 %v506_v3, %v1565_v35  ;;  %v510_v39 = vadd.f32 %v509_v16, %v1573_v38  ;;  %v548_v29 = vmul.f32 %v547_v57, %v546_v20  ;;  %v551_v13 = vmul.f32 %v550_v60, %v546_v20 }
  0x7f   :  { %v535_v19 = vadd.f32 %v534_v25, %v1561_v31  ;;  %v538_v33 = vadd.f32 %v537_v26, %v1569_v2 }
  0x80   :  { %v549_v42 = vadd.f32 %v548_v29, %v1563_v32  ;;  %v552_v34 = vadd.f32 %v551_v13, %v1571_v37  ;;  %v555_v45 = vsel %vm1652_vm10, %v507_v27, 0.0  ;;  %v556_v46 = vsel %vm1652_vm10, %v510_v39, 0.0 }
  0x81   :  { %v560_v48 = vsel %vm1661_vm12, %v521_v22, %v555_v45  ;;  %v561_v49 = vsel %vm1661_vm12, %v524_v24, %v556_v46  ;;  %vm605_vm10 = vcmp.eq.f32.partialorder %v1693_v47, 2.0  ;;  %vm610_vm12 = vcmp.gt.f32.partialorder %v1693_v47, 3.0 }
  0x82   :  { %v565_v44 = vsel %vm1671_vm7, %v535_v19, %v560_v48  ;;  %v566_v50 = vsel %vm1671_vm7, %v538_v33, %v561_v49 }
  0x83   :  { %v570_v21 = vsel %vm1683_vm9, %v549_v42, %v565_v44  ;;  %v571_v23 = vsel %vm1683_vm9, %v552_v34, %v566_v50 }
  0x84   :  { %v574_v51 = vsel %vm496_vm2, %v507_v27, %v570_v21  ;;  %v575_v28 = vsel %vm496_vm2, %v510_v39, %v571_v23  ;;  %v578_v54 = vsel %vm493_vm0, %v521_v22, %v570_v21  ;;  %v579_v0 = vsel %vm493_vm0, %v524_v24, %v571_v23 }
  0x85   :  { %v576_v1 = vsel %vm493_vm0, %v1559_v30, %v574_v51  ;;  %v577_v55 = vsel %vm493_vm0, %v1567_v36, %v575_v28  ;;  %v580_v56 = vsel %vm494_vm1, %v1561_v31, %v578_v54  ;;  %v581_v57 = vsel %vm494_vm1, %v1569_v2, %v579_v0 }
  0x86   :  { %v582_v58 = vsel %vm494_vm1, %v535_v19, %v570_v21  ;;  %v583_v59 = vsel %vm494_vm1, %v538_v33, %v571_v23  ;;  %v586_v30 = vsel %vm495_vm5, %v549_v42, %v570_v21  ;;  %v587_v36 = vsel %vm495_vm5, %v552_v34, %v571_v23 }
  0x87   :  { %v584_v31 = vsel %vm495_vm5, %v1563_v32, %v582_v58  ;;  %v585_v2 = vsel %vm495_vm5, %v1571_v37, %v583_v59  ;;  %v588_v4 = vsel %vm496_vm2, %v1565_v35, %v586_v30  ;;  %v589_v5 = vsel %vm496_vm2, %v1573_v38, %v587_v36 }
  0x88   :  { %v590_v60 = vsel %vm573_vm11, %v570_v21, %v588_v4  ;;  %v591_v11 = vsel %vm573_vm11, %v571_v23, %v589_v5  ;;  %vm616_vm0 = vcmp.gt.f32.partialorder %v1693_v47, 4.0  ;;  %vm617_vm1 = vcmp.eq.f32.partialorder %v1693_v47, 4.0 }
  0x89   :  { %v594_v32 = vsel %vm593_vm14, %v590_v60, %v588_v4  ;;  %v596_v35 = vsel %vm593_vm14, %v591_v11, %v589_v5  ;;  %v600_v37 = vsel %vm599_vm6, %v590_v60, %v576_v1  ;;  %v602_v38 = vsel %vm599_vm6, %v591_v11, %v577_v55 }
  0x8a   :  { %v1820_v9 = vsel %vm592_vm13, %v576_v1, %v594_v32  ;;  %v1824_v10 = vsel %vm592_vm13, %v577_v55, %v596_v35  ;;  %v1828_v12 = vsel %vm598_vm15, %v580_v56, %v600_v37  ;;  %v1832_v14 = vsel %vm598_vm15, %v581_v57, %v602_v38 }
  0x8b   :  { %v606_v15 = vsel %vm605_vm10, %v590_v60, %v580_v56  ;;  %v608_v3 = vsel %vm605_vm10, %v591_v11, %v581_v57  ;;  %v612_v16 = vsel %vm611_vm8, %v590_v60, %v584_v31  ;;  %v614_v20 = vsel %vm611_vm8, %v591_v11, %v585_v2 }
  0x8c   :  { %v1844_v22 = vsel %vm604_vm4, %v584_v31, %v606_v15  ;;  %v1848_v24 = vsel %vm604_vm4, %v585_v2, %v608_v3  ;;  %v1852_v25 = vsel %vm610_vm12, %v588_v4, %v612_v16  ;;  %v1856_v26 = vsel %vm610_vm12, %v589_v5, %v614_v20 }
  0x8d   :  { %v618_v27 = vsel %vm617_vm1, %v590_v60, %v588_v4  ;;  %v620_v39 = vsel %vm617_vm1, %v591_v11, %v589_v5  ;;  %v624_v29 = vsub.f32 %v1824_v10, %v1583_v43  ;;  %v626_v13 = vsub.f32 %v1820_v9, %v1577_v40 }
  0x8e   :  { %v1868_v19 = vsel %vm616_vm0, %v588_v4, %v618_v27  ;;  %v1872_v33 = vsel %vm616_vm0, %v589_v5, %v620_v39  ;;  %v629_v42 = vsub.f32 %v1832_v14, %v1583_v43  ;;  %v631_v34 = vsub.f32 %v1828_v12, %v1577_v40 }
  0x8f   :  { %v625_v45 = vmul.f32 %v624_v29, %v1715_v61  ;;  %v627_v46 = vmul.f32 %v626_v13, %v1719_v62  ;;  %v634_v48 = vsub.f32 %v1848_v24, %v1583_v43  ;;  %v636_v49 = vsub.f32 %v1844_v22, %v1577_v40 }
  0x90   :  { %v630_v47 = vmul.f32 %v629_v42, %v1715_v61  ;;  %v632_v44 = vmul.f32 %v631_v34, %v1719_v62  ;;  %v639_v50 = vsub.f32 %v1856_v26, %v1583_v43  ;;  %v641_v21 = vsub.f32 %v1852_v25, %v1577_v40 }
  0x91   :  { %v1890_v23 = vsub.f32 %v625_v45, %v627_v46  ;;  %v635_v51 = vmul.f32 %v634_v48, %v1715_v61  ;;  %v637_v28 = vmul.f32 %v636_v49, %v1719_v62  ;;  %v644_v54 = vsub.f32 %v1872_v33, %v1583_v43 }
  0x92   :  { %v1896_v0 = vsub.f32 %v630_v47, %v632_v44  ;;  %v640_v1 = vmul.f32 %v639_v50, %v1715_v61  ;;  %v642_v55 = vmul.f32 %v641_v21, %v1719_v62  ;;  %v646_v56 = vsub.f32 %v1868_v19, %v1577_v40 }
  0x93   :  { %v1902_v57 = vsub.f32 %v635_v51, %v637_v28  ;;  %v645_v58 = vmul.f32 %v644_v54, %v1715_v61  ;;  %vm649_vm2 = vcmp.ge.f32.partialorder %v1890_v23, 0.0  ;;  %v662_v59 = vsub.f32 %v1820_v9, %v1868_v19 }
  0x94   :  { %v1908_v30 = vsub.f32 %v640_v1, %v642_v55  ;;  %v647_v43 = vmul.f32 %v646_v56, %v1719_v62  ;;  %vm650_vm5 = vcmp.ge.f32.partialorder %v1896_v0, 0.0  ;;  %v665_v36 = vsub.f32 %v1824_v10, %v1872_v33  ;;  %vm729_vm7 = vmxor %vm649_vm2, %vm3064_vm3 }
  0x95   :  { %vm3062_vm9 = vcmp.ge.f32.partialorder %v1902_v57, 0.0  ;;  %v668_v40 = vsub.f32 %v1890_v23, %v1896_v0  ;;  %v676_v61 = vsub.f32 %v1828_v12, %v1820_v9  ;;  %v679_v62 = vsub.f32 %v1832_v14, %v1824_v10  ;;  %vm1926_vm11 = vmand %vm729_vm7, %vm650_vm5 }
  0x96   :  { %v1930_v2 = vsub.f32 %v645_v58, %v647_v43  ;;  %vm652_vm13 = vcmp.ge.f32.partialorder %v1908_v30, 0.0  ;;  %v682_v4 = vsub.f32 %v1896_v0, %v1902_v57  ;;  %v690_v5 = vsub.f32 %v1844_v22, %v1828_v12  ;;  %vm734_vm14 = vmxor %vm650_vm5, %vm3064_vm3 }
  0x97   :  { %v669_v60 = vand.u32 2147483647, %v668_v40  ;;  %vm671_vm15 = vcmp.lt.f32.partialorder %v668_v40, 0.0  ;;  %v693_v11 = vsub.f32 %v1848_v24, %v1832_v14  ;;  %v696_v32 = vsub.f32 %v1902_v57, %v1908_v30  ;;  %vm1946_vm6 = vmand %vm734_vm14, %vm3062_vm9 }
  0x98   :  { %vm653_vm4 = vcmp.ge.f32.partialorder %v1930_v2, 0.0  ;;  %v654_v37 = vsub.f32 %v1930_v2, %v1890_v23  ;;  %v672_v38 = vsel %vm671_vm15, -1e-12, %v1436_v17  ;;  %v683_v15 = vand.u32 2147483647, %v682_v4  ;;  %vm1957_vm10 = vmxor %vm3062_vm9, %vm3064_vm3 }
  0x99   :  { %vm670_vm12 = vcmp.lt.f32.partialorder %v669_v60, 1e-12  ;;  %vm685_vm8 = vcmp.lt.f32.partialorder %v682_v4, 0.0  ;;  %v697_v16 = vand.u32 2147483647, %v696_v32  ;;  %vm699_vm0 = vcmp.lt.f32.partialorder %v696_v32, 0.0  ;;  %vm724_vm1 = vmxor %vm653_vm4, %vm3064_vm3 }
  0x9a   :  { %v655_v20 = vand.u32 2147483647, %v654_v37  ;;  %vm657_vm7 = vcmp.lt.f32.partialorder %v654_v37, 0.0  ;;  %v673_v27 = vsel %vm670_vm12, %v672_v38, %v668_v40  ;;  %vm684_vm14 = vcmp.lt.f32.partialorder %v683_v15, 1e-12  ;;  %vm1966_vm15 = vmand %vm724_vm1, %vm649_vm2 }
  0x9b   :  { %v658_v29 = vsel %vm657_vm7, -1e-12, %v1436_v17  ;;  %1385 = vrcp.f32 %v673_v27  ;;  %v686_v13 = vsel %vm685_vm8, -1e-12, %v1436_v17  ;;  %vm1972_vm9 = vcmp.lt.f32.partialorder %v697_v16, 1e-12  ;;  %vm1980_vm12 = vmand %vm1957_vm10, %vm652_vm13 }
  0x9c   :  { %vm656_vm1 = vcmp.lt.f32.partialorder %v655_v20, 1e-12  ;;  %v687_v45 = vsel %vm684_vm14, %v686_v13, %v682_v4  ;;  %v700_v46 = vsel %vm699_vm0, -1e-12, %v1436_v17  ;;  %v704_v48 = vsub.f32 %v1852_v25, %v1844_v22  ;;  %vm744_vm8 = vmxor %vm652_vm13, %vm3064_vm3 }
  0x9d   :  { %v659_v49 = vsel %vm656_vm1, %v658_v29, %v654_v37  ;;  %1387 = vrcp.f32 %v687_v45  ;;  %v701_v47 = vsel %vm1972_vm9, %v700_v46, %v696_v32  ;;  %v707_v44 = vsub.f32 %v1856_v26, %v1848_v24  ;;  %vm1996_vm10 = vmand %vm744_vm8, %vm653_vm4 }
  0x9e   :  { %1389 = vrcp.f32 %v659_v49  ;;  %v710_v21 = vsub.f32 %v1908_v30, %v1930_v2  ;;  %v718_v51 = vsub.f32 %v1868_v19, %v1852_v25  ;;  %v721_v28 = vsub.f32 %v1872_v33, %v1856_v26 }
  0x9f   :  { %1391 = vrcp.f32 %v701_v47  ;;  %v1438_v54 = vmov 5.0   ;;  %vm3095_vm8 = vcmp.ge.f32.partialorder %v1902_v57, 0.0 }
  0xa0   :  { %v728_v1 = vsel %vm1966_vm15, 0.0, %v1438_v54  ;;  %v711_v55 = vand.u32 2147483647, %v710_v21  ;;  %vm713_vm9 = vcmp.lt.f32.partialorder %v710_v21, 0.0 }
  0xa1   :  { %v733_v56 = vsel %vm1926_vm11, 1.0, %v728_v1  ;;  %v714_v58 = vsel %vm713_vm9, -1e-12, %v1436_v17 }
  0xa2   :  { %v738_v43 = vsel %vm1946_vm6, 2.0, %v733_v56  ;;  %vm712_vm0 = vcmp.lt.f32.partialorder %v711_v55, 1e-12 }
  0xa3   :  { %v743_v40 = vsel %vm1980_vm12, 3.0, %v738_v43  ;;  %v715_v4 = vsel %vm712_vm0, %v714_v58, %v710_v21 }
  0xa4   :  { %v2017_v60 = vsel %vm1996_vm10, 4.0, %v743_v40  ;;  %1393 = vrcp.f32 %v715_v4 }
  0xa5   :  { %v1386_v32 = vpop.eup %1385  ;;  %vm749_vm7 = vcmp.lt.f32.partialorder %v2017_v60, 5.0  ;;  %vm773_vm14 = vcmp.eq.f32.partialorder %v2017_v60, 0.0  ;;  %vm784_vm1 = vcmp.gt.f32.partialorder %v2017_v60, 2.0  ;;  %vm791_vm0 = vcmp.eq.f32.partialorder %v2017_v60, 3.0 }
  0xa6   :  { %v675_v37 = vmul.f32 %v1386_v32, %v1890_v23 }
  0xa7   :  { %v1388_v38 = vpop.eup %1387 }
  0xa8   :  { %v1390_v15 = vpop.eup %1389  ;;  %v677_v3 = vmul.f32 %v676_v61, %v675_v37  ;;  %v680_v16 = vmul.f32 %v679_v62, %v675_v37  ;;  %v689_v20 = vmul.f32 %v1388_v38, %v1896_v0 }
  0xa9   :  { %v1392_v27 = vpop.eup %1391  ;;  %v661_v29 = vmul.f32 %v1390_v15, %v1930_v2 }
  0xaa   :  { %v678_v13 = vadd.f32 %v677_v3, %v1820_v9  ;;  %v681_v42 = vadd.f32 %v680_v16, %v1824_v10  ;;  %v691_v45 = vmul.f32 %v690_v5, %v689_v20  ;;  %v694_v46 = vmul.f32 %v693_v11, %v689_v20 }
  0xab   :  { %v663_v61 = vmul.f32 %v662_v59, %v661_v29  ;;  %v666_v62 = vmul.f32 %v665_v36, %v661_v29  ;;  %v703_v49 = vmul.f32 %v1392_v27, %v1902_v57 }
  0xac   :  { %v692_v47 = vadd.f32 %v691_v45, %v1828_v12  ;;  %v695_v21 = vadd.f32 %v694_v46, %v1832_v14 }
  0xad   :  { %v664_v54 = vadd.f32 %v663_v61, %v1868_v19  ;;  %v667_v1 = vadd.f32 %v666_v62, %v1872_v33  ;;  %v705_v5 = vmul.f32 %v704_v48, %v703_v49  ;;  %v708_v11 = vmul.f32 %v707_v44, %v703_v49 }
  0xae   :  { %v1394_v55 = vpop.eup %1393 }
  0xaf   :  { %v706_v56 = vadd.f32 %v705_v5, %v1844_v22  ;;  %v709_v59 = vadd.f32 %v708_v11, %v1848_v24  ;;  %v717_v58 = vmul.f32 %v1394_v55, %v1908_v30  ;;  %v726_v36 = vsel %vm1966_vm15, %v664_v54, 0.0 }
  0xb0   :  { %v727_v43 = vsel %vm1966_vm15, %v667_v1, 0.0  ;;  %v731_v40 = vsel %vm1926_vm11, %v678_v13, %v726_v36  ;;  %vm778_vm15 = vcmp.gt.f32.partialorder %v2017_v60, 1.0 }
  0xb1   :  { %v719_v4 = vmul.f32 %v718_v51, %v717_v58  ;;  %v722_v32 = vmul.f32 %v721_v28, %v717_v58  ;;  %v732_v48 = vsel %vm1926_vm11, %v681_v42, %v727_v43  ;;  %v736_v44 = vsel %vm1946_vm6, %v692_v47, %v731_v40 }
  0xb2   :  { %v737_v37 = vsel %vm1946_vm6, %v695_v21, %v732_v48  ;;  %v741_v38 = vsel %vm1980_vm12, %v706_v56, %v736_v44  ;;  %vm772_vm11 = vcmp.gt.f32.partialorder %v2017_v60, 0.0  ;;  %vm779_vm6 = vcmp.eq.f32.partialorder %v2017_v60, 1.0 }
  0xb3   :  { %v720_v39 = vadd.f32 %v719_v4, %v1852_v25  ;;  %v723_v15 = vadd.f32 %v722_v32, %v1856_v26  ;;  %v742_v51 = vsel %vm1980_vm12, %v709_v59, %v737_v37  ;;  %vm785_vm12 = vcmp.eq.f32.partialorder %v2017_v60, 2.0 }
  0xb5   :  { %v746_v31 = vsel %vm1996_vm10, %v720_v39, %v741_v38  ;;  %v747_v35 = vsel %vm1996_vm10, %v723_v15, %v742_v51  ;;  %vm3096_vm10 = vmmov %vm3095_vm8 }
  0xb6   :  { %v750_v34 = vsel %vm653_vm4, %v664_v54, %v746_v31  ;;  %v751_v28 = vsel %vm653_vm4, %v667_v1, %v747_v35  ;;  %v754_v3 = vsel %vm649_vm2, %v678_v13, %v746_v31  ;;  %v755_v16 = vsel %vm649_vm2, %v681_v42, %v747_v35 }
  0xb7   :  { %v752_v50 = vsel %vm649_vm2, %v1820_v9, %v750_v34  ;;  %v753_v20 = vsel %vm649_vm2, %v1824_v10, %v751_v28  ;;  %v756_v27 = vsel %vm650_vm5, %v1828_v12, %v754_v3  ;;  %v757_v29 = vsel %vm650_vm5, %v1832_v14, %v755_v16  ;;  %vm3097_vm2 = vmmov %vm3095_vm8 }
  0xb8   :  { %v758_v13 = vsel %vm650_vm5, %v692_v47, %v746_v31  ;;  %v759_v42 = vsel %vm650_vm5, %v695_v21, %v747_v35  ;;  %v762_v9 = vsel %vm3095_vm8, %v706_v56, %v746_v31  ;;  %v763_v10 = vsel %vm3096_vm10, %v709_v59, %v747_v35  ;;  %vm3098_vm9 = vmmov %vm3097_vm2 }
  0xb9   :  { %v760_v12 = vsel %vm3097_vm2, %v1844_v22, %v758_v13  ;;  %v761_v14 = vsel %vm3098_vm9, %v1848_v24, %v759_v42  ;;  %v764_v23 = vsel %vm652_vm13, %v1852_v25, %v762_v9  ;;  %v765_v0 = vsel %vm652_vm13, %v1856_v26, %v763_v10 }
  0xba   :  { %v766_v45 = vsel %vm652_vm13, %v720_v39, %v746_v31  ;;  %v767_v46 = vsel %vm652_vm13, %v723_v15, %v747_v35  ;;  %vm790_vm5 = vcmp.gt.f32.partialorder %v2017_v60, 3.0  ;;  %vm796_vm8 = vcmp.gt.f32.partialorder %v2017_v60, 4.0 }
  0xbb   :  { %v768_v22 = vsel %vm653_vm4, %v1868_v19, %v766_v45  ;;  %v769_v24 = vsel %vm653_vm4, %v1872_v33, %v767_v46  ;;  %vm797_vm10 = vcmp.eq.f32.partialorder %v2017_v60, 4.0  ;;  %vm802_vm13 = vcmp.gt.f32.partialorder %v2017_v60, 5.0 }
  0xbc   :  { %v770_v25 = vsel %vm749_vm7, %v746_v31, %v768_v22  ;;  %v771_v26 = vsel %vm749_vm7, %v747_v35, %v769_v24  ;;  %vm803_vm2 = vcmp.eq.f32.partialorder %v2017_v60, 5.0 }
  0xbd   :  { %v774_v19 = vsel %vm773_vm14, %v770_v25, %v768_v22  ;;  %v776_v33 = vsel %vm773_vm14, %v771_v26, %v769_v24  ;;  %v780_v57 = vsel %vm779_vm6, %v770_v25, %v752_v50  ;;  %v782_v30 = vsel %vm779_vm6, %v771_v26, %v753_v20 }
  0xbe   :  { %v2146_v2 = vsel %vm772_vm11, %v752_v50, %v774_v19  ;;  %v2150_v61 = vsel %vm772_vm11, %v753_v20, %v776_v33  ;;  %v2154_v62 = vsel %vm778_vm15, %v756_v27, %v780_v57  ;;  %v2158_v49 = vsel %vm778_vm15, %v757_v29, %v782_v30 }
  0xbf   :  { %v786_v47 = vsel %vm785_vm12, %v770_v25, %v756_v27  ;;  %v788_v21 = vsel %vm785_vm12, %v771_v26, %v757_v29  ;;  %v792_v54 = vsel %vm791_vm0, %v770_v25, %v760_v12  ;;  %v794_v1 = vsel %vm791_vm0, %v771_v26, %v761_v14 }
  0xc0   :  { %v2170_v5 = vsel %vm784_vm1, %v760_v12, %v786_v47  ;;  %v2174_v11 = vsel %vm784_vm1, %v761_v14, %v788_v21  ;;  %v2178_v55 = vsel %vm790_vm5, %v764_v23, %v792_v54  ;;  %v2182_v56 = vsel %vm790_vm5, %v765_v0, %v794_v1 }
  0xc1   :  { %v798_v59 = vsel %vm797_vm10, %v770_v25, %v764_v23  ;;  %v800_v58 = vsel %vm797_vm10, %v771_v26, %v765_v0  ;;  %v804_v36 = vsel %vm803_vm2, %v770_v25, %v768_v22  ;;  %v806_v43 = vsel %vm803_vm2, %v771_v26, %v769_v24 }
  0xc2   :  { %v2194_v40 = vsel %vm796_vm8, %v768_v22, %v798_v59  ;;  %v2198_v4 = vsel %vm796_vm8, %v769_v24, %v800_v58  ;;  %v2202_v32 = vsel %vm802_vm13, %v768_v22, %v804_v36  ;;  %v2206_v48 = vsel %vm802_vm13, %v769_v24, %v806_v43 }
  0xc3   :  { %v810_v44 = vsub.f32 %v2150_v61, %v1605_v53  ;;  %v812_v37 = vsub.f32 %v2146_v2, %v1603_v52  ;;  %v815_v38 = vsub.f32 %v2158_v49, %v1605_v53  ;;  %v817_v39 = vsub.f32 %v2154_v62, %v1603_v52 }
  0xc4   :  { %v820_v15 = vsub.f32 %v2174_v11, %v1605_v53  ;;  %v822_v60 = vsub.f32 %v2170_v5, %v1603_v52  ;;  %v825_v51 = vsub.f32 %v2182_v56, %v1605_v53  ;;  %v827_v31 = vsub.f32 %v2178_v55, %v1603_v52 }
  0xc5   :  { %v811_v35 = vmul.f32 %v810_v44, %v1617_v6  ;;  %v813_v34 = vmul.f32 %v812_v37, %v1621_v8  ;;  %v816_v28 = vmul.f32 %v815_v38, %v1617_v6  ;;  %v818_v3 = vmul.f32 %v817_v39, %v1621_v8 }
  0xc6   :  { %v821_v16 = vmul.f32 %v820_v15, %v1617_v6  ;;  %v823_v50 = vmul.f32 %v822_v60, %v1621_v8  ;;  %v826_v20 = vmul.f32 %v825_v51, %v1617_v6  ;;  %v828_v27 = vmul.f32 %v827_v31, %v1621_v8 }
  0xc7   :  { %v2232_v29 = vsub.f32 %v811_v35, %v813_v34  ;;  %v2234_v13 = vsub.f32 %v816_v28, %v818_v3  ;;  %v830_v42 = vsub.f32 %v2198_v4, %v1605_v53  ;;  %v832_v9 = vsub.f32 %v2194_v40, %v1603_v52 }
  0xc8   :  { %v2240_v10 = vsub.f32 %v821_v16, %v823_v50  ;;  %v2242_v12 = vsub.f32 %v826_v20, %v828_v27  ;;  %v835_v14 = vsub.f32 %v2206_v48, %v1605_v53  ;;  %v837_v23 = vsub.f32 %v2202_v32, %v1603_v52 }
  0xc9   :  { %v831_v0 = vmul.f32 %v830_v42, %v1617_v6  ;;  %v833_v45 = vmul.f32 %v832_v9, %v1621_v8  ;;  %vm840_vm4 = vcmp.ge.f32.partialorder %v2232_v29, 0.0  ;;  %vm841_vm7 = vcmp.ge.f32.partialorder %v2234_v13, 0.0 }
  0xca   :  { %v836_v46 = vmul.f32 %v835_v14, %v1617_v6  ;;  %v838_v22 = vmul.f32 %v837_v23, %v1621_v8  ;;  %vm3063_vm11 = vcmp.ge.f32.partialorder %v2240_v10, 0.0  ;;  %vm843_vm14 = vcmp.ge.f32.partialorder %v2242_v12, 0.0  ;;  %vm935_vm15 = vmxor %vm840_vm4, %vm3064_vm3 }
  0xcb   :  { %v2259_v52 = vsub.f32 %v831_v0, %v833_v45  ;;  %v854_v53 = vsub.f32 %v2146_v2, %v2202_v32  ;;  %v857_v24 = vsub.f32 %v2150_v61, %v2206_v48  ;;  %v860_v6 = vsub.f32 %v2232_v29, %v2234_v13  ;;  %vm2269_vm6 = vmand %vm935_vm15, %vm841_vm7 }
  0xcc   :  { %v2273_v25 = vsub.f32 %v836_v46, %v838_v22  ;;  %v868_v26 = vsub.f32 %v2154_v62, %v2146_v2  ;;  %v871_v19 = vsub.f32 %v2158_v49, %v2150_v61  ;;  %v874_v33 = vsub.f32 %v2234_v13, %v2240_v10  ;;  %vm940_vm1 = vmxor %vm841_vm7, %vm3064_vm3 }
  0xcd   :  { %vm844_vm12 = vcmp.ge.f32.partialorder %v2259_v52, 0.0  ;;  %v861_v57 = vand.u32 2147483647, %v860_v6  ;;  %vm863_vm9 = vcmp.lt.f32.partialorder %v860_v6, 0.0  ;;  %v882_v30 = vsub.f32 %v2170_v5, %v2154_v62  ;;  %vm2289_vm5 = vmand %vm940_vm1, %vm3063_vm11 }
  0xce   :  { %vm845_vm0 = vcmp.ge.f32.partialorder %v2273_v25, 0.0  ;;  %v846_v21 = vsub.f32 %v2273_v25, %v2232_v29  ;;  %v864_v54 = vsel %vm863_vm9, -1e-12, %v1436_v17  ;;  %v875_v1 = vand.u32 2147483647, %v874_v33  ;;  %vm2300_vm8 = vmxor %vm3063_vm11, %vm3064_vm3 }
  0xcf   :  { %vm862_vm10 = vcmp.lt.f32.partialorder %v861_v57, 1e-12  ;;  %vm877_vm13 = vcmp.lt.f32.partialorder %v874_v33, 0.0  ;;  %v885_v58 = vsub.f32 %v2174_v11, %v2158_v49  ;;  %v888_v36 = vsub.f32 %v2240_v10, %v2242_v12  ;;  %vm930_vm2 = vmxor %vm845_vm0, %vm3064_vm3 }
  0xd0   :  { %v847_v43 = vand.u32 2147483647, %v846_v21  ;;  %vm849_vm15 = vcmp.lt.f32.partialorder %v846_v21, 0.0  ;;  %v865_v44 = vsel %vm862_vm10, %v864_v54, %v860_v6  ;;  %vm876_vm1 = vcmp.lt.f32.partialorder %v875_v1, 1e-12  ;;  %vm2313_vm9 = vmand %vm930_vm2, %vm840_vm4 }
  0xd1   :  { %v850_v38 = vsel %vm849_vm15, -1e-12, %v1436_v17  ;;  %1395 = vrcp.f32 %v865_v44  ;;  %v878_v39 = vsel %vm877_vm13, -1e-12, %v1436_v17  ;;  %v889_v15 = vand.u32 2147483647, %v888_v36  ;;  %vm2323_vm11 = vmand %vm2300_vm8, %vm843_vm14 }
  0xd2   :  { %vm848_vm10 = vcmp.lt.f32.partialorder %v847_v43, 1e-12  ;;  %v879_v51 = vsel %vm876_vm1, %v878_v39, %v874_v33  ;;  %vm891_vm2 = vcmp.lt.f32.partialorder %v888_v36, 0.0  ;;  %v896_v31 = vsub.f32 %v2178_v55, %v2170_v5  ;;  %vm950_vm15 = vmxor %vm843_vm14, %vm3064_vm3 }
  0xd3   :  { %v851_v35 = vsel %vm848_vm10, %v850_v38, %v846_v21  ;;  %1397 = vrcp.f32 %v879_v51  ;;  %vm890_vm13 = vcmp.lt.f32.partialorder %v889_v15, 1e-12  ;;  %v892_v34 = vsel %vm891_vm2, -1e-12, %v1436_v17  ;;  %vm2335_vm8 = vmand %vm950_vm15, %vm844_vm12 }
  0xd4   :  { %1399 = vrcp.f32 %v851_v35  ;;  %v893_v3 = vsel %vm890_vm13, %v892_v34, %v888_v36  ;;  %v899_v16 = vsub.f32 %v2182_v56, %v2174_v11  ;;  %v902_v50 = vsub.f32 %v2242_v12, %v2259_v52  ;;  %vm955_vm1 = vmxor %vm844_vm12, %vm3064_vm3 }
  0xd5   :  { %1401 = vrcp.f32 %v893_v3  ;;  %v910_v20 = vsub.f32 %v2194_v40, %v2178_v55  ;;  %v913_v27 = vsub.f32 %v2198_v4, %v2182_v56  ;;  %v916_v42 = vsub.f32 %v2259_v52, %v2273_v25  ;;  %vm2354_vm10 = vmand %vm955_vm1, %vm845_vm0 }
  0xd6   :  { %v903_v14 = vand.u32 2147483647, %v902_v50  ;;  %vm905_vm2 = vcmp.lt.f32.partialorder %v902_v50, 0.0  ;;  %v924_v23 = vsub.f32 %v2202_v32, %v2194_v40  ;;  %v927_v0 = vsub.f32 %v2206_v48, %v2198_v4 }
  0xd7   :  { %v906_v45 = vsel %vm905_vm2, -1e-12, %v1436_v17  ;;  %v917_v46 = vand.u32 2147483647, %v916_v42  ;;  %vm919_vm15 = vcmp.lt.f32.partialorder %v916_v42, 0.0  ;;  %v1439_v22 = vmov 6.0  }
  0xd8   :  { %v934_v6 = vsel %vm2313_vm9, 0.0, %v1439_v22  ;;  %vm904_vm13 = vcmp.lt.f32.partialorder %v903_v14, 1e-12  ;;  %v920_v33 = vsel %vm919_vm15, -1e-12, %v1436_v17 }
  0xd9   :  { %v939_v57 = vsel %vm2269_vm6, 1.0, %v934_v6  ;;  %v907_v21 = vsel %vm904_vm13, %v906_v45, %v902_v50  ;;  %vm918_vm1 = vcmp.lt.f32.partialorder %v917_v46, 1e-12 }
  0xda   :  { %v944_v54 = vsel %vm2289_vm5, 2.0, %v939_v57  ;;  %1403 = vrcp.f32 %v907_v21  ;;  %v921_v1 = vsel %vm918_vm1, %v920_v33, %v916_v42 }
  0xdb   :  { %v949_v59 = vsel %vm2323_vm11, 3.0, %v944_v54  ;;  %v1396_v36 = vpop.eup %1395  ;;  %1405 = vrcp.f32 %v921_v1 }
  0xdc   :  { %v954_v43 = vsel %vm2335_vm8, 4.0, %v949_v59  ;;  %v867_v44 = vmul.f32 %v1396_v36, %v2232_v29 }
  0xdd   :  { %v2377_v38 = vsel %vm2354_vm10, 5.0, %v954_v43  ;;  %v1398_v39 = vpop.eup %1397 }
  0xde   :  { %v1400_v15 = vpop.eup %1399  ;;  %v869_v51 = vmul.f32 %v868_v26, %v867_v44  ;;  %v872_v35 = vmul.f32 %v871_v19, %v867_v44  ;;  %v881_v34 = vmul.f32 %v1398_v39, %v2234_v13  ;;  %vm993_vm2 = vcmp.gt.f32.partialorder %v2377_v38, 1.0 }
  0xdf   :  { %v1402_v3 = vpop.eup %1401  ;;  %v853_v50 = vmul.f32 %v1400_v15, %v2273_v25  ;;  %vm1000_vm15 = vcmp.eq.f32.partialorder %v2377_v38, 2.0  ;;  %vm1006_vm3 = vcmp.eq.f32.partialorder %v2377_v38, 3.0 }
  0xe0   :  { %v870_v42 = vadd.f32 %v869_v51, %v2146_v2  ;;  %v873_v14 = vadd.f32 %v872_v35, %v2150_v61  ;;  %v883_v45 = vmul.f32 %v882_v30, %v881_v34  ;;  %v886_v26 = vmul.f32 %v885_v58, %v881_v34 }
  0xe1   :  { %v855_v19 = vmul.f32 %v854_v53, %v853_v50  ;;  %v858_v46 = vmul.f32 %v857_v24, %v853_v50  ;;  %v895_v22 = vmul.f32 %v1402_v3, %v2240_v10 }
  0xe2   :  { %v884_v6 = vadd.f32 %v883_v45, %v2154_v62  ;;  %v887_v33 = vadd.f32 %v886_v26, %v2158_v49 }
  0xe3   :  { %v856_v30 = vadd.f32 %v855_v19, %v2202_v32  ;;  %v859_v57 = vadd.f32 %v858_v46, %v2206_v48  ;;  %v897_v21 = vmul.f32 %v896_v31, %v895_v22  ;;  %v900_v58 = vmul.f32 %v899_v16, %v895_v22 }
  0xe4   :  { %v1404_v54 = vpop.eup %1403 }
  0xe5   :  { %v1406_v1 = vpop.eup %1405  ;;  %v898_v53 = vadd.f32 %v897_v21, %v2170_v5  ;;  %v901_v59 = vadd.f32 %v900_v58, %v2174_v11  ;;  %v909_v24 = vmul.f32 %v1404_v54, %v2242_v12  ;;  %v932_v36 = vsel %vm2313_vm9, %v856_v30, 0.0 }
  0xe6   :  { %v923_v43 = vmul.f32 %v1406_v1, %v2259_v52  ;;  %v933_v44 = vsel %vm2313_vm9, %v859_v57, 0.0  ;;  %v937_v31 = vsel %vm2269_vm6, %v870_v42, %v932_v36  ;;  %vm987_vm9 = vcmp.gt.f32.partialorder %v2377_v38, 0.0 }
  0xe7   :  { %v911_v16 = vmul.f32 %v910_v20, %v909_v24  ;;  %v914_v39 = vmul.f32 %v913_v27, %v909_v24  ;;  %v938_v15 = vsel %vm2269_vm6, %v873_v14, %v933_v44  ;;  %v942_v51 = vsel %vm2289_vm5, %v884_v6, %v937_v31 }
  0xe8   :  { %v925_v35 = vmul.f32 %v924_v23, %v923_v43  ;;  %v928_v34 = vmul.f32 %v927_v0, %v923_v43  ;;  %v943_v3 = vsel %vm2289_vm5, %v887_v33, %v938_v15  ;;  %v947_v37 = vsel %vm2323_vm11, %v898_v53, %v942_v51 }
  0xe9   :  { %v912_v50 = vadd.f32 %v911_v16, %v2178_v55  ;;  %v915_v45 = vadd.f32 %v914_v39, %v2182_v56  ;;  %v948_v20 = vsel %vm2323_vm11, %v901_v59, %v943_v3  ;;  %vm960_vm6 = vcmp.lt.f32.partialorder %v2377_v38, 6.0 }
  0xea   :  { %v926_v8 = vadd.f32 %v925_v35, %v2194_v40  ;;  %v929_v27 = vadd.f32 %v928_v34, %v2198_v4  ;;  %vm988_vm5 = vcmp.eq.f32.partialorder %v2377_v38, 0.0  ;;  %vm994_vm11 = vcmp.eq.f32.partialorder %v2377_v38, 1.0 }
  0xeb   :  { %v952_v47 = vsel %vm2335_vm8, %v912_v50, %v947_v37  ;;  %v953_v23 = vsel %vm2335_vm8, %v915_v45, %v948_v20 }
  0xec   :  { %v957_v60 = vsel %vm2354_vm10, %v926_v8, %v952_v47  ;;  %v958_v0 = vsel %vm2354_vm10, %v929_v27, %v953_v23  ;;  %vm1017_vm10 = vcmp.gt.f32.partialorder %v2377_v38, 5.0 }
  0xed   :  { %v961_v28 = vsel %vm845_vm0, %v856_v30, %v957_v60  ;;  %v962_v26 = vsel %vm845_vm0, %v859_v57, %v958_v0  ;;  %v965_v19 = vsel %vm840_vm4, %v870_v42, %v957_v60  ;;  %v966_v46 = vsel %vm840_vm4, %v873_v14, %v958_v0 }
  0xee   :  { %v963_v9 = vsel %vm840_vm4, %v2146_v2, %v961_v28  ;;  %v964_v22 = vsel %vm840_vm4, %v2150_v61, %v962_v26  ;;  %v967_v30 = vsel %vm841_vm7, %v2154_v62, %v965_v19  ;;  %v968_v42 = vsel %vm841_vm7, %v2158_v49, %v966_v46 }
  0xef   :  { %v969_v14 = vsel %vm841_vm7, %v884_v6, %v957_v60  ;;  %v970_v2 = vsel %vm841_vm7, %v887_v33, %v958_v0  ;;  %vm3113_vm4 = vcmp.ge.f32.partialorder %v2240_v10, 0.0  ;;  %v977_v33 = vsel %vm843_vm14, %v912_v50, %v957_v60 }
  0xf0   :  { %v973_v61 = vsel %vm3113_vm4, %v898_v53, %v957_v60  ;;  %vm3114_vm1 = vmmov %vm3113_vm4  ;;  %v978_v57 = vsel %vm843_vm14, %v915_v45, %v958_v0  ;;  %vm1023_vm7 = vcmp.gt.f32.partialorder %v2377_v38, 6.0  ;;  %vm3127_vm4 = vmmov 1  }
  0xf1   :  { %v974_v62 = vsel %vm3114_vm1, %v901_v59, %v958_v0  ;;  %vm3115_vm13 = vmmov %vm3114_vm1  ;;  %v975_v6 = vsel %vm843_vm14, %v2178_v55, %v973_v61  ;;  %v979_v55 = vsel %vm844_vm12, %v2194_v40, %v977_v33 }
  0xf2   :  { %v971_v49 = vsel %vm3115_vm13, %v2170_v5, %v969_v14  ;;  %vm3116_vm8 = vmmov %vm3114_vm1  ;;  %v976_v13 = vsel %vm843_vm14, %v2182_v56, %v974_v62  ;;  %v981_v5 = vsel %vm844_vm12, %v926_v8, %v957_v60  ;;  %v980_v56 = vsel %vm844_vm12, %v2198_v4, %v978_v57 }
  0xf3   :  { %v972_v29 = vsel %vm3116_vm8, %v2174_v11, %v970_v2  ;;  %v982_v11 = vsel %vm844_vm12, %v929_v27, %v958_v0  ;;  %v983_v10 = vsel %vm845_vm0, %v2202_v32, %v981_v5  ;;  %vm1024_vm14 = vcmp.eq.f32.partialorder %v2377_v38, 6.0 }
  0xf4   :  { %v984_v12 = vsel %vm845_vm0, %v2206_v48, %v982_v11  ;;  %v985_v21 = vsel %vm960_vm6, %v957_v60, %v983_v10  ;;  %vm3117_vm12 = vcmp.gt.f32.partialorder %v2377_v38, 2.0 }
  0xf5   :  { %v986_v58 = vsel %vm960_vm6, %v958_v0, %v984_v12  ;;  %v989_v40 = vsel %vm988_vm5, %v985_v21, %v983_v10  ;;  %v995_v32 = vsel %vm994_vm11, %v985_v21, %v963_v9  ;;  %v1001_v53 = vsel %vm1000_vm15, %v985_v21, %v967_v30  ;;  %vm3118_vm0 = vmmov %vm3117_vm12 }
  0xf6   :  { %v991_v4 = vsel %vm988_vm5, %v986_v58, %v984_v12  ;;  %v997_v48 = vsel %vm994_vm11, %v986_v58, %v964_v22  ;;  %v2527_v52 = vsel %vm987_vm9, %v963_v9, %v989_v40  ;;  %v2535_v54 = vsel %vm993_vm2, %v967_v30, %v995_v32 }
  0xf7   :  { %v2531_v25 = vsel %vm987_vm9, %v964_v22, %v991_v4  ;;  %v2539_v1 = vsel %vm993_vm2, %v968_v42, %v997_v48  ;;  %v1003_v59 = vsel %vm1000_vm15, %v986_v58, %v968_v42  ;;  %v1007_v24 = vsel %vm1006_vm3, %v985_v21, %v971_v49 }
  0xf8   :  { %v1009_v36 = vsel %vm1006_vm3, %v986_v58, %v972_v29  ;;  %v2551_v43 = vsel %vm3117_vm12, %v971_v49, %v1001_v53  ;;  %v2555_v44 = vsel %vm3118_vm0, %v972_v29, %v1003_v59  ;;  %vm3119_vm6 = vcmp.gt.f32.partialorder %v2377_v38, 3.0 }
  0xf9   :  { %v2559_v31 = vsel %vm3119_vm6, %v975_v6, %v1007_v24  ;;  %vm3120_vm9 = vmmov %vm3119_vm6  ;;  %vm3121_vm5 = vcmp.eq.f32.partialorder %v2377_v38, 4.0  ;;  %vm3123_vm2 = vcmp.eq.f32.partialorder %v2377_v38, 5.0  ;;  %vm3125_vm15 = vcmp.gt.f32.partialorder %v2377_v38, 4.0 }
  0xfa   :  { %v2563_v16 = vsel %vm3120_vm9, %v976_v13, %v1009_v36  ;;  %v1013_v39 = vsel %vm3121_vm5, %v985_v21, %v975_v6  ;;  %vm3122_vm3 = vmmov %vm3121_vm5  ;;  %v1019_v51 = vsel %vm3123_vm2, %v985_v21, %v979_v55  ;;  %v1025_v45 = vsel %vm1024_vm14, %v985_v21, %v983_v10 }
  0xfb   :  { %v1015_v15 = vsel %vm3122_vm3, %v986_v58, %v976_v13  ;;  %vm3124_vm11 = vmmov %vm3123_vm2  ;;  %v2575_v34 = vsel %vm3125_vm15, %v979_v55, %v1013_v39  ;;  %v2583_v37 = vsel %vm1017_vm10, %v983_v10, %v1019_v51  ;;  %v1027_v20 = vsel %vm1024_vm14, %v986_v58, %v984_v12 }
  0xfc   :  { %v1021_v35 = vsel %vm3124_vm11, %v986_v58, %v980_v56  ;;  %vm3126_vm13 = vmmov %vm3125_vm15  ;;  %v1031_v8 = vsub.f32 %v2531_v25, %v1585_v7  ;;  %v1033_v27 = vsub.f32 %v2527_v52, %v1579_v41  ;;  %v2599_v47 = vsel %vm1023_vm7, %v983_v10, %v1025_v45 }
  0xfd   :  { %v2579_v3 = vsel %vm3126_vm13, %v980_v56, %v1015_v15  ;;  %v2587_v50 = vsel %vm1017_vm10, %v984_v12, %v1021_v35  ;;  %v2603_v23 = vsel %vm1023_vm7, %v984_v12, %v1027_v20  ;;  %v1036_v60 = vsub.f32 %v2539_v1, %v1585_v7 }
  0xfe   :  { %v1038_v0 = vsub.f32 %v2535_v54, %v1579_v41  ;;  %v1032_v28 = vmul.f32 %v1031_v8, %v1724_v63  ;;  %v1034_v26 = vmul.f32 %v1033_v27, %v1729_v18  ;;  %v1041_v19 = vsub.f32 %v2555_v44, %v1585_v7 }
  0xff   :  { %v1043_v46 = vsub.f32 %v2551_v43, %v1579_v41  ;;  %v1037_v38 = vmul.f32 %v1036_v60, %v1724_v63  ;;  %v1046_v22 = vsub.f32 %v2563_v16, %v1585_v7  ;;  %v1048_v30 = vsub.f32 %v2559_v31, %v1579_v41 }
 0x100   :  { %v1039_v9 = vmul.f32 %v1038_v0, %v1729_v18  ;;  %v2621_v42 = vsub.f32 %v1032_v28, %v1034_v26  ;;  %v1042_v14 = vmul.f32 %v1041_v19, %v1724_v63  ;;  %v1051_v61 = vsub.f32 %v2579_v3, %v1585_v7 }
 0x101   :  { %v1044_v2 = vmul.f32 %v1043_v46, %v1729_v18  ;;  %v1047_v49 = vmul.f32 %v1046_v22, %v1724_v63  ;;  %v1049_v29 = vmul.f32 %v1048_v30, %v1729_v18  ;;  %v1053_v6 = vsub.f32 %v2575_v34, %v1579_v41 }
 0x102   :  { %v2627_v62 = vsub.f32 %v1037_v38, %v1039_v9  ;;  %v1052_v33 = vmul.f32 %v1051_v61, %v1724_v63  ;;  %v1056_v57 = vsub.f32 %v2587_v50, %v1585_v7  ;;  %v1058_v5 = vsub.f32 %v2583_v37, %v1579_v41 }
 0x103   :  { %v2633_v13 = vsub.f32 %v1042_v14, %v1044_v2  ;;  %v2640_v11 = vsub.f32 %v1047_v49, %v1049_v29  ;;  %v1054_v55 = vmul.f32 %v1053_v6, %v1729_v18  ;;  %v1061_v56 = vsub.f32 %v2603_v23, %v1585_v7 }
 0x104   :  { %v1063_v10 = vsub.f32 %v2599_v47, %v1579_v41  ;;  %v1057_v12 = vmul.f32 %v1056_v57, %v1724_v63  ;;  %v1059_v21 = vmul.f32 %v1058_v5, %v1729_v18  ;;  %vm1066_vm1 = vcmp.ge.f32.partialorder %v2621_v42, 0.0 }
 0x105   :  { %vm3067_vm8 = vcmp.ge.f32.partialorder %v2627_v62, 0.0  ;;  %v2651_v58 = vsub.f32 %v1052_v33, %v1054_v55  ;;  %v1062_v40 = vmul.f32 %v1061_v56, %v1724_v63  ;;  %vm3066_vm10 = vcmp.ge.f32.partialorder %v2633_v13, 0.0  ;;  %vm1176_vm7 = vmxor %vm1066_vm1, %vm3127_vm4 }
 0x106   :  { %v1064_v4 = vmul.f32 %v1063_v10, %v1729_v18  ;;  %v2659_v41 = vsub.f32 %v1057_v12, %v1059_v21  ;;  %vm1069_vm14 = vcmp.ge.f32.partialorder %v2640_v11, 0.0  ;;  %v1081_v7 = vsub.f32 %v2527_v52, %v2599_v47  ;;  %vm2668_vm12 = vmand %vm1176_vm7, %vm3067_vm8 }
 0x107   :  { %v1084_v32 = vsub.f32 %v2531_v25, %v2603_v23  ;;  %vm3070_vm0 = vcmp.ge.f32.partialorder %v2651_v58, 0.0  ;;  %v1087_v48 = vsub.f32 %v2621_v42, %v2627_v62  ;;  %v1095_v53 = vsub.f32 %v2535_v54, %v2527_v52  ;;  %vm1181_vm6 = vmxor %vm3067_vm8, %vm3127_vm4 }
 0x108   :  { %v2672_v18 = vsub.f32 %v1062_v40, %v1064_v4  ;;  %vm3069_vm9 = vcmp.ge.f32.partialorder %v2659_v41, 0.0  ;;  %v1098_v59 = vsub.f32 %v2539_v1, %v2531_v25  ;;  %v1101_v24 = vsub.f32 %v2627_v62, %v2633_v13  ;;  %vm2691_vm5 = vmand %vm1181_vm6, %vm3066_vm10 }
 0x109   :  { %v1109_v36 = vsub.f32 %v2551_v43, %v2535_v54  ;;  %v1088_v51 = vand.u32 2147483647, %v1087_v48  ;;  %vm1090_vm2 = vcmp.lt.f32.partialorder %v1087_v48, 0.0  ;;  %vm2701_vm11 = vmxor %vm3066_vm10, %vm3127_vm4  ;;  %v1112_v8 = vsub.f32 %v2555_v44, %v2539_v1 }
 0x10a   :  { %vm3068_vm3 = vcmp.ge.f32.partialorder %v2672_v18, 0.0  ;;  %v1073_v15 = vsub.f32 %v2672_v18, %v2621_v42  ;;  %v1091_v45 = vsel %vm1090_vm2, -1e-12, %v1436_v17  ;;  %v1102_v20 = vand.u32 2147483647, %v1101_v24  ;;  %vm2725_vm8 = vmand %vm2701_vm11, %vm1069_vm14 }
 0x10b   :  { %vm1104_vm15 = vcmp.lt.f32.partialorder %v1101_v24, 0.0  ;;  %vm1171_vm13 = vmxor %vm3068_vm3, %vm3127_vm4  ;;  %vm1089_vm6 = vcmp.lt.f32.partialorder %v1088_v51, 1e-12  ;;  %v1115_v60 = vsub.f32 %v2633_v13, %v2640_v11  ;;  %v1123_v30 = vsub.f32 %v2559_v31, %v2551_v43 }
 0x10c   :  { %v1074_v27 = vand.u32 2147483647, %v1073_v15  ;;  %vm1076_vm7 = vcmp.lt.f32.partialorder %v1073_v15, 0.0  ;;  %vm2715_vm10 = vmand %vm1171_vm13, %vm1066_vm1  ;;  %v1092_v26 = vsel %vm1089_vm6, %v1091_v45, %v1087_v48  ;;  %vm1103_vm2 = vcmp.lt.f32.partialorder %v1102_v20, 1e-12 }
 0x10d   :  { %v1077_v28 = vsel %vm1076_vm7, -1e-12, %v1436_v17  ;;  %v1105_v19 = vsel %vm1104_vm15, -1e-12, %v1436_v17  ;;  %1407 = vrcp.f32 %v1092_v26  ;;  %v1116_v9 = vand.u32 2147483647, %v1115_v60  ;;  %vm1191_vm13 = vmxor %vm1069_vm14, %vm3127_vm4 }
 0x10e   :  { %vm1075_vm3 = vcmp.lt.f32.partialorder %v1074_v27, 1e-12  ;;  %v1106_v38 = vsel %vm1103_vm2, %v1105_v19, %v1101_v24  ;;  %vm1118_vm7 = vcmp.lt.f32.partialorder %v1115_v60, 0.0  ;;  %vm2736_vm11 = vmand %vm1191_vm13, %vm3070_vm0  ;;  %v1126_v61 = vsub.f32 %v2563_v16, %v2555_v44 }
 0x10f   :  { %v1078_v22 = vsel %vm1075_vm3, %v1077_v28, %v1073_v15  ;;  %1409 = vrcp.f32 %v1106_v38  ;;  %vm1117_vm15 = vcmp.lt.f32.partialorder %v1116_v9, 1e-12  ;;  %v1119_v2 = vsel %vm1118_vm7, -1e-12, %v1436_v17  ;;  %vm1196_vm3 = vmxor %vm3070_vm0, %vm3127_vm4 }
 0x110   :  { %1411 = vrcp.f32 %v1078_v22  ;;  %v1120_v49 = vsel %vm1117_vm15, %v1119_v2, %v1115_v60  ;;  %v1129_v29 = vsub.f32 %v2640_v11, %v2651_v58  ;;  %v1137_v6 = vsub.f32 %v2575_v34, %v2559_v31  ;;  %vm2754_vm6 = vmand %vm1196_vm3, %vm3069_vm9 }
 0x111   :  { %v1140_v33 = vsub.f32 %v2579_v3, %v2563_v16  ;;  %1413 = vrcp.f32 %v1120_v49  ;;  %v1143_v5 = vsub.f32 %v2651_v58, %v2659_v41  ;;  %v1151_v55 = vsub.f32 %v2583_v37, %v2575_v34  ;;  %vm1201_vm2 = vmxor %vm3069_vm9, %vm3127_vm4 }
 0x112   :  { %v1154_v56 = vsub.f32 %v2587_v50, %v2579_v3  ;;  %v1130_v10 = vand.u32 2147483647, %v1129_v29  ;;  %vm1132_vm13 = vcmp.lt.f32.partialorder %v1129_v29, 0.0  ;;  %v1157_v12 = vsub.f32 %v2659_v41, %v2672_v18 }
 0x113   :  { %v1165_v21 = vsub.f32 %v2599_v47, %v2583_v37  ;;  %vm3142_vm7 = vcmp.ge.f32.partialorder %v2672_v18, 0.0  ;;  %v1133_v4 = vsel %vm1132_vm13, -1e-12, %v1436_v17  ;;  %v1144_v48 = vand.u32 2147483647, %v1143_v5 }
 0x114   :  { %vm2773_vm15 = vmand %vm1201_vm2, %vm3142_vm7  ;;  %vm1146_vm3 = vcmp.lt.f32.partialorder %v1143_v5, 0.0  ;;  %v1168_v24 = vsub.f32 %v2603_v23, %v2587_v50  ;;  %vm1131_vm4 = vcmp.lt.f32.partialorder %v1130_v10, 1e-12  ;;  %v1158_v51 = vand.u32 2147483647, %v1157_v12 }
 0x115   :  { %v1147_v15 = vsel %vm1146_vm3, -1e-12, %v1436_v17  ;;  %v1134_v35 = vsel %vm1131_vm4, %v1133_v4, %v1129_v29  ;;  %vm1145_vm9 = vcmp.lt.f32.partialorder %v1144_v48, 1e-12  ;;  %vm1160_vm0 = vcmp.lt.f32.partialorder %v1157_v12, 0.0 }
 0x116   :  { %v1440_v45 = vmov 7.0   ;;  %1415 = vrcp.f32 %v1134_v35  ;;  %v1148_v27 = vsel %vm1145_vm9, %v1147_v15, %v1143_v5  ;;  %vm1159_vm2 = vcmp.lt.f32.partialorder %v1158_v51, 1e-12 }
 0x117   :  { %v1175_v20 = vsel %vm2715_vm10, 0.0, %v1440_v45  ;;  %v1161_v60 = vsel %vm1160_vm0, -1e-12, %v1436_v17  ;;  %v1408_v28 = vpop.eup %1407  ;;  %1417 = vrcp.f32 %v1148_v27 }
 0x118   :  { %v1162_v26 = vsel %vm1159_vm2, %v1161_v60, %v1157_v12  ;;  %v1180_v19 = vsel %vm2668_vm12, 1.0, %v1175_v20  ;;  %v1094_v9 = vmul.f32 %v1408_v28, %v2621_v42 }
 0x119   :  { %v1410_v38 = vpop.eup %1409  ;;  %1419 = vrcp.f32 %v1162_v26  ;;  %v1185_v22 = vsel %vm2691_vm5, 2.0, %v1180_v19 }
 0x11a   :  { %v1412_v2 = vpop.eup %1411  ;;  %v1108_v49 = vmul.f32 %v1410_v38, %v2627_v62  ;;  %v1190_v29 = vsel %vm2725_vm8, 3.0, %v1185_v22  ;;  %v1096_v5 = vmul.f32 %v1095_v53, %v1094_v9  ;;  %v1099_v10 = vmul.f32 %v1098_v59, %v1094_v9 }
 0x11b   :  { %v1080_v17 = vmul.f32 %v1412_v2, %v2672_v18  ;;  %v1195_v12 = vsel %vm2736_vm11, 4.0, %v1190_v29  ;;  %v1414_v4 = vpop.eup %1413 }
 0x11c   :  { %v1110_v48 = vmul.f32 %v1109_v36, %v1108_v49  ;;  %v1113_v15 = vmul.f32 %v1112_v8, %v1108_v49  ;;  %v1200_v51 = vsel %vm2754_vm6, 5.0, %v1195_v12  ;;  %v1097_v35 = vadd.f32 %v1096_v5, %v2527_v52 }
 0x11d   :  { %v1082_v53 = vmul.f32 %v1081_v7, %v1080_v17  ;;  %v1085_v59 = vmul.f32 %v1084_v32, %v1080_v17  ;;  %v1100_v45 = vadd.f32 %v1099_v10, %v2531_v25  ;;  %v1122_v8 = vmul.f32 %v1414_v4, %v2633_v13 }
 0x11e   :  { %v1111_v36 = vadd.f32 %v1110_v48, %v2535_v54  ;;  %v1114_v20 = vadd.f32 %v1113_v15, %v2539_v1  ;;  %v2822_v27 = vsel %vm2773_vm15, 6.0, %v1200_v51 }
 0x11f   :  { %v1083_v7 = vadd.f32 %v1082_v53, %v2599_v47  ;;  %v1086_v60 = vadd.f32 %v1085_v59, %v2603_v23  ;;  %v1124_v32 = vmul.f32 %v1123_v30, %v1122_v8  ;;  %v1127_v28 = vmul.f32 %v1126_v61, %v1122_v8 }
 0x120   :  { %v1416_v26 = vpop.eup %1415  ;;  %vm1243_vm0 = vcmp.gt.f32.partialorder %v2822_v27, 1.0  ;;  %vm1244_vm9 = vcmp.eq.f32.partialorder %v2822_v27, 1.0  ;;  %vm1256_vm13 = vcmp.eq.f32.partialorder %v2822_v27, 3.0  ;;  %vm1249_vm3 = vcmp.gt.f32.partialorder %v2822_v27, 2.0 }
 0x121   :  { %v1173_v19 = vsel %vm2715_vm10, %v1083_v7, 0.0  ;;  %v1174_v38 = vsel %vm2715_vm10, %v1086_v60, 0.0  ;;  %v1418_v9 = vpop.eup %1417  ;;  %v1125_v22 = vadd.f32 %v1124_v32, %v2551_v43  ;;  %v1128_v2 = vadd.f32 %v1127_v28, %v2555_v44 }
 0x122   :  { %v1136_v49 = vmul.f32 %v1416_v26, %v2640_v11  ;;  %v1178_v30 = vsel %vm2668_vm12, %v1097_v35, %v1173_v19  ;;  %v1150_v61 = vmul.f32 %v1418_v9, %v2651_v58  ;;  %v1179_v17 = vsel %vm2668_vm12, %v1100_v45, %v1174_v38 }
 0x123   :  { %v1420_v29 = vpop.eup %1419  ;;  %v1183_v0 = vsel %vm2691_vm5, %v1111_v36, %v1178_v30  ;;  %v1184_v4 = vsel %vm2691_vm5, %v1114_v20, %v1179_v17  ;;  %vm1238_vm10 = vcmp.eq.f32.partialorder %v2822_v27, 0.0  ;;  %vm1237_vm12 = vcmp.gt.f32.partialorder %v2822_v27, 0.0  ;;  %vm3145_vm5 = vmmov %vm3142_vm7 }
 0x124   :  { %v1138_v5 = vmul.f32 %v1137_v6, %v1136_v49  ;;  %v1141_v10 = vmul.f32 %v1140_v33, %v1136_v49  ;;  %v1164_v12 = vmul.f32 %v1420_v29, %v2659_v41  ;;  %v1152_v63 = vmul.f32 %v1151_v55, %v1150_v61 }
 0x125   :  { %v1155_v48 = vmul.f32 %v1154_v56, %v1150_v61  ;;  %v1188_v6 = vsel %vm2725_vm8, %v1125_v22, %v1183_v0  ;;  %v1189_v15 = vsel %vm2725_vm8, %v1128_v2, %v1184_v4  ;;  %vm1206_vm8 = vcmp.lt.f32.partialorder %v2822_v27, 7.0 }
 0x126   :  { %v1139_v33 = vadd.f32 %v1138_v5, %v2559_v31  ;;  %v1142_v51 = vadd.f32 %v1141_v10, %v2563_v16  ;;  %v1166_v39 = vmul.f32 %v1165_v21, %v1164_v12  ;;  %v1169_v55 = vmul.f32 %v1168_v24, %v1164_v12 }
 0x127   :  { %v1153_v56 = vadd.f32 %v1152_v63, %v2575_v34  ;;  %v1156_v53 = vadd.f32 %v1155_v48, %v2579_v3  ;;  %vm3147_vm7 = vcmp.ge.f32.partialorder %v2627_v62, 0.0 }
 0x128   :  { %v1167_v59 = vadd.f32 %v1166_v39, %v2583_v37  ;;  %v1170_v46 = vadd.f32 %v1169_v55, %v2587_v50  ;;  %v1193_v8 = vsel %vm2736_vm11, %v1139_v33, %v1188_v6  ;;  %v1194_v32 = vsel %vm2736_vm11, %v1142_v51, %v1189_v15  ;;  %vm3146_vm11 = vmmov %vm3145_vm5 }
 0x129   :  { %v1198_v21 = vsel %vm2754_vm6, %v1153_v56, %v1193_v8  ;;  %v1199_v24 = vsel %vm2754_vm6, %v1156_v53, %v1194_v32  ;;  %vm1250_vm6 = vcmp.eq.f32.partialorder %v2822_v27, 2.0  ;;  %vm3149_vm2 = vmmov %vm3147_vm7 }
 0x12a   :  { %v1203_v28 = vsel %vm2773_vm15, %v1167_v59, %v1198_v21  ;;  %v1204_v26 = vsel %vm2773_vm15, %v1170_v46, %v1199_v24  ;;  %vm3148_vm15 = vmmov %vm3147_vm7 }
 0x12b   :  { %v1207_v14 = vsel %vm3145_vm5, %v1083_v7, %v1203_v28  ;;  %v1208_v57 = vsel %vm3146_vm11, %v1086_v60, %v1204_v26  ;;  %v1211_v19 = vsel %vm1066_vm1, %v1097_v35, %v1203_v28  ;;  %v1212_v38 = vsel %vm1066_vm1, %v1100_v45, %v1204_v26  ;;  %vm3150_vm5 = vmmov %vm3149_vm2 }
 0x12c   :  { %v1209_v40 = vsel %vm1066_vm1, %v2527_v52, %v1207_v14  ;;  %v1210_v7 = vsel %vm1066_vm1, %v2531_v25, %v1208_v57  ;;  %v1213_v60 = vsel %vm3147_vm7, %v2535_v54, %v1211_v19  ;;  %v1214_v35 = vsel %vm3148_vm15, %v2539_v1, %v1212_v38 }
 0x12d   :  { %v1215_v45 = vsel %vm3149_vm2, %v1111_v36, %v1203_v28  ;;  %v1216_v52 = vsel %vm3150_vm5, %v1114_v20, %v1204_v26  ;;  %vm3151_vm1 = vcmp.ge.f32.partialorder %v2633_v13, 0.0  ;;  %v1223_v20 = vsel %vm1069_vm14, %v1139_v33, %v1203_v28 }
 0x12e   :  { %v1219_v25 = vsel %vm3151_vm1, %v1125_v22, %v1203_v28  ;;  %vm3152_vm11 = vmmov %vm3151_vm1  ;;  %vm3155_vm5 = vcmp.ge.f32.partialorder %v2651_v58, 0.0  ;;  %vm1268_vm2 = vcmp.eq.f32.partialorder %v2822_v27, 5.0  ;;  %vm1274_vm7 = vcmp.eq.f32.partialorder %v2822_v27, 6.0 }
 0x12f   :  { %v1220_v54 = vsel %vm3152_vm11, %v1128_v2, %v1204_v26  ;;  %vm3153_vm15 = vmmov %vm3151_vm1  ;;  %v1221_v62 = vsel %vm1069_vm14, %v2559_v31, %v1219_v25  ;;  %v1227_v13 = vsel %vm3155_vm5, %v1153_v56, %v1203_v28 }
 0x130   :  { %v1217_v1 = vsel %vm3153_vm15, %v2551_v43, %v1215_v45  ;;  %vm3154_vm4 = vmmov %vm3151_vm1  ;;  %v1222_v36 = vsel %vm1069_vm14, %v2563_v16, %v1220_v54  ;;  %v1224_v43 = vsel %vm1069_vm14, %v1142_v51, %v1204_v26  ;;  %vm3159_vm15 = vcmp.ge.f32.partialorder %v2659_v41, 0.0 }
 0x131   :  { %v1218_v42 = vsel %vm3154_vm4, %v2555_v44, %v1216_v52  ;;  %vm3156_vm4 = vmmov %vm3155_vm5  ;;  %v1229_v9 = vsel %vm3159_vm15, %v2583_v37, %v1227_v13 }
 0x132   :  { %v1228_v44 = vsel %vm3156_vm4, %v1156_v53, %v1204_v26  ;;  %vm3157_vm1 = vmmov %vm3156_vm4 }
 0x133   :  { %v1225_v31 = vsel %vm3157_vm1, %v2575_v34, %v1223_v20  ;;  %vm3158_vm11 = vmmov %vm3157_vm1  ;;  %vm1267_vm1 = vcmp.gt.f32.partialorder %v2822_v27, 5.0 }
 0x134   :  { %v1226_v16 = vsel %vm3158_vm11, %v2579_v3, %v1224_v43  ;;  %vm3160_vm14 = vmmov %vm3159_vm15  ;;  %vm3163_vm11 = vcmp.ge.f32.partialorder %v2672_v18, 0.0 }
 0x135   :  { %v1230_v11 = vsel %vm3160_vm14, %v2587_v50, %v1228_v44  ;;  %vm3161_vm5 = vmmov %vm3160_vm14  ;;  %vm1273_vm14 = vcmp.gt.f32.partialorder %v2822_v27, 6.0 }
 0x136   :  { %v1231_v22 = vsel %vm3161_vm5, %v1167_v59, %v1203_v28  ;;  %vm3162_vm4 = vmmov %vm3161_vm5  ;;  %vm1279_vm5 = vcmp.gt.f32.partialorder %v2822_v27, 7.0 }
 0x137   :  { %v1232_v2 = vsel %vm3162_vm4, %v1170_v46, %v1204_v26  ;;  %v1233_v34 = vsel %vm3163_vm11, %v2599_v47, %v1231_v22  ;;  %vm3164_vm15 = vmmov %vm3163_vm11  ;;  %vm1280_vm4 = vcmp.eq.f32.partialorder %v2822_v27, 7.0 }
 0x138   :  { %v1234_v3 = vsel %vm3164_vm15, %v2603_v23, %v1232_v2  ;;  %v1235_v37 = vsel %vm1206_vm8, %v1203_v28, %v1233_v34 }
 0x139   :  { %v1236_v50 = vsel %vm1206_vm8, %v1204_v26, %v1234_v3  ;;  %v1239_v47 = vsel %vm1238_vm10, %v1235_v37, %v1233_v34  ;;  %v1245_v58 = vsel %vm1244_vm9, %v1235_v37, %v1209_v40  ;;  %v1251_v61 = vsel %vm1250_vm6, %v1235_v37, %v1213_v60 }
 0x13a   :  { %v1241_v23 = vsel %vm1238_vm10, %v1236_v50, %v1234_v3  ;;  %v1247_v41 = vsel %vm1244_vm9, %v1236_v50, %v1210_v7  ;;  %v1240_v18 = vsel %vm1237_vm12, %v1209_v40, %v1239_v47  ;;  %v1246_v30 = vsel %vm1243_vm0, %v1213_v60, %v1245_v58  ;;  %v1428_v58 = vld [vmem:[%s3060_s1 + $0x18] sm:$0xff] }
 0x13b   :  { %v1242_v49 = vsel %vm1237_vm12, %v1210_v7, %v1241_v23  ;;  %v1248_v29 = vsel %vm1243_vm0, %v1214_v35, %v1247_v41  ;;  %v1253_v17 = vsel %vm1250_vm6, %v1236_v50, %v1214_v35  ;;  %v1257_v0 = vsel %vm1256_vm13, %v1235_v37, %v1217_v1  ;;  %v1427_v23 = vld [vmem:[%s3060_s1 + $0x10] sm:$0xff] }
 0x13c   :  { %v1259_v5 = vsel %vm1256_vm13, %v1236_v50, %v1218_v42  ;;  %v1252_v10 = vsel %vm1249_vm3, %v1217_v1, %v1251_v61  ;;  %v1254_v12 = vsel %vm1249_vm3, %v1218_v42, %v1253_v17  ;;  %vm3165_vm8 = vcmp.gt.f32.partialorder %v2822_v27, 3.0 }
 0x13d   :  { %v1258_v4 = vsel %vm3165_vm8, %v1221_v62, %v1257_v0  ;;  %vm3166_vm10 = vmmov %vm3165_vm8  ;;  %vm3167_vm12 = vcmp.eq.f32.partialorder %v2822_v27, 4.0  ;;  %v1269_v15 = vsel %vm1268_vm2, %v1235_v37, %v1225_v31  ;;  %v1271_v33 = vsel %vm1268_vm2, %v1236_v50, %v1226_v16 }
 0x13e   :  { %v1260_v63 = vsel %vm3166_vm10, %v1222_v36, %v1259_v5  ;;  %v1263_v48 = vsel %vm3167_vm12, %v1235_v37, %v1221_v62  ;;  %vm3168_vm0 = vmmov %vm3167_vm12  ;;  %vm3169_vm9 = vcmp.gt.f32.partialorder %v2822_v27, 4.0  ;;  %v1270_v55 = vsel %vm1267_vm1, %v1229_v9, %v1269_v15 }
 0x13f   :  { %v1265_v6 = vsel %vm3168_vm0, %v1236_v50, %v1222_v36  ;;  %v1264_v51 = vsel %vm3169_vm9, %v1225_v31, %v1263_v48  ;;  %vm3170_vm6 = vmmov %vm3169_vm9  ;;  %v1272_v56 = vsel %vm1267_vm1, %v1230_v11, %v1271_v33  ;;  %v1275_v53 = vsel %vm1274_vm7, %v1235_v37, %v1229_v9 }
 0x140   :  { %v1266_v39 = vsel %vm3170_vm6, %v1226_v16, %v1265_v6  ;;  %v1277_v59 = vsel %vm1274_vm7, %v1236_v50, %v1230_v11  ;;  %v1281_v46 = vsel %vm1280_vm4, %v1235_v37, %v1233_v34  ;;  %v1283_v8 = vsel %vm1280_vm4, %v1236_v50, %v1234_v3  ;;  %v1425_v37 = vld [vmem:[%s3059_s0 + $0x10] sm:$0xff]  ;;  %v1426_v50 = vld [vmem:[%s3059_s0 + $0x18] sm:$0xff] }
 0x141   :  { %v1276_v32 = vsel %vm1273_vm14, %v1233_v34, %v1275_v53  ;;  %v1278_v21 = vsel %vm1273_vm14, %v1234_v3, %v1277_v59  ;;  %v1282_v24 = vsel %vm1279_vm5, %v1233_v34, %v1281_v46  ;;  %v1284_v28 = vsel %vm1279_vm5, %v1234_v3, %v1283_v8 }
 0x142   :  { %v1285_v26 = vmul.f32 %v1282_v24, %v1242_v49  ;;  %v1286_v14 = vmul.f32 %v1284_v28, %v1240_v18  ;;  %v1288_v57 = vmul.f32 %v1248_v29, %v1240_v18  ;;  %v1289_v19 = vmul.f32 %v1246_v30, %v1242_v49 }
 0x143   :  { %v1292_v38 = vmul.f32 %v1254_v12, %v1246_v30  ;;  %v1293_v40 = vmul.f32 %v1252_v10, %v1248_v29  ;;  %v1296_v7 = vmul.f32 %v1260_v63, %v1252_v10  ;;  %v1297_v60 = vmul.f32 %v1258_v4, %v1254_v12 }
 0x144   :  { %v1287_v35 = vsub.f32 %v1285_v26, %v1286_v14  ;;  %v1290_v45 = vsub.f32 %v1288_v57, %v1289_v19  ;;  %v1300_v52 = vmul.f32 %v1266_v39, %v1258_v4  ;;  %v1301_v25 = vmul.f32 %v1264_v51, %v1260_v63 }
 0x145   :  { %v1294_v54 = vsub.f32 %v1292_v38, %v1293_v40  ;;  %v1298_v1 = vsub.f32 %v1296_v7, %v1297_v60  ;;  %v1304_v42 = vmul.f32 %v1272_v56, %v1264_v51  ;;  %v1305_v62 = vmul.f32 %v1270_v55, %v1266_v39 }
 0x146   :  { %v1291_v36 = vadd.f32 %v1290_v45, %v1287_v35  ;;  %v1302_v20 = vsub.f32 %v1300_v52, %v1301_v25  ;;  %v1308_v27 = vmul.f32 %v1278_v21, %v1270_v55  ;;  %v1309_v43 = vmul.f32 %v1276_v32, %v1272_v56 }
 0x147   :  { %v1306_v13 = vsub.f32 %v1304_v42, %v1305_v62  ;;  %v1312_v44 = vmul.f32 %v1284_v28, %v1276_v32  ;;  %v1313_v31 = vmul.f32 %v1282_v24, %v1278_v21  ;;  %v1318_v47 = vmul.f32 %v1426_v50, %v1425_v37 }
 0x148   :  { %v1295_v16 = vadd.f32 %v1294_v54, %v1291_v36  ;;  %v1310_v9 = vsub.f32 %v1308_v27, %v1309_v43  ;;  %v1319_v41 = vmul.f32 %v1428_v58, %v1427_v23 }
 0x149   :  { %v1314_v11 = vsub.f32 %v1312_v44, %v1313_v31 }
 0x14a   :  { %v1299_v22 = vadd.f32 %v1298_v1, %v1295_v16  ;;  %v1320_v30 = vadd.f32 %v1319_v41, %v1318_v47 }
 0x14c   :  { %v1303_v2 = vadd.f32 %v1302_v20, %v1299_v22 }
 0x14e   :  { %v1307_v34 = vadd.f32 %v1306_v13, %v1303_v2 }
 0x150   :  { %v1311_v3 = vadd.f32 %v1310_v9, %v1307_v34 }
 0x152   :  { %v1315_v18 = vadd.f32 %v1314_v11, %v1311_v3 }
 0x154   :  { %v1316_v49 = vand.u32 2147483647, %v1315_v18 }
 0x156   :  { %v1317_v29 = vmul.f32 0.5, %v1316_v49 }
 0x158   :  { %v1321_v61 = vsub.f32 %v1320_v30, %v1317_v29 }
 0x15a   :  { %1421 = vrcp.f32 %v1321_v61 }
 0x164   :  { %v1422_v17 = vpop.eup %1421 }
 0x165   :  { %v1323_v0 = vmul.f32 %v1422_v17, %v1317_v29 }
 0x167   :  { %v1324_v5 = vmax.f32 %v1323_v0, 1e-06 }
 0x169   :  { %1423 = vlog2.f32 %v1324_v5 }
 0x173   :  { %v1424_v10 = vpop.eup %1423 }
 0x174   :  { %v1326_v12 = vmul.f32 0.6931472, %v1424_v10 }
 0x176   :  { %v1327_v4 = vsub.f32 0.0, %v1326_v12 }
 0x178   :  { %1328 = vst [vmem:[%s3061_s2] sm:$0xff] %v1327_v4 }

</bundles_post_ra>
